<compile_context>
chip_gen: v7x
topology: tpu7x:2x2x1
jax: 0.10.0
libtpu: 0.0.40
codegen_flags: <defaults>
</compile_context>

<pallas_src>
import functools
import math

import jax
import jax.numpy as jnp
from jax.experimental import pallas as pl
from jax.experimental.pallas import tpu as pltpu

D = 768            # BERT hidden size (fixed by the module: Linear(768, ...))
H = 64             # switch / cls hidden size
H2 = 2 * H         # 128: lane-dense packed head width (a-head cols 0:H, c-head cols H:2H)
N_ACT = 4          # action classes
N_CMP = 5          # component classes
OUTW = 128         # lane-dense packed output width (cols 0:4 action, 4:9 component, rest 0)
LN_EPS = 1e-5
TM_TARGET = 512    # target rows per grid step (multiple of 256 -> full MXU tiles on v6e/v7x, 128 on v5e)
VMEM_LIMIT = 48 * 1024 * 1024   # explicit scoped-VMEM budget for the larger tile (fits v7x 64 MiB)


# ----------------------------- small in-kernel helpers -----------------------------

def _elu(x):
    # exact ELU; clamp the exp argument so the non-selected branch cannot produce inf
    return jnp.where(x > 0, x, jnp.exp(jnp.minimum(x, 0.0)) - 1.0)


def _layernorm(x, gamma, beta, eps=LN_EPS):
    mu = jnp.mean(x, axis=-1, keepdims=True)
    var = jnp.mean((x - mu) ** 2, axis=-1, keepdims=True)
    return (x - mu) * jax.lax.rsqrt(var + eps) * gamma + beta


def _dual_layernorm(h, gamma, beta, half, eps=LN_EPS):
    # LayerNorm(half) applied independently to columns [0:half] and [half:2*half] of a
    # lane-dense (N, 2*half) slab (keeps both heads' 64-wide hiddens in one 128-lane tile).
    cols = jax.lax.broadcasted_iota(jnp.int32, h.shape, 1)
    left = cols < half
    inv = 1.0 / float(half)
    sum_l = jnp.sum(jnp.where(left, h, 0.0), axis=-1, keepdims=True)
    sum_r = jnp.sum(jnp.where(left, 0.0, h), axis=-1, keepdims=True)
    mean = jnp.where(left, sum_l, sum_r) * inv
    d = h - mean
    d2 = d * d
    var_l = jnp.sum(jnp.where(left, d2, 0.0), axis=-1, keepdims=True)
    var_r = jnp.sum(jnp.where(left, 0.0, d2), axis=-1, keepdims=True)
    var = jnp.where(left, var_l, var_r) * inv
    return d * jax.lax.rsqrt(var + eps) * gamma + beta


# ----------------------------- fused encoder + heads kernel -----------------------------

def _make_fused_kernel(NB, L):
    TM = NB * L

    def kernel(x_ref, mask_ref, w_enc_ref, enc_vec_ref,
               w_sw1_ref, w_sw2_ref, w_cls1_ref, w_cls2_ref, head_vec_ref,
               out_ref):
        # ---- synthetic encoder: one (TM,768)@(768,768) bf16 MXU matmul over NB sequences ----
        x_bf = x_ref[0]                                                       # (TM, D) bf16
        ff = jnp.dot(x_bf, w_enc_ref[:, :D], preferred_element_type=jnp.float32)
        # TODO(synk): tanh-approx GELU (exact-erf GELU of real BERT not guaranteed in Mosaic)
        ff = jax.nn.gelu(ff + enc_vec_ref[0:1, :], approximate=True)
        h = _layernorm(x_bf.astype(jnp.float32) + ff,
                       enc_vec_ref[1:2, :], enc_vec_ref[2:3, :])              # seq_emb (TM, D) f32

        se3 = h.reshape(NB, L, D)
        # tanh CLS pooler: CLS row (row 0) of each sequence, sliced out of the tile (no one-hot matmul).
        cls = se3[:, 0:1, :].reshape(NB, D)
        ctx = jnp.tanh(jnp.dot(cls.astype(jnp.bfloat16), w_enc_ref[:, D:],
                               preferred_element_type=jnp.float32)
                       + enc_vec_ref[3:4, :])                                 # (NB, D)

        # ---- attention logits on VPU/XLU (keeps the N=2 matmul off the MXU) ----
        la = jnp.sum(h * enc_vec_ref[4:5, :], axis=-1, keepdims=True)         # (TM, 1)
        lc = jnp.sum(h * enc_vec_ref[5:6, :], axis=-1, keepdims=True)         # (TM, 1)
        lg3 = (jnp.concatenate([la, lc], axis=-1) + mask_ref[0]).reshape(NB, L, 2)
        m = jnp.max(lg3, axis=1, keepdims=True)
        e = jnp.exp(lg3 - m)
        soft = e * pl.reciprocal(jnp.sum(e, axis=1, keepdims=True), approx=True)
        inv_l = 1.0 / float(L)
        # PyTorch: softmax over seq dim, elementwise mul, mean over the FULL seq dim (/L).
        a_vec = jnp.sum(se3 * soft[:, :, 0:1], axis=1) * inv_l                # (NB, D)
        c_vec = jnp.sum(se3 * soft[:, :, 1:2], axis=1) * inv_l                # (NB, D)

        # ---- switch MLPs (lane-packed: cols 0:H == a_switch, cols H:2H == c_switch) ----
        hv = head_vec_ref[...]                                                # (8, 2H) f32
        cols = jax.lax.broadcasted_iota(jnp.int32, (NB, H2), 1)
        left = cols < H
        w_sw1_ctx = w_sw1_ref[:D, :]                                          # ctx rows of both switches
        w_sw1_pool = w_sw1_ref[D:, :]                                         # pooled rows of both switches
        h_ctx = jnp.dot(ctx.astype(jnp.bfloat16), w_sw1_ctx,
                        preferred_element_type=jnp.float32)                   # (NB, 2H)
        h_pa = jnp.dot(a_vec.astype(jnp.bfloat16), w_sw1_pool,
                       preferred_element_type=jnp.float32)                    # (NB, 2H)
        h_pc = jnp.dot(c_vec.astype(jnp.bfloat16), w_sw1_pool,
                       preferred_element_type=jnp.float32)                    # (NB, 2H)
        h_sw = _elu(h_ctx + jnp.where(left, h_pa, h_pc) + hv[0:1, :])
        h_sw = _dual_layernorm(h_sw, hv[1:2, :], hv[2:3, :], H)
        # w_sw2 is block-diagonal: col 0 only sees cols 0:H, col 1 only sees cols H:2H.
        sw = jax.nn.sigmoid(jnp.dot(h_sw.astype(jnp.bfloat16), w_sw2_ref[...],
                                    preferred_element_type=jnp.float32) + hv[3:4, 0:2])
        a_sw = sw[:, 0:1]
        c_sw = sw[:, 1:2]
        a_fin = (1.0 - a_sw) * a_vec + a_sw * ctx                             # (NB, D)
        c_fin = (1.0 - c_sw) * c_vec + c_sw * ctx                             # (NB, D)

        # ---- classification heads (lane-packed; block-diagonal w_cls2 emits one slab) ----
        h_a = jnp.dot(a_fin.astype(jnp.bfloat16), w_cls1_ref[...],
                      preferred_element_type=jnp.float32)                     # (NB, 2H)
        h_c = jnp.dot(c_fin.astype(jnp.bfloat16), w_cls1_ref[...],
                      preferred_element_type=jnp.float32)                     # (NB, 2H)
        h_cls = _elu(jnp.where(left, h_a, h_c))
        h_cls = _dual_layernorm(h_cls, hv[4:5, :], hv[5:6, :], H)
        res = jnp.dot(h_cls.astype(jnp.bfloat16), w_cls2_ref[...],
                      preferred_element_type=jnp.float32)                     # (NB, OUTW)
        out_ref[0] = res.astype(out_ref.dtype)

    return kernel


def _fused_call(x, mask, pk, NB, L, G):
    TM = NB * L
    kernel = _make_fused_kernel(NB, L)

    def full(arr):
        # grid-invariant weight slab, resident in VMEM for the whole call
        # TODO(synk): on v7x, pipeline_mode=pl.Buffered(1) on these would free ~3 MiB of dead
        # double-buffer VMEM; left at the default for maximum compile portability.
        nd = arr.ndim
        return pl.BlockSpec(arr.shape, lambda i, _nd=nd: (0,) * _nd)

    return pl.pallas_call(
        kernel,
        out_shape=jax.ShapeDtypeStruct((G, NB, OUTW), jnp.float32),
        grid=(G,),
        in_specs=[
            pl.BlockSpec((1, TM, D), lambda i: (i, 0, 0)),     # token embeddings (bf16, flattened rows)
            pl.BlockSpec((1, TM, 1), lambda i: (i, 0, 0)),     # additive mask (f32, one lane)
            full(pk["w_enc"]),                                  # (D, 2D) bf16: W_ff | W_pool
            full(pk["enc_vecs"]),                               # (8, D)  f32 : b_ff, ln_g, ln_b, b_pool, w_a, w_c
            full(pk["w_sw1"]),                                  # (2D,2H) bf16: a_switch | c_switch lin1
            full(pk["w_sw2"]),                                  # (2H, 2) bf16: block-diag lin2
            full(pk["w_cls1"]),                                 # (D, 2H) bf16: action | component lin1
            full(pk["w_cls2"]),                                 # (2H,128)bf16: block-diag lin2 (padded)
            full(pk["head_vecs"]),                              # (8, 2H) f32 : biases + LN params
        ],
        out_specs=pl.BlockSpec((1, NB, OUTW), lambda i: (i, 0, 0)),
        compiler_params=pltpu.CompilerParams(
            dimension_semantics=("parallel",),
            vmem_limit_bytes=VMEM_LIMIT,
        ),
    )(x, mask, pk["w_enc"], pk["enc_vecs"],
      pk["w_sw1"], pk["w_sw2"], pk["w_cls1"], pk["w_cls2"], pk["head_vecs"])


# ----------------------------- tiling choice -----------------------------

def _ceil_to(v, m):
    return -(-v // m) * m


def _choose_nb(B, L):
    """Sequences per grid step. Keeps TM = NB*L a multiple of 8, avoids padding tiny batches
    up to a full tile, and keeps >= 2 grid steps (v7x megacore) whenever the batch allows it."""
    step = 8 // math.gcd(L, 8)                      # smallest NB with (NB*L) % 8 == 0
    nb = max(1, TM_TARGET // max(1, L))
    nb = max(step, (nb // step) * step)             # sublane-aligned tile near TM_TARGET
    nb = min(nb, _ceil_to(B, step))                 # don't blow tiny batches up to a full tile
    if -(-B // nb) == 1 and B >= 2 * step:
        nb = _ceil_to(-(-B // 2), step)             # split into >= 2 grid steps for megacore
    return nb


# ----------------------------- parameters (deterministic) -----------------------------

def init_params(key, vocab=100):
    ks = iter(jax.random.split(key, 24))
    n = lambda shape, s=0.02: jax.random.normal(next(ks), shape, jnp.float32) * s
    return {
        # synthetic BERT stand-in
        "emb": n((vocab, D)),
        "w_ff": n((D, D)), "b_ff": jnp.zeros((D,), jnp.float32),
        "ln_g": jnp.ones((D,), jnp.float32), "ln_b": jnp.zeros((D,), jnp.float32),
        "w_pool": n((D, D)), "b_pool": jnp.zeros((D,), jnp.float32),
        # a_attn / c_attn : Linear(768, 1, bias=False)
        "w_a": n((D, 1)), "w_c": n((D, 1)),
        # a_switch / c_switch: Linear(1536,64)+b -> ELU -> LayerNorm(64) -> Linear(64,1)+b -> Sigmoid
        "w_as1": n((2 * D, H)), "b_as1": jnp.zeros((H,), jnp.float32),
        "g_as": jnp.ones((H,), jnp.float32), "be_as": jnp.zeros((H,), jnp.float32),
        "w_as2": n((H, 1)), "b_as2": jnp.zeros((1,), jnp.float32),
        "w_cs1": n((2 * D, H)), "b_cs1": jnp.zeros((H,), jnp.float32),
        "g_cs": jnp.ones((H,), jnp.float32), "be_cs": jnp.zeros((H,), jnp.float32),
        "w_cs2": n((H, 1)), "b_cs2": jnp.zeros((1,), jnp.float32),
        # action / component cls: Linear(768,64,no bias) -> ELU -> LayerNorm(64) -> Linear(64,C,no bias)
        "w_ac1": n((D, H)), "g_ac": jnp.ones((H,), jnp.float32), "be_ac": jnp.zeros((H,), jnp.float32),
        "w_ac2": n((H, N_ACT)),
        "w_cc1": n((D, H)), "g_cc": jnp.ones((H,), jnp.float32), "be_cc": jnp.zeros((H,), jnp.float32),
        "w_cc2": n((H, N_CMP)),
    }


def pack_params(p):
    f32, bf16 = jnp.float32, jnp.bfloat16
    enc_vecs = jnp.zeros((8, D), f32)
    enc_vecs = (enc_vecs.at[0].set(p["b_ff"]).at[1].set(p["ln_g"])
                .at[2].set(p["ln_b"]).at[3].set(p["b_pool"])
                .at[4].set(p["w_a"][:, 0]).at[5].set(p["w_c"][:, 0]))
    head_vecs = jnp.zeros((8, H2), f32)
    head_vecs = (head_vecs
                 .at[0, :H].set(p["b_as1"]).at[0, H:].set(p["b_cs1"])
                 .at[1, :H].set(p["g_as"]).at[1, H:].set(p["g_cs"])
                 .at[2, :H].set(p["be_as"]).at[2, H:].set(p["be_cs"])
                 .at[3, 0].set(p["b_as2"][0]).at[3, 1].set(p["b_cs2"][0])
                 .at[4, :H].set(p["g_ac"]).at[4, H:].set(p["g_cc"])
                 .at[5, :H].set(p["be_ac"]).at[5, H:].set(p["be_cc"]))
    w_sw2 = jnp.zeros((H2, 2), f32)
    w_sw2 = w_sw2.at[:H, 0].set(p["w_as2"][:, 0]).at[H:, 1].set(p["w_cs2"][:, 0])
    w_cls2 = jnp.zeros((H2, OUTW), f32)
    w_cls2 = w_cls2.at[:H, :N_ACT].set(p["w_ac2"]).at[H:, N_ACT:N_ACT + N_CMP].set(p["w_cc2"])
    return {
        "emb": p["emb"],
        "w_enc": jnp.concatenate([p["w_ff"], p["w_pool"]], axis=1).astype(bf16),
        "enc_vecs": enc_vecs,
        "w_sw1": jnp.concatenate([p["w_as1"], p["w_cs1"]], axis=1).astype(bf16),
        "w_sw2": w_sw2.astype(bf16),
        "w_cls1": jnp.concatenate([p["w_ac1"], p["w_cc1"]], axis=1).astype(bf16),
        "w_cls2": w_cls2.astype(bf16),
        "head_vecs": head_vecs,
    }


# ----------------------------- full forward -----------------------------

@functools.partial(jax.jit, static_argnames=("output_attn", "output_hs", "output_switch"))
def my_model31_forward(seq_ids, attn_masks, packed,
                       output_attn=False, output_hs=False, output_switch=False):
    # TODO(synk): output_attn / output_hs / output_switch extras are omitted (default flags).
    B, L = seq_ids.shape
    NB = _choose_nb(B, L)                           # sequences per grid step -> TM = NB*L rows
    G = -(-B // NB)
    B_pad = G * NB
    TM = NB * L

    # glue: embedding gather, shipped to the kernel in bf16 (halves per-step HBM traffic)
    x = packed["emb"][seq_ids].astype(jnp.bfloat16)                      # (B, L, D)
    mask_add = (1.0 - attn_masks.astype(jnp.float32)) * -10000.0         # (B, L)
    if B_pad > B:
        x = jnp.pad(x, ((0, B_pad - B), (0, 0), (0, 0)))
        mask_add = jnp.pad(mask_add, ((0, B_pad - B), (0, 0)), constant_values=-10000.0)

    x = x.reshape(G, TM, D)
    mask = mask_add.reshape(G, TM, 1)

    out = _fused_call(x, mask, packed, NB, L, G).reshape(B_pad, OUTW)[:B]
    action_logits = out[:, :N_ACT]
    component_logits = out[:, N_ACT:N_ACT + N_CMP]
    return action_logits, component_logits


if __name__ == "__main__":
    key = jax.random.PRNGKey(0)
    k_par, k_ids = jax.random.split(key)

    B, L, VOCAB = 2, 8, 100
    raw = init_params(k_par, vocab=VOCAB)
    packed = pack_params(raw)
    seq_ids = jax.random.randint(k_ids, (B, L), 0, VOCAB, dtype=jnp.int32)
    attn_masks = jnp.array([[1, 1, 1, 1, 1, 1, 1, 1],
                            [1, 1, 1, 1, 1, 0, 0, 0]], dtype=jnp.int32)

    action_logits, component_logits = my_model31_forward(seq_ids, attn_masks, packed)
    jax.block_until_ready((action_logits, component_logits))
    assert action_logits.shape == (B, N_ACT)
    assert component_logits.shape == (B, N_CMP)
    print("KERNEL_OK")
</pallas_src>

<mosaic_0001>
module attributes {stable_mosaic.version = 11 : i64} {
  func.func @kernel(%arg0: i32, %arg1: memref<1x8x768xbf16, #tpu.memory_space<vmem>>, %arg2: memref<1x8x1xf32, #tpu.memory_space<vmem>>, %arg3: memref<768x1536xbf16, #tpu.memory_space<vmem>>, %arg4: memref<8x768xf32, #tpu.memory_space<vmem>>, %arg5: memref<1536x128xbf16, #tpu.memory_space<vmem>>, %arg6: memref<128x2xbf16, #tpu.memory_space<vmem>>, %arg7: memref<768x128xbf16, #tpu.memory_space<vmem>>, %arg8: memref<128x128xbf16, #tpu.memory_space<vmem>>, %arg9: memref<8x128xf32, #tpu.memory_space<vmem>>, %arg10: memref<1x1x128xf32, #tpu.memory_space<vmem>>) attributes {dimension_semantics = [#tpu.dimension_semantics<parallel>], iteration_bounds = array<i64: 2>, scalar_prefetch = 0 : i64, scratch_operands = 0 : i64, tpu.core_type = #tpu.core_type<tc>, window_params = [{transform_indices = @transform_0, window_bounds = array<i64: 1, 8, 768>}, {transform_indices = @transform_1, window_bounds = array<i64: 1, 8, 1>}, {pipeline_mode = #tpu.pipeline_mode<synchronous>, transform_indices = @transform_2, window_bounds = array<i64: 768, 1536>}, {pipeline_mode = #tpu.pipeline_mode<synchronous>, transform_indices = @transform_3, window_bounds = array<i64: 8, 768>}, {pipeline_mode = #tpu.pipeline_mode<synchronous>, transform_indices = @transform_4, window_bounds = array<i64: 1536, 128>}, {pipeline_mode = #tpu.pipeline_mode<synchronous>, transform_indices = @transform_5, window_bounds = array<i64: 128, 2>}, {pipeline_mode = #tpu.pipeline_mode<synchronous>, transform_indices = @transform_6, window_bounds = array<i64: 768, 128>}, {pipeline_mode = #tpu.pipeline_mode<synchronous>, transform_indices = @transform_7, window_bounds = array<i64: 128, 128>}, {pipeline_mode = #tpu.pipeline_mode<synchronous>, transform_indices = @transform_8, window_bounds = array<i64: 8, 128>}, {transform_indices = @transform_9, window_bounds = array<i64: 1, 1, 128>}]} {
    %c0 = arith.constant 0 : index
    %c0_0 = arith.constant 0 : index
    %c0_1 = arith.constant 0 : index
    %0 = vector.load %arg1[%c0, %c0_0, %c0_1] : memref<1x8x768xbf16, #tpu.memory_space<vmem>>, vector<1x8x768xbf16>
    %1 = vector.shape_cast %0 : vector<1x8x768xbf16> to vector<8x768xbf16>
    %c0_2 = arith.constant 0 : index
    %c0_3 = arith.constant 0 : index
    %2 = vector.load %arg3[%c0_2, %c0_3] : memref<768x1536xbf16, #tpu.memory_space<vmem>>, vector<768x768xbf16>
    %cst = arith.constant dense<0.000000e+00> : vector<8x768xf32>
    %3 = tpu.matmul %1, %2, %cst {dimension_numbers = #tpu.dot_dimension_numbers<[1], [0], [0], [1], [0, 0, 1, 1], [], []>} : vector<8x768xbf16>, vector<768x768xbf16>, vector<8x768xf32> -> vector<8x768xf32>
    %c0_4 = arith.constant 0 : index
    %c0_5 = arith.constant 0 : index
    %4 = vector.load %arg4[%c0_4, %c0_5] : memref<8x768xf32, #tpu.memory_space<vmem>>, vector<1x768xf32>
    %5 = vector.broadcast %4 : vector<1x768xf32> to vector<8x768xf32>
    %6 = arith.addf %3, %5 : vector<8x768xf32>
    %7 = arith.mulf %6, %6 : vector<8x768xf32>
    %8 = arith.mulf %6, %7 : vector<8x768xf32>
    %cst_6 = arith.constant 4.471500e-02 : f32
    %9 = vector.broadcast %cst_6 : f32 to vector<8x768xf32>
    %10 = arith.mulf %9, %8 : vector<8x768xf32>
    %11 = arith.addf %6, %10 : vector<8x768xf32>
    %cst_7 = arith.constant 0.797884583 : f32
    %12 = vector.broadcast %cst_7 : f32 to vector<8x768xf32>
    %13 = arith.mulf %12, %11 : vector<8x768xf32>
    %14 = math.tanh %13 : vector<8x768xf32>
    %cst_8 = arith.constant 1.000000e+00 : f32
    %15 = vector.broadcast %cst_8 : f32 to vector<8x768xf32>
    %16 = arith.addf %15, %14 : vector<8x768xf32>
    %cst_9 = arith.constant 5.000000e-01 : f32
    %17 = vector.broadcast %cst_9 : f32 to vector<8x768xf32>
    %18 = arith.mulf %17, %16 : vector<8x768xf32>
    %19 = arith.mulf %6, %18 : vector<8x768xf32>
    %20 = arith.extf %1 : vector<8x768xbf16> to vector<8x768xf32>
    %21 = arith.addf %20, %19 : vector<8x768xf32>
    %c1 = arith.constant 1 : index
    %c0_10 = arith.constant 0 : index
    %22 = vector.load %arg4[%c1, %c0_10] : memref<8x768xf32, #tpu.memory_space<vmem>>, vector<1x768xf32>
    %c2 = arith.constant 2 : index
    %c0_11 = arith.constant 0 : index
    %23 = vector.load %arg4[%c2, %c0_11] : memref<8x768xf32, #tpu.memory_space<vmem>>, vector<1x768xf32>
    %cst_12 = arith.constant dense<0.000000e+00> : vector<8xf32>
    %24 = vector.multi_reduction <add>, %21, %cst_12 [1] : vector<8x768xf32> to vector<8xf32>
    %25 = vector.shape_cast %24 : vector<8xf32> to vector<8x1xf32>
    %cst_13 = arith.constant 7.680000e+02 : f32
    %26 = vector.broadcast %cst_13 : f32 to vector<8x1xf32>
    %27 = arith.divf %25, %26 : vector<8x1xf32>
    %28 = vector.broadcast %27 : vector<8x1xf32> to vector<8x768xf32>
    %29 = arith.subf %21, %28 : vector<8x768xf32>
    %30 = arith.mulf %29, %29 : vector<8x768xf32>
    %cst_14 = arith.constant dense<0.000000e+00> : vector<8xf32>
    %31 = vector.multi_reduction <add>, %30, %cst_14 [1] : vector<8x768xf32> to vector<8xf32>
    %32 = vector.shape_cast %31 : vector<8xf32> to vector<8x1xf32>
    %cst_15 = arith.constant 7.680000e+02 : f32
    %33 = vector.broadcast %cst_15 : f32 to vector<8x1xf32>
    %34 = arith.divf %32, %33 : vector<8x1xf32>
    %35 = vector.broadcast %27 : vector<8x1xf32> to vector<8x768xf32>
    %36 = arith.subf %21, %35 : vector<8x768xf32>
    %cst_16 = arith.constant 9.99999974E-6 : f32
    %37 = vector.broadcast %cst_16 : f32 to vector<8x1xf32>
    %38 = arith.addf %34, %37 : vector<8x1xf32>
    %39 = math.rsqrt %38 : vector<8x1xf32>
    %40 = vector.broadcast %39 : vector<8x1xf32> to vector<8x768xf32>
    %41 = arith.mulf %36, %40 : vector<8x768xf32>
    %42 = vector.broadcast %22 : vector<1x768xf32> to vector<8x768xf32>
    %43 = arith.mulf %41, %42 : vector<8x768xf32>
    %44 = vector.broadcast %23 : vector<1x768xf32> to vector<8x768xf32>
    %45 = arith.addf %43, %44 : vector<8x768xf32>
    %46 = vector.shape_cast %45 : vector<8x768xf32> to vector<1x8x768xf32>
    %47 = vector.extract_strided_slice %46 {offsets = [0, 0, 0], sizes = [1, 1, 768], strides = [1, 1, 1]} : vector<1x8x768xf32> to vector<1x1x768xf32>
    %48 = vector.shape_cast %47 : vector<1x1x768xf32> to vector<1x768xf32>
    %49 = arith.truncf %48 : vector<1x768xf32> to vector<1x768xbf16>
    %c0_17 = arith.constant 0 : index
    %c768 = arith.constant 768 : index
    %50 = vector.load %arg3[%c0_17, %c768] : memref<768x1536xbf16, #tpu.memory_space<vmem>>, vector<768x768xbf16>
    %cst_18 = arith.constant dense<0.000000e+00> : vector<1x768xf32>
    %51 = tpu.matmul %49, %50, %cst_18 {dimension_numbers = #tpu.dot_dimension_numbers<[1], [0], [0], [1], [0, 0, 1, 1], [], []>} : vector<1x768xbf16>, vector<768x768xbf16>, vector<1x768xf32> -> vector<1x768xf32>
    %c3 = arith.constant 3 : index
    %c0_19 = arith.constant 0 : index
    %52 = vector.load %arg4[%c3, %c0_19] : memref<8x768xf32, #tpu.memory_space<vmem>>, vector<1x768xf32>
    %53 = arith.addf %51, %52 : vector<1x768xf32>
    %54 = math.tanh %53 : vector<1x768xf32>
    %c4 = arith.constant 4 : index
    %c0_20 = arith.constant 0 : index
    %55 = vector.load %arg4[%c4, %c0_20] : memref<8x768xf32, #tpu.memory_space<vmem>>, vector<1x768xf32>
    %56 = vector.broadcast %55 : vector<1x768xf32> to vector<8x768xf32>
    %57 = arith.mulf %45, %56 : vector<8x768xf32>
    %cst_21 = arith.constant dense<0.000000e+00> : vector<8xf32>
    %58 = vector.multi_reduction <add>, %57, %cst_21 [1] : vector<8x768xf32> to vector<8xf32>
    %59 = vector.shape_cast %58 : vector<8xf32> to vector<8x1xf32>
    %c5 = arith.constant 5 : index
    %c0_22 = arith.constant 0 : index
    %60 = vector.load %arg4[%c5, %c0_22] : memref<8x768xf32, #tpu.memory_space<vmem>>, vector<1x768xf32>
    %61 = vector.broadcast %60 : vector<1x768xf32> to vector<8x768xf32>
    %62 = arith.mulf %45, %61 : vector<8x768xf32>
    %cst_23 = arith.constant dense<0.000000e+00> : vector<8xf32>
    %63 = vector.multi_reduction <add>, %62, %cst_23 [1] : vector<8x768xf32> to vector<8xf32>
    %64 = vector.shape_cast %63 : vector<8xf32> to vector<8x1xf32>
    %65 = tpu.concatenate %59, %64 in 1 : vector<8x1xf32>, vector<8x1xf32> -> vector<8x2xf32>
    %c0_24 = arith.constant 0 : index
    %c0_25 = arith.constant 0 : index
    %c0_26 = arith.constant 0 : index
    %66 = vector.load %arg2[%c0_24, %c0_25, %c0_26] : memref<1x8x1xf32, #tpu.memory_space<vmem>>, vector<1x8x1xf32>
    %67 = vector.shape_cast %66 : vector<1x8x1xf32> to vector<8x1xf32>
    %68 = vector.broadcast %67 : vector<8x1xf32> to vector<8x2xf32>
    %69 = arith.addf %65, %68 : vector<8x2xf32>
    %70 = vector.shape_cast %69 : vector<8x2xf32> to vector<1x8x2xf32>
    %cst_27 = arith.constant dense<0xFF800000> : vector<1x2xf32>
    %71 = vector.multi_reduction <maximumf>, %70, %cst_27 [1] : vector<1x8x2xf32> to vector<1x2xf32>
    %72 = vector.shape_cast %71 : vector<1x2xf32> to vector<1x1x2xf32>
    %73 = vector.broadcast %72 : vector<1x1x2xf32> to vector<1x8x2xf32>
    %74 = arith.subf %70, %73 : vector<1x8x2xf32>
    %75 = math.exp %74 : vector<1x8x2xf32>
    %cst_28 = arith.constant dense<0.000000e+00> : vector<1x2xf32>
    %76 = vector.multi_reduction <add>, %75, %cst_28 [1] : vector<1x8x2xf32> to vector<1x2xf32>
    %77 = vector.shape_cast %76 : vector<1x2xf32> to vector<1x1x2xf32>
    %78 = tpu.reciprocal %77 {approx = true} : vector<1x1x2xf32> -> vector<1x1x2xf32>
    %79 = vector.broadcast %78 : vector<1x1x2xf32> to vector<1x8x2xf32>
    %80 = arith.mulf %75, %79 : vector<1x8x2xf32>
    %81 = vector.extract_strided_slice %80 {offsets = [0, 0, 0], sizes = [1, 8, 1], strides = [1, 1, 1]} : vector<1x8x2xf32> to vector<1x8x1xf32>
    %82 = vector.broadcast %81 : vector<1x8x1xf32> to vector<1x8x768xf32>
    %83 = arith.mulf %46, %82 : vector<1x8x768xf32>
    %cst_29 = arith.constant dense<0.000000e+00> : vector<1x768xf32>
    %84 = vector.multi_reduction <add>, %83, %cst_29 [1] : vector<1x8x768xf32> to vector<1x768xf32>
    %cst_30 = arith.constant 1.250000e-01 : f32
    %85 = vector.broadcast %cst_30 : f32 to vector<1x768xf32>
    %86 = arith.mulf %84, %85 : vector<1x768xf32>
    %87 = vector.extract_strided_slice %80 {offsets = [0, 0, 1], sizes = [1, 8, 1], strides = [1, 1, 1]} : vector<1x8x2xf32> to vector<1x8x1xf32>
    %88 = vector.broadcast %87 : vector<1x8x1xf32> to vector<1x8x768xf32>
    %89 = arith.mulf %46, %88 : vector<1x8x768xf32>
    %cst_31 = arith.constant dense<0.000000e+00> : vector<1x768xf32>
    %90 = vector.multi_reduction <add>, %89, %cst_31 [1] : vector<1x8x768xf32> to vector<1x768xf32>
    %cst_32 = arith.constant 1.250000e-01 : f32
    %91 = vector.broadcast %cst_32 : f32 to vector<1x768xf32>
    %92 = arith.mulf %90, %91 : vector<1x768xf32>
    %c0_33 = arith.constant 0 : index
    %c0_34 = arith.constant 0 : index
    %93 = vector.load %arg9[%c0_33, %c0_34] : memref<8x128xf32, #tpu.memory_space<vmem>>, vector<8x128xf32>
    %94 = tpu.iota {dimensions = array<i32: 1>} : vector<1x128xi32>
    %c64_i32 = arith.constant 64 : i32
    %95 = vector.broadcast %c64_i32 : i32 to vector<1x128xi32>
    %96 = arith.cmpi slt, %94, %95 : vector<1x128xi32>
    %c0_35 = arith.constant 0 : index
    %c0_36 = arith.constant 0 : index
    %97 = vector.load %arg5[%c0_35, %c0_36] : memref<1536x128xbf16, #tpu.memory_space<vmem>>, vector<768x128xbf16>
    %c768_37 = arith.constant 768 : index
    %c0_38 = arith.constant 0 : index
    %98 = vector.load %arg5[%c768_37, %c0_38] : memref<1536x128xbf16, #tpu.memory_space<vmem>>, vector<768x128xbf16>
    %99 = arith.truncf %54 : vector<1x768xf32> to vector<1x768xbf16>
    %cst_39 = arith.constant dense<0.000000e+00> : vector<1x128xf32>
    %100 = tpu.matmul %99, %97, %cst_39 {dimension_numbers = #tpu.dot_dimension_numbers<[1], [0], [0], [1], [0, 0, 1, 1], [], []>} : vector<1x768xbf16>, vector<768x128xbf16>, vector<1x128xf32> -> vector<1x128xf32>
    %101 = arith.truncf %86 : vector<1x768xf32> to vector<1x768xbf16>
    %cst_40 = arith.constant dense<0.000000e+00> : vector<1x128xf32>
    %102 = tpu.matmul %101, %98, %cst_40 {dimension_numbers = #tpu.dot_dimension_numbers<[1], [0], [0], [1], [0, 0, 1, 1], [], []>} : vector<1x768xbf16>, vector<768x128xbf16>, vector<1x128xf32> -> vector<1x128xf32>
    %103 = arith.truncf %92 : vector<1x768xf32> to vector<1x768xbf16>
    %cst_41 = arith.constant dense<0.000000e+00> : vector<1x128xf32>
    %104 = tpu.matmul %103, %98, %cst_41 {dimension_numbers = #tpu.dot_dimension_numbers<[1], [0], [0], [1], [0, 0, 1, 1], [], []>} : vector<1x768xbf16>, vector<768x128xbf16>, vector<1x128xf32> -> vector<1x128xf32>
    %105 = arith.select %96, %102, %104 : vector<1x128xi1>, vector<1x128xf32>
    %106 = arith.addf %100, %105 : vector<1x128xf32>
    %107 = vector.extract_strided_slice %93 {offsets = [0, 0], sizes = [1, 128], strides = [1, 1]} : vector<8x128xf32> to vector<1x128xf32>
    %108 = arith.addf %106, %107 : vector<1x128xf32>
    %cst_42 = arith.constant 0.000000e+00 : f32
    %109 = vector.broadcast %cst_42 : f32 to vector<1x128xf32>
    %110 = arith.cmpf ogt, %108, %109 : vector<1x128xf32>
    %cst_43 = arith.constant 0.000000e+00 : f32
    %111 = vector.broadcast %cst_43 : f32 to vector<1x128xf32>
    %112 = arith.minimumf %108, %111 : vector<1x128xf32>
    %113 = math.exp %112 : vector<1x128xf32>
    %cst_44 = arith.constant 1.000000e+00 : f32
    %114 = vector.broadcast %cst_44 : f32 to vector<1x128xf32>
    %115 = arith.subf %113, %114 : vector<1x128xf32>
    %116 = arith.select %110, %108, %115 : vector<1x128xi1>, vector<1x128xf32>
    %117 = vector.extract_strided_slice %93 {offsets = [1, 0], sizes = [1, 128], strides = [1, 1]} : vector<8x128xf32> to vector<1x128xf32>
    %118 = vector.extract_strided_slice %93 {offsets = [2, 0], sizes = [1, 128], strides = [1, 1]} : vector<8x128xf32> to vector<1x128xf32>
    %119 = tpu.iota {dimensions = array<i32: 1>} : vector<1x128xi32>
    %c64_i32_45 = arith.constant 64 : i32
    %120 = vector.broadcast %c64_i32_45 : i32 to vector<1x128xi32>
    %121 = arith.cmpi slt, %119, %120 : vector<1x128xi32>
    %cst_46 = arith.constant 0.000000e+00 : f32
    %122 = vector.broadcast %cst_46 : f32 to vector<1x128xf32>
    %123 = arith.select %121, %116, %122 : vector<1x128xi1>, vector<1x128xf32>
    %cst_47 = arith.constant dense<0.000000e+00> : vector<1xf32>
    %124 = vector.multi_reduction <add>, %123, %cst_47 [1] : vector<1x128xf32> to vector<1xf32>
    %125 = vector.shape_cast %124 : vector<1xf32> to vector<1x1xf32>
    %cst_48 = arith.constant 0.000000e+00 : f32
    %126 = vector.broadcast %cst_48 : f32 to vector<1x128xf32>
    %127 = arith.select %121, %126, %116 : vector<1x128xi1>, vector<1x128xf32>
    %cst_49 = arith.constant dense<0.000000e+00> : vector<1xf32>
    %128 = vector.multi_reduction <add>, %127, %cst_49 [1] : vector<1x128xf32> to vector<1xf32>
    %129 = vector.shape_cast %128 : vector<1xf32> to vector<1x1xf32>
    %130 = vector.shape_cast %125 : vector<1x1xf32> to vector<1x1xf32>
    %131 = vector.broadcast %130 : vector<1x1xf32> to vector<1x128xf32>
    %132 = vector.shape_cast %129 : vector<1x1xf32> to vector<1x1xf32>
    %133 = vector.broadcast %132 : vector<1x1xf32> to vector<1x128xf32>
    %134 = arith.select %121, %131, %133 : vector<1x128xi1>, vector<1x128xf32>
    %cst_50 = arith.constant 1.562500e-02 : f32
    %135 = vector.broadcast %cst_50 : f32 to vector<1x128xf32>
    %136 = arith.mulf %134, %135 : vector<1x128xf32>
    %137 = arith.subf %116, %136 : vector<1x128xf32>
    %138 = arith.mulf %137, %137 : vector<1x128xf32>
    %cst_51 = arith.constant 0.000000e+00 : f32
    %139 = vector.broadcast %cst_51 : f32 to vector<1x128xf32>
    %140 = arith.select %121, %138, %139 : vector<1x128xi1>, vector<1x128xf32>
    %cst_52 = arith.constant dense<0.000000e+00> : vector<1xf32>
    %141 = vector.multi_reduction <add>, %140, %cst_52 [1] : vector<1x128xf32> to vector<1xf32>
    %142 = vector.shape_cast %141 : vector<1xf32> to vector<1x1xf32>
    %cst_53 = arith.constant 0.000000e+00 : f32
    %143 = vector.broadcast %cst_53 : f32 to vector<1x128xf32>
    %144 = arith.select %121, %143, %138 : vector<1x128xi1>, vector<1x128xf32>
    %cst_54 = arith.constant dense<0.000000e+00> : vector<1xf32>
    %145 = vector.multi_reduction <add>, %144, %cst_54 [1] : vector<1x128xf32> to vector<1xf32>
    %146 = vector.shape_cast %145 : vector<1xf32> to vector<1x1xf32>
    %147 = vector.shape_cast %142 : vector<1x1xf32> to vector<1x1xf32>
    %148 = vector.broadcast %147 : vector<1x1xf32> to vector<1x128xf32>
    %149 = vector.shape_cast %146 : vector<1x1xf32> to vector<1x1xf32>
    %150 = vector.broadcast %149 : vector<1x1xf32> to vector<1x128xf32>
    %151 = arith.select %121, %148, %150 : vector<1x128xi1>, vector<1x128xf32>
    %cst_55 = arith.constant 1.562500e-02 : f32
    %152 = vector.broadcast %cst_55 : f32 to vector<1x128xf32>
    %153 = arith.mulf %151, %152 : vector<1x128xf32>
    %cst_56 = arith.constant 9.99999974E-6 : f32
    %154 = vector.broadcast %cst_56 : f32 to vector<1x128xf32>
    %155 = arith.addf %153, %154 : vector<1x128xf32>
    %156 = math.rsqrt %155 : vector<1x128xf32>
    %157 = arith.mulf %137, %156 : vector<1x128xf32>
    %158 = arith.mulf %157, %117 : vector<1x128xf32>
    %159 = arith.addf %158, %118 : vector<1x128xf32>
    %160 = arith.truncf %159 : vector<1x128xf32> to vector<1x128xbf16>
    %c0_57 = arith.constant 0 : index
    %c0_58 = arith.constant 0 : index
    %161 = vector.load %arg6[%c0_57, %c0_58] : memref<128x2xbf16, #tpu.memory_space<vmem>>, vector<128x2xbf16>
    %cst_59 = arith.constant dense<0.000000e+00> : vector<1x2xf32>
    %162 = tpu.matmul %160, %161, %cst_59 {dimension_numbers = #tpu.dot_dimension_numbers<[1], [0], [0], [1], [0, 0, 1, 1], [], []>} : vector<1x128xbf16>, vector<128x2xbf16>, vector<1x2xf32> -> vector<1x2xf32>
    %163 = vector.extract_strided_slice %93 {offsets = [3, 0], sizes = [1, 2], strides = [1, 1]} : vector<8x128xf32> to vector<1x2xf32>
    %164 = arith.addf %162, %163 : vector<1x2xf32>
    %165 = arith.negf %164 : vector<1x2xf32>
    %166 = math.exp %165 : vector<1x2xf32>
    %cst_60 = arith.constant 1.000000e+00 : f32
    %167 = vector.broadcast %cst_60 : f32 to vector<1x2xf32>
    %168 = arith.addf %167, %166 : vector<1x2xf32>
    %169 = arith.divf %167, %168 : vector<1x2xf32>
    %170 = vector.extract_strided_slice %169 {offsets = [0, 0], sizes = [1, 1], strides = [1, 1]} : vector<1x2xf32> to vector<1x1xf32>
    %171 = vector.extract_strided_slice %169 {offsets = [0, 1], sizes = [1, 1], strides = [1, 1]} : vector<1x2xf32> to vector<1x1xf32>
    %cst_61 = arith.constant 1.000000e+00 : f32
    %172 = vector.broadcast %cst_61 : f32 to vector<1x1xf32>
    %173 = arith.subf %172, %170 : vector<1x1xf32>
    %174 = vector.broadcast %173 : vector<1x1xf32> to vector<1x768xf32>
    %175 = arith.mulf %174, %86 : vector<1x768xf32>
    %176 = vector.broadcast %170 : vector<1x1xf32> to vector<1x768xf32>
    %177 = arith.mulf %176, %54 : vector<1x768xf32>
    %178 = arith.addf %175, %177 : vector<1x768xf32>
    %cst_62 = arith.constant 1.000000e+00 : f32
    %179 = vector.broadcast %cst_62 : f32 to vector<1x1xf32>
    %180 = arith.subf %179, %171 : vector<1x1xf32>
    %181 = vector.broadcast %180 : vector<1x1xf32> to vector<1x768xf32>
    %182 = arith.mulf %181, %92 : vector<1x768xf32>
    %183 = vector.broadcast %171 : vector<1x1xf32> to vector<1x768xf32>
    %184 = arith.mulf %183, %54 : vector<1x768xf32>
    %185 = arith.addf %182, %184 : vector<1x768xf32>
    %186 = arith.truncf %178 : vector<1x768xf32> to vector<1x768xbf16>
    %c0_63 = arith.constant 0 : index
    %c0_64 = arith.constant 0 : index
    %187 = vector.load %arg7[%c0_63, %c0_64] : memref<768x128xbf16, #tpu.memory_space<vmem>>, vector<768x128xbf16>
    %cst_65 = arith.constant dense<0.000000e+00> : vector<1x128xf32>
    %188 = tpu.matmul %186, %187, %cst_65 {dimension_numbers = #tpu.dot_dimension_numbers<[1], [0], [0], [1], [0, 0, 1, 1], [], []>} : vector<1x768xbf16>, vector<768x128xbf16>, vector<1x128xf32> -> vector<1x128xf32>
    %189 = arith.truncf %185 : vector<1x768xf32> to vector<1x768xbf16>
    %c0_66 = arith.constant 0 : index
    %c0_67 = arith.constant 0 : index
    %190 = vector.load %arg7[%c0_66, %c0_67] : memref<768x128xbf16, #tpu.memory_space<vmem>>, vector<768x128xbf16>
    %cst_68 = arith.constant dense<0.000000e+00> : vector<1x128xf32>
    %191 = tpu.matmul %189, %190, %cst_68 {dimension_numbers = #tpu.dot_dimension_numbers<[1], [0], [0], [1], [0, 0, 1, 1], [], []>} : vector<1x768xbf16>, vector<768x128xbf16>, vector<1x128xf32> -> vector<1x128xf32>
    %192 = arith.select %96, %188, %191 : vector<1x128xi1>, vector<1x128xf32>
    %cst_69 = arith.constant 0.000000e+00 : f32
    %193 = vector.broadcast %cst_69 : f32 to vector<1x128xf32>
    %194 = arith.cmpf ogt, %192, %193 : vector<1x128xf32>
    %cst_70 = arith.constant 0.000000e+00 : f32
    %195 = vector.broadcast %cst_70 : f32 to vector<1x128xf32>
    %196 = arith.minimumf %192, %195 : vector<1x128xf32>
    %197 = math.exp %196 : vector<1x128xf32>
    %cst_71 = arith.constant 1.000000e+00 : f32
    %198 = vector.broadcast %cst_71 : f32 to vector<1x128xf32>
    %199 = arith.subf %197, %198 : vector<1x128xf32>
    %200 = arith.select %194, %192, %199 : vector<1x128xi1>, vector<1x128xf32>
    %201 = vector.extract_strided_slice %93 {offsets = [4, 0], sizes = [1, 128], strides = [1, 1]} : vector<8x128xf32> to vector<1x128xf32>
    %202 = vector.extract_strided_slice %93 {offsets = [5, 0], sizes = [1, 128], strides = [1, 1]} : vector<8x128xf32> to vector<1x128xf32>
    %203 = tpu.iota {dimensions = array<i32: 1>} : vector<1x128xi32>
    %c64_i32_72 = arith.constant 64 : i32
    %204 = vector.broadcast %c64_i32_72 : i32 to vector<1x128xi32>
    %205 = arith.cmpi slt, %203, %204 : vector<1x128xi32>
    %cst_73 = arith.constant 0.000000e+00 : f32
    %206 = vector.broadcast %cst_73 : f32 to vector<1x128xf32>
    %207 = arith.select %205, %200, %206 : vector<1x128xi1>, vector<1x128xf32>
    %cst_74 = arith.constant dense<0.000000e+00> : vector<1xf32>
    %208 = vector.multi_reduction <add>, %207, %cst_74 [1] : vector<1x128xf32> to vector<1xf32>
    %209 = vector.shape_cast %208 : vector<1xf32> to vector<1x1xf32>
    %cst_75 = arith.constant 0.000000e+00 : f32
    %210 = vector.broadcast %cst_75 : f32 to vector<1x128xf32>
    %211 = arith.select %205, %210, %200 : vector<1x128xi1>, vector<1x128xf32>
    %cst_76 = arith.constant dense<0.000000e+00> : vector<1xf32>
    %212 = vector.multi_reduction <add>, %211, %cst_76 [1] : vector<1x128xf32> to vector<1xf32>
    %213 = vector.shape_cast %212 : vector<1xf32> to vector<1x1xf32>
    %214 = vector.shape_cast %209 : vector<1x1xf32> to vector<1x1xf32>
    %215 = vector.broadcast %214 : vector<1x1xf32> to vector<1x128xf32>
    %216 = vector.shape_cast %213 : vector<1x1xf32> to vector<1x1xf32>
    %217 = vector.broadcast %216 : vector<1x1xf32> to vector<1x128xf32>
    %218 = arith.select %205, %215, %217 : vector<1x128xi1>, vector<1x128xf32>
    %cst_77 = arith.constant 1.562500e-02 : f32
    %219 = vector.broadcast %cst_77 : f32 to vector<1x128xf32>
    %220 = arith.mulf %218, %219 : vector<1x128xf32>
    %221 = arith.subf %200, %220 : vector<1x128xf32>
    %222 = arith.mulf %221, %221 : vector<1x128xf32>
    %cst_78 = arith.constant 0.000000e+00 : f32
    %223 = vector.broadcast %cst_78 : f32 to vector<1x128xf32>
    %224 = arith.select %205, %222, %223 : vector<1x128xi1>, vector<1x128xf32>
    %cst_79 = arith.constant dense<0.000000e+00> : vector<1xf32>
    %225 = vector.multi_reduction <add>, %224, %cst_79 [1] : vector<1x128xf32> to vector<1xf32>
    %226 = vector.shape_cast %225 : vector<1xf32> to vector<1x1xf32>
    %cst_80 = arith.constant 0.000000e+00 : f32
    %227 = vector.broadcast %cst_80 : f32 to vector<1x128xf32>
    %228 = arith.select %205, %227, %222 : vector<1x128xi1>, vector<1x128xf32>
    %cst_81 = arith.constant dense<0.000000e+00> : vector<1xf32>
    %229 = vector.multi_reduction <add>, %228, %cst_81 [1] : vector<1x128xf32> to vector<1xf32>
    %230 = vector.shape_cast %229 : vector<1xf32> to vector<1x1xf32>
    %231 = vector.shape_cast %226 : vector<1x1xf32> to vector<1x1xf32>
    %232 = vector.broadcast %231 : vector<1x1xf32> to vector<1x128xf32>
    %233 = vector.shape_cast %230 : vector<1x1xf32> to vector<1x1xf32>
    %234 = vector.broadcast %233 : vector<1x1xf32> to vector<1x128xf32>
    %235 = arith.select %205, %232, %234 : vector<1x128xi1>, vector<1x128xf32>
    %cst_82 = arith.constant 1.562500e-02 : f32
    %236 = vector.broadcast %cst_82 : f32 to vector<1x128xf32>
    %237 = arith.mulf %235, %236 : vector<1x128xf32>
    %cst_83 = arith.constant 9.99999974E-6 : f32
    %238 = vector.broadcast %cst_83 : f32 to vector<1x128xf32>
    %239 = arith.addf %237, %238 : vector<1x128xf32>
    %240 = math.rsqrt %239 : vector<1x128xf32>
    %241 = arith.mulf %221, %240 : vector<1x128xf32>
    %242 = arith.mulf %241, %201 : vector<1x128xf32>
    %243 = arith.addf %242, %202 : vector<1x128xf32>
    %244 = arith.truncf %243 : vector<1x128xf32> to vector<1x128xbf16>
    %c0_84 = arith.constant 0 : index
    %c0_85 = arith.constant 0 : index
    %245 = vector.load %arg8[%c0_84, %c0_85] : memref<128x128xbf16, #tpu.memory_space<vmem>>, vector<128x128xbf16>
    %cst_86 = arith.constant dense<0.000000e+00> : vector<1x128xf32>
    %246 = tpu.matmul %244, %245, %cst_86 {dimension_numbers = #tpu.dot_dimension_numbers<[1], [0], [0], [1], [0, 0, 1, 1], [], []>} : vector<1x128xbf16>, vector<128x128xbf16>, vector<1x128xf32> -> vector<1x128xf32>
    %c0_87 = arith.constant 0 : index
    %c0_88 = arith.constant 0 : index
    %c0_89 = arith.constant 0 : index
    %247 = vector.load %arg10[%c0_87, %c0_88, %c0_89] : memref<1x1x128xf32, #tpu.memory_space<vmem>>, vector<1x1x128xf32>
    %248 = vector.shape_cast %247 : vector<1x1x128xf32> to vector<1x128xf32>
    %249 = vector.shape_cast %246 : vector<1x128xf32> to vector<1x1x128xf32>
    tpu.vector_store %arg10[%c0_87, %c0_88, %c0_89], %249 {strides = array<i32>} : memref<1x1x128xf32, #tpu.memory_space<vmem>>, vector<1x1x128xf32>,
    return
  }
  func.func @transform_0(%arg0: i32) -> (i32, i32, i32) {
    %c0_i32 = arith.constant 0 : i32
    %c0_i32_0 = arith.constant 0 : i32
    %c0_i32_1 = arith.constant 0 : i32
    return %arg0, %c0_i32, %c0_i32_0 : i32, i32, i32
  }
  func.func @transform_1(%arg0: i32) -> (i32, i32, i32) {
    %c0_i32 = arith.constant 0 : i32
    %c0_i32_0 = arith.constant 0 : i32
    %c0_i32_1 = arith.constant 0 : i32
    return %arg0, %c0_i32, %c0_i32_0 : i32, i32, i32
  }
  func.func @transform_2(%arg0: i32) -> (i32, i32) {
    %c0_i32 = arith.constant 0 : i32
    %c0_i32_0 = arith.constant 0 : i32
    %c0_i32_1 = arith.constant 0 : i32
    return %c0_i32, %c0_i32_0 : i32, i32
  }
  func.func @transform_3(%arg0: i32) -> (i32, i32) {
    %c0_i32 = arith.constant 0 : i32
    %c0_i32_0 = arith.constant 0 : i32
    %c0_i32_1 = arith.constant 0 : i32
    return %c0_i32, %c0_i32_0 : i32, i32
  }
  func.func @transform_4(%arg0: i32) -> (i32, i32) {
    %c0_i32 = arith.constant 0 : i32
    %c0_i32_0 = arith.constant 0 : i32
    %c0_i32_1 = arith.constant 0 : i32
    return %c0_i32, %c0_i32_0 : i32, i32
  }
  func.func @transform_5(%arg0: i32) -> (i32, i32) {
    %c0_i32 = arith.constant 0 : i32
    %c0_i32_0 = arith.constant 0 : i32
    %c0_i32_1 = arith.constant 0 : i32
    return %c0_i32, %c0_i32_0 : i32, i32
  }
  func.func @transform_6(%arg0: i32) -> (i32, i32) {
    %c0_i32 = arith.constant 0 : i32
    %c0_i32_0 = arith.constant 0 : i32
    %c0_i32_1 = arith.constant 0 : i32
    return %c0_i32, %c0_i32_0 : i32, i32
  }
  func.func @transform_7(%arg0: i32) -> (i32, i32) {
    %c0_i32 = arith.constant 0 : i32
    %c0_i32_0 = arith.constant 0 : i32
    %c0_i32_1 = arith.constant 0 : i32
    return %c0_i32, %c0_i32_0 : i32, i32
  }
  func.func @transform_8(%arg0: i32) -> (i32, i32) {
    %c0_i32 = arith.constant 0 : i32
    %c0_i32_0 = arith.constant 0 : i32
    %c0_i32_1 = arith.constant 0 : i32
    return %c0_i32, %c0_i32_0 : i32, i32
  }
  func.func @transform_9(%arg0: i32) -> (i32, i32, i32) {
    %c0_i32 = arith.constant 0 : i32
    %c0_i32_0 = arith.constant 0 : i32
    %c0_i32_1 = arith.constant 0 : i32
    return %arg0, %c0_i32, %c0_i32_0 : i32, i32, i32
  }
}

</mosaic_0001>

<bundles_post_ra>
// kernel: my_model31_forward.1
= control target key start
LH: loop header
LB: loop body
LE: loop exit
PB: predicated region body
PF: predicated region fallthrough
CT: control target
= control target key end

     0   :  { %14 = vsyncpa [#allocation3], 0  ;;  %s11135_s0 = inlined_call_operand.vmem [shape: bf16[2,8,768], index: 0, kind: input, shape index: {}]   ;;  %s11136_s1 = inlined_call_operand.vmem [shape: f32[2,8,1], index: 1, kind: input, shape index: {}]   ;;  %s11137_s2 = inlined_call_operand.hbm [shape: bf16[768,1536], index: 2, kind: input, shape index: {}]   ;;  %s11138_s3 = inlined_call_operand.hbm [shape: f32[8,768], index: 3, kind: input, shape index: {}]   ;;  %s11139_s4 = inlined_call_operand.hbm [shape: bf16[1536,128], index: 4, kind: input, shape index: {}]   ;;  %s11140_s5 = inlined_call_operand.vmem [shape: bf16[128,2], index: 5, kind: input, shape index: {}]   ;;  %s11141_s6 = inlined_call_operand.hbm [shape: bf16[768,128], index: 6, kind: input, shape index: {}]   ;;  %s11142_s7 = inlined_call_operand.hbm [shape: bf16[128,128], index: 7, kind: input, shape index: {}]   ;;  %s11143_s8 = inlined_call_operand.hbm [shape: f32[8,128], index: 8, kind: input, shape index: {}]   ;;  %s11144_s9 = inlined_call_operand.vmem [shape: f32[2,1,128], index: 9, kind: output, shape index: {}]  }
   0x1   :  { %15 = vsyncpa [#allocation5], 0 }
   0x2   :  { %16 = vsyncpa [#allocation8], 0 }
   0x3   :  { %17 = vsyncpa [#allocation11], 0  ;;  %s10032_s30 = smov 0  }
   0x4 LB: > { %s9968_s10 = smov [#allocation4]   ;;  %s10038_s12 = sadd.s32 4294967295, %s9966_s30   ;;  %s9966_s30 = sphi %s10032_s30, %s23_s30  }
   0x5   : > { %s279_s11 = sshll.u32 %s9968_s10, 4  ;;  %p7405_p0 = scmp.ge.s32.totalorder %s9966_s30, 1  ;;  %s280_s11 = int_to_ptr.vmem [resolvable:$true] %s279_s11 }
   0x6   : > { %p253_p1 = scmp.lt.s32.totalorder %s9966_s30, 3  ;;  %p11145_p2 = scmp.eq.s32.totalorder %s10038_s12, 0 }
   0x7   : > { %s9969_s14 = smov [#allocation7]   ;;  %s9970_s17 = smov [#allocation2]  }
   0x8   : > { %p10043_p3 = pnand %p7405_p0, %p253_p1  ;;  %s305_s15 = sshll.u32 %s9969_s14, 4  ;;  %s10049_s15 = int_to_ptr.vmem [resolvable:$true] %s305_s15 }
   0x9   : > { %s265_s18 = sshll.u32 %s9970_s17, 4  ;;  %s9776_s21 = scalar_lea.hbm %s11138_s3, 768  ;;  %s10057_s18 = int_to_ptr.vmem [resolvable:$true] %s265_s18 }
   0xa   : > { %s11173_s13 = scalar_select %p10043_p3, 1, 0 }
   0xb   : > { %p8642_p4 = pneg %p10043_p3  ;;  %p9777_p6 = scmp.ne.s32.totalorder %s11138_s3, %s9776_s21 }
   0xc   : > { %p9783_p10 = scmp.lt.u32.totalorder %s9776_s21, %s11138_s3 }
   0xd   : > { %p10053_p5 = pnand %p11145_p2, %p8642_p4 }
   0xf   : > { %p10067_p7 = pneg %p10053_p5 }
  0x11   : > { %p9779_p8 = pnand %p10067_p7, %p9777_p6 }
  0x13   : > { %p9780_p9 = pneg %p9779_p8 }
  0x15   : > { %p9785_p11 = pnand %p9783_p10, %p9780_p9 }
  0x17   : > { %9788 = shalt.err (!%p9785_p11)
}
  0x18   : > { %s9789_s27 = scalar_lea.vmem %s280_s11, 768  ;;  %p9797_p1 = scmp.lt.s32.totalorder %s280_s11, %s280_s11 }
  0x19   : > { %p9790_p12 = scmp.ne.s32.totalorder %s280_s11, %s9789_s27  ;;  %p9798_p4 = scmp.lt.s32.totalorder %s9789_s27, %s9789_s27 }
  0x1b   : > { %p9792_p13 = pnand %p9790_p12, %p10067_p7  ;;  %p9799_p2 = por %p9798_p4, %p9797_p1 }
  0x1d   : > { %p9793_p0 = pneg %p9792_p13 }
  0x1f   : > { %p9800_p3 = pnand %p9799_p2, %p9793_p0 }
  0x21   : > { %9803 = shalt.err (!%p9800_p3)
}
  0x22   : > { %8648 = dma.hbm_to_vmem [thread:$0]  (!%p10053_p5), %s11138_s3, 768, %s280_s11, [#allocation5]  }
  0x23   : > { %s9804_s17 = scalar_lea.hbm %s11141_s6, 6144 }
  0x24   : > { %p9805_p6 = scmp.ne.s32.totalorder %s11141_s6, %s9804_s17  ;;  %p9811_p2 = scmp.lt.u32.totalorder %s9804_s17, %s11141_s6 }
  0x26   : > { %p9807_p8 = pnand %p9805_p6, %p10067_p7 }
  0x28   : > { %p9808_p9 = pneg %p9807_p8 }
  0x2a   : > { %p9813_p3 = pnand %p9811_p2, %p9808_p9 }
  0x2c   : > { %9816 = shalt.err (!%p9813_p3)
}
  0x2d   : > { %s9817_s11 = scalar_lea.vmem %s10049_s15, 6144  ;;  %p9825_p13 = scmp.lt.s32.totalorder %s10049_s15, %s10049_s15 }
  0x2e   : > { %p9818_p10 = scmp.ne.s32.totalorder %s10049_s15, %s9817_s11  ;;  %p9826_p0 = scmp.lt.s32.totalorder %s9817_s11, %s9817_s11 }
  0x30   : > { %p9820_p11 = pnand %p9818_p10, %p10067_p7  ;;  %p9827_p1 = por %p9826_p0, %p9825_p13 }
  0x32   : > { %p9821_p12 = pneg %p9820_p11 }
  0x34   : > { %p9828_p4 = pnand %p9827_p1, %p9821_p12 }
  0x36   : > { %9831 = shalt.err (!%p9828_p4)
}
  0x37   : > { %s9971_s23 = smov 64   ;;  %s9972_s25 = smov 4  }
  0x38   : > { %8654 = dma.hbm_to_vmem [thread:$0]  (!%p10053_p5), %s11141_s6, 6144, %s10049_s15, [#allocation8], %s9971_s23, %s9971_s23, %s9972_s25  }
  0x39   : > { %s9832_s10 = scalar_lea.hbm %s11137_s2, 73728 }
  0x3a   : > { %p9833_p6 = scmp.ne.s32.totalorder %s11137_s2, %s9832_s10  ;;  %p9839_p2 = scmp.lt.u32.totalorder %s9832_s10, %s11137_s2 }
  0x3c   : > { %p9835_p8 = pnand %p9833_p6, %p10067_p7 }
  0x3e   : > { %p9836_p9 = pneg %p9835_p8 }
  0x40   : > { %p9841_p3 = pnand %p9839_p2, %p9836_p9 }
  0x42   : > { %9844 = shalt.err (!%p9841_p3)
}
  0x43   : > { %s9845_s15 = scalar_lea.vmem %s10057_s18, 73728  ;;  %p9853_p13 = scmp.lt.s32.totalorder %s10057_s18, %s10057_s18 }
  0x44   : > { %p9846_p10 = scmp.ne.s32.totalorder %s10057_s18, %s9845_s15  ;;  %p9854_p0 = scmp.lt.s32.totalorder %s9845_s15, %s9845_s15 }
  0x46   : > { %p9848_p11 = pnand %p9846_p10, %p10067_p7  ;;  %p9855_p1 = por %p9854_p0, %p9853_p13 }
  0x48   : > { %p9849_p12 = pneg %p9848_p11 }
  0x4a   : > { %p9856_p4 = pnand %p9855_p1, %p9849_p12 }
  0x4c   : > { %9859 = shalt.err (!%p9856_p4)
}
  0x4d   : > { %s9973_s21 = smov 768   ;;  %s9974_s22 = smov 48  }
  0x4e   : > { %8645 = dma.hbm_to_vmem [thread:$0]  (!%p10053_p5), %s11137_s2, 73728, %s10057_s18, [#allocation3], %s9973_s21, %s9973_s21, %s9974_s22  }
  0x4f   : > { %s9975_s27 = smov [#allocation6]   ;;  %s9976_s29 = smov [#allocation9]  }
  0x50   : > { %s289_s28 = sshll.u32 %s9975_s27, 4  ;;  %s318_s10 = sshll.u32 %s9976_s29, 4  ;;  %s290_s28 = int_to_ptr.vmem [resolvable:$true] %s289_s28  ;;  %s10132_s10 = int_to_ptr.vmem [resolvable:$true] %s318_s10 }
  0x51   : > { %s9860_s19 = scalar_lea.hbm %s11139_s4, 12288 }
  0x52   : > { %p9861_p6 = scmp.ne.s32.totalorder %s11139_s4, %s9860_s19  ;;  %p9867_p2 = scmp.lt.u32.totalorder %s9860_s19, %s11139_s4 }
  0x54   : > { %p9863_p8 = pnand %p9861_p6, %p10067_p7 }
  0x56   : > { %p9864_p9 = pneg %p9863_p8 }
  0x58   : > { %p9869_p3 = pnand %p9867_p2, %p9864_p9 }
  0x5a   : > { %9872 = shalt.err (!%p9869_p3)
}
  0x5b   : > { %s9873_s21 = scalar_lea.vmem %s290_s28, 12288  ;;  %p9881_p13 = scmp.lt.s32.totalorder %s290_s28, %s290_s28 }
  0x5c   : > { %p9874_p10 = scmp.ne.s32.totalorder %s290_s28, %s9873_s21  ;;  %p9882_p0 = scmp.lt.s32.totalorder %s9873_s21, %s9873_s21 }
  0x5e   : > { %p9876_p11 = pnand %p9874_p10, %p10067_p7  ;;  %p9883_p1 = por %p9882_p0, %p9881_p13 }
  0x60   : > { %p9877_p12 = pneg %p9876_p11 }
  0x62   : > { %p9884_p4 = pnand %p9883_p1, %p9877_p12 }
  0x64   : > { %9887 = shalt.err (!%p9884_p4)
}
  0x65   : > { %8651 = dma.hbm_to_vmem [thread:$0]  (!%p10053_p5), %s11139_s4, 12288, %s290_s28, [#allocation5], %s9971_s23, %s9971_s23, %s9972_s25  }
  0x66   : > { %s9888_s14 = scalar_lea.hbm %s11142_s7, 1024 }
  0x67   : > { %p9889_p6 = scmp.ne.s32.totalorder %s11142_s7, %s9888_s14  ;;  %p9895_p2 = scmp.lt.u32.totalorder %s9888_s14, %s11142_s7 }
  0x69   : > { %p9891_p8 = pnand %p9889_p6, %p10067_p7 }
  0x6b   : > { %p9892_p9 = pneg %p9891_p8 }
  0x6d   : > { %p9897_p3 = pnand %p9895_p2, %p9892_p9 }
  0x6f   : > { %9900 = shalt.err (!%p9897_p3)
}
  0x70   : > { %s9901_s28 = scalar_lea.vmem %s10132_s10, 1024  ;;  %p9909_p13 = scmp.lt.s32.totalorder %s10132_s10, %s10132_s10 }
  0x71   : > { %p9902_p10 = scmp.ne.s32.totalorder %s10132_s10, %s9901_s28  ;;  %p9910_p0 = scmp.lt.s32.totalorder %s9901_s28, %s9901_s28 }
  0x73   : > { %p9904_p11 = pnand %p9902_p10, %p10067_p7  ;;  %p9911_p1 = por %p9910_p0, %p9909_p13 }
  0x75   : > { %p9905_p12 = pneg %p9904_p11 }
  0x77   : > { %p9912_p4 = pnand %p9911_p1, %p9905_p12 }
  0x79   : > { %9915 = shalt.err (!%p9912_p4)
}
  0x7a   : > { %8657 = dma.hbm_to_vmem [thread:$0]  (!%p10053_p5), %s11142_s7, 1024, %s10132_s10, [#allocation8], %s9971_s23, %s9971_s23, %s9972_s25  }
  0x7b   : > { %s9977_s21 = smov [#allocation10]   ;;  %s9916_s29 = scalar_lea.hbm %s11143_s8, 128 }
  0x7c   : > { %s332_s22 = sshll.u32 %s9977_s21, 4  ;;  %p9917_p6 = scmp.ne.s32.totalorder %s11143_s8, %s9916_s29  ;;  %s333_s22 = int_to_ptr.vmem [resolvable:$true] %s332_s22 }
  0x7d   : > { %p9923_p2 = scmp.lt.u32.totalorder %s9916_s29, %s11143_s8 }
  0x7e   : > { %p9919_p8 = pnand %p9917_p6, %p10067_p7 }
  0x80   : > { %p9920_p9 = pneg %p9919_p8 }
  0x82   : > { %p9925_p3 = pnand %p9923_p2, %p9920_p9 }
  0x84   : > { %9928 = shalt.err (!%p9925_p3)
}
  0x85   : > { %s9929_s23 = scalar_lea.vmem %s333_s22, 128  ;;  %p9937_p13 = scmp.lt.s32.totalorder %s333_s22, %s333_s22 }
  0x86   : > { %p9930_p10 = scmp.ne.s32.totalorder %s333_s22, %s9929_s23  ;;  %p9938_p0 = scmp.lt.s32.totalorder %s9929_s23, %s9929_s23 }
  0x88   : > { %p9932_p11 = pnand %p9930_p10, %p10067_p7  ;;  %p9939_p1 = por %p9938_p0, %p9937_p13 }
  0x8a   : > { %p9933_p12 = pneg %p9932_p11 }
  0x8c   : > { %p9940_p4 = pnand %p9939_p1, %p9933_p12 }
  0x8e   : > { %9943 = shalt.err (!%p9940_p4)
}
  0x8f   : > { %8660 = dma.hbm_to_vmem [thread:$0]  (!%p10053_p5), %s11143_s8, 128, %s333_s22, [#allocation11]  }
  0x90   : > { %p11176_p6 = scmp.ne.s32.totalorder %s11173_s13, 0 }
  0x92   : > { %360 = sbr.rel (%p11176_p6) target bundleno = 3444 (0xd74), region = 56 }
  0x99   : > { %p11177_p8 = scmp.eq.s32.totalorder %s10038_s12, 0 }
  0x9b   : > { %9949 = dma.done.wait (%p11177_p8), [#allocation3], 73728   ;;  %p11178_p7 = pmov %p11177_p8 }
  0x9d   : > { %9951 = vsyncadd (%p11178_p7), [#allocation3], 4294893568  ;;  %p11179_p9 = pmov %p11178_p7 }
  0x9e   : > { %p11180_p2 = pmov %p11178_p7 }
  0x9f   : > { %9953 = dma.done.wait (%p11179_p9), [#allocation5], 13056  }
  0xa0   : > { %9955 = vsyncadd (%p11180_p2), [#allocation5], 4294954240  ;;  %p11181_p3 = pmov %p11180_p2 }
  0xa1   : > { %p11182_p5 = pmov %p11180_p2 }
  0xa2   : > { %9957 = dma.done.wait (%p11181_p3), [#allocation8], 7168  }
  0xa3   : > { %9959 = vsyncadd (%p11182_p5), [#allocation8], 4294960128  ;;  %p11183_p10 = pmov %p11180_p2 }
  0xa4   : > { %p11184_p11 = pmov %p11180_p2 }
  0xa5   : > { %9961 = dma.done.wait (%p11183_p10), [#allocation11], 128  }
  0xa6   : > { %9963 = vsyncadd (%p11184_p11), [#allocation11], 4294967168  ;;  %v8701_v0 = vld [vmem:[#allocation2 + $0x4] ss:$48 sps:$4 sm:$0xff]   ;;  %v8703_v1 = vld [vmem:[#allocation2] ss:$48 sps:$4 sm:$0xff]  }
  0xa7   : > { %2217 = vmatprep.subr.bf16.mxu0 %v8701_v0  ;;  %v8704_v2 = vld [vmem:[#allocation2 + $0xc] ss:$48 sps:$4 sm:$0xff]   ;;  %v8706_v3 = vld [vmem:[#allocation2 + $0x64] ss:$48 sps:$4 sm:$0xff]   ;;  %v8708_v4 = vld [vmem:[#allocation2 + $0x8] ss:$48 sps:$4 sm:$0xff]  }
  0xa8   : > { %2218 = vmatpush1.bf16.msra.mxu0 %v8703_v1  ;;  %v8709_v5 = vld [vmem:[#allocation2 + $0x60] ss:$48 sps:$4 sm:$0xff]   ;;  %2340 = vmatprep.subr.bf16.mxu1 %v8704_v2  ;;  %v8710_v6 = vld [vmem:[#allocation2 + $0x6c] ss:$48 sps:$4 sm:$0xff]   ;;  %v8712_v7 = vld [vmem:[#allocation2 + $0xc4] ss:$48 sps:$4 sm:$0xff]  }
  0xa9   : > { %2219 = vmatprep.subr.bf16.mxu0 %v8706_v3  ;;  %2341 = vmatpush1.bf16.msra.mxu1 %v8708_v4  ;;  %v8714_v8 = vld [vmem:[#allocation2 + $0x68] ss:$48 sps:$4 sm:$0xff]   ;;  %v8715_v9 = vld [vmem:[#allocation2 + $0xc0] ss:$48 sps:$4 sm:$0xff]   ;;  %v8716_v10 = vld [vmem:[#allocation2 + $0xcc] ss:$48 sps:$4 sm:$0xff]  }
  0xaa   : > { %2342 = vmatprep.subr.bf16.mxu1 %v8710_v6  ;;  %v8718_v11 = vld [vmem:[#allocation2 + $0x124] ss:$48 sps:$4 sm:$0xff]   ;;  %v8720_v12 = vld [vmem:[#allocation2 + $0xc8] ss:$48 sps:$4 sm:$0xff]   ;;  %v8722_v13 = vld [vmem:[#allocation2 + $0x12c] ss:$48 sps:$4 sm:$0xff]  }
  0xab   : > { %v8721_v14 = vld [vmem:[#allocation2 + $0x120] ss:$48 sps:$4 sm:$0xff]   ;;  %v8724_v15 = vld [vmem:[#allocation2 + $0x184] ss:$48 sps:$4 sm:$0xff]   ;;  %v8726_v16 = vld [vmem:[#allocation2 + $0x128] ss:$48 sps:$4 sm:$0xff]  }
  0xac   : > { %2220 = vmatpush1.bf16.msra.mxu0 %v8709_v5  ;;  %v8728_v17 = vld [vmem:[#allocation2 + $0x18c] ss:$48 sps:$4 sm:$0xff]   ;;  %v8727_v18 = vld [vmem:[#allocation2 + $0x180] ss:$48 sps:$4 sm:$0xff]   ;;  %v8730_v19 = vld [vmem:[#allocation2 + $0x1e4] ss:$48 sps:$4 sm:$0xff]  }
  0xad   : > { %2221 = vmatprep.subr.bf16.mxu0 %v8712_v7  ;;  %2343 = vmatpush1.bf16.msra.mxu1 %v8714_v8  ;;  %v8732_v20 = vld [vmem:[#allocation2 + $0x188] ss:$48 sps:$4 sm:$0xff]   ;;  %v8734_v21 = vld [vmem:[#allocation2 + $0x1ec] ss:$48 sps:$4 sm:$0xff]   ;;  %v8733_v22 = vld [vmem:[#allocation2 + $0x1e0] ss:$48 sps:$4 sm:$0xff]  }
  0xae   : > { %2344 = vmatprep.subr.bf16.mxu1 %v8716_v10  ;;  %v8736_v23 = vld [vmem:[#allocation2 + $0x244] ss:$48 sps:$4 sm:$0xff]   ;;  %v8738_v24 = vld [vmem:[#allocation2 + $0x1e8] ss:$48 sps:$4 sm:$0xff]   ;;  %v8740_v25 = vld [vmem:[#allocation2 + $0x24c] ss:$48 sps:$4 sm:$0xff]  }
  0xaf   : > { %v8739_v26 = vld [vmem:[#allocation2 + $0x240] ss:$48 sps:$4 sm:$0xff]   ;;  %v8742_v27 = vld [vmem:[#allocation2 + $0x2a4] ss:$48 sps:$4 sm:$0xff]   ;;  %v8744_v28 = vld [vmem:[#allocation2 + $0x248] ss:$48 sps:$4 sm:$0xff]  }
  0xb0   : > { %2222 = vmatpush1.bf16.msra.mxu0 %v8715_v9  ;;  %v8746_v29 = vld [vmem:[#allocation2 + $0x2ac] ss:$48 sps:$4 sm:$0xff]   ;;  %v8745_v30 = vld [vmem:[#allocation2 + $0x2a0] ss:$48 sps:$4 sm:$0xff]   ;;  %p418_p12 = scmp.lt.s32.totalorder %s10038_s12, 1  ;;  %vm5011_vm0 = vcmask 7168  }
  0xb1   : > { %2223 = vmatprep.subr.bf16.mxu0 %v8718_v11  ;;  %2345 = vmatpush1.bf16.msra.mxu1 %v8720_v12  ;;  %v8748_v31 = vld [vmem:[#allocation2 + $0x304] ss:$48 sps:$4 sm:$0xff]   ;;  %v8750_v32 = vld [vmem:[#allocation2 + $0x2a8] ss:$48 sps:$4 sm:$0xff]   ;;  %v8752_v33 = vld [vmem:[#allocation2 + $0x30c] ss:$48 sps:$4 sm:$0xff]  }
  0xb2   : > { %2346 = vmatprep.subr.bf16.mxu1 %v8722_v13  ;;  %v8751_v34 = vld [vmem:[#allocation2 + $0x300] ss:$48 sps:$4 sm:$0xff]   ;;  %s11235_s12 = smov (!%p418_p12, %s10038_s12), 1  ;;  %v8754_v35 = vld [vmem:[#allocation2 + $0x364] ss:$48 sps:$4 sm:$0xff]   ;;  %vm5020_vm1 = vcmask 15360  }
  0xb3   : > { %v8756_v36 = vld [vmem:[#allocation2 + $0x308] ss:$48 sps:$4 sm:$0xff]   ;;  %v8758_v37 = vld [vmem:[#allocation2 + $0x36c] ss:$48 sps:$4 sm:$0xff]   ;;  %v8757_v38 = vld [vmem:[#allocation2 + $0x360] ss:$48 sps:$4 sm:$0xff]  }
  0xb4   : > { %2224 = vmatpush1.bf16.msra.mxu0 %v8721_v14  ;;  %s8617_s13 = smul.u32 24, %s11235_s12  ;;  %v8760_v39 = vld [vmem:[#allocation2 + $0x3c4] ss:$48 sps:$4 sm:$0xff]   ;;  %v8762_v40 = vld [vmem:[#allocation2 + $0x368] ss:$48 sps:$4 sm:$0xff]   ;;  %s7421_s28 = sshll.u32 %s11235_s12, 3 }
  0xb5   : > { %2225 = vmatprep.subr.bf16.mxu0 %v8724_v15  ;;  %2347 = vmatpush1.bf16.msra.mxu1 %v8726_v16  ;;  %v8764_v41 = vld [vmem:[#allocation2 + $0x3cc] ss:$48 sps:$4 sm:$0xff]   ;;  %v8763_v42 = vld [vmem:[#allocation2 + $0x3c0] ss:$48 sps:$4 sm:$0xff]   ;;  %v8766_v43 = vld [vmem:[#allocation2 + $0x424] ss:$48 sps:$4 sm:$0xff]   ;;  %s426_s21 = scalar_lea.vmem %s11136_s1, %s7421_s28 }
  0xb6   : > { %2348 = vmatprep.subr.bf16.mxu1 %v8728_v17  ;;  %s10225_s15 = scalar_lea.vmem %s11135_s0, %s8617_s13  ;;  %v8768_v44 = vld [vmem:[#allocation2 + $0x3c8] ss:$48 sps:$4 sm:$0xff]   ;;  %v8770_v45 = vld [vmem:[#allocation2 + $0x42c] ss:$48 sps:$4 sm:$0xff]   ;;  %v8769_v47 = vld [vmem:[#allocation2 + $0x420] ss:$48 sps:$4 sm:$0xff]  }
  0xb7   : > { %v431_v46 = vld [vmem:[%s10225_s15] sm:$0xff]  ;;  %v8774_v50 = vld [vmem:[#allocation2 + $0x428] ss:$48 sps:$4 sm:$0xff]   ;;  %v8776_v51 = vld [vmem:[#allocation2 + $0x48c] ss:$48 sps:$4 sm:$0xff]   ;;  %vm6304_vm4 = vcmask 1040384  }
  0xb8   : > { %2226 = vmatpush1.bf16.msra.mxu0 %v8727_v18  ;;  %v10228_v48 = vcombine.high %v431_v46, %v431_v46  ;;  %v8772_v49 = vld [vmem:[#allocation2 + $0x484] ss:$48 sps:$4 sm:$0xff]   ;;  %v8775_v52 = vld [vmem:[#allocation2 + $0x480] ss:$48 sps:$4 sm:$0xff]   ;;  %v8780_v54 = vld [vmem:[#allocation2 + $0x488] ss:$48 sps:$4 sm:$0xff]   ;;  %v10232_v3 = vcombine.low %v431_v46, %v431_v46 }
  0xb9   : > { %2227 = vmatprep.subr.bf16.mxu0 %v8730_v19  ;;  %2349 = vmatpush1.bf16.msra.mxu1 %v8732_v20  ;;  %v8778_v53 = vld [vmem:[#allocation2 + $0x4e4] ss:$48 sps:$4 sm:$0xff]   ;;  %v8782_v55 = vld [vmem:[#allocation2 + $0x4ec] ss:$48 sps:$4 sm:$0xff]   ;;  %v8781_v56 = vld [vmem:[#allocation2 + $0x4e0] ss:$48 sps:$4 sm:$0xff]  }
  0xba   : > { %2350 = vmatprep.subr.bf16.mxu1 %v8734_v21  ;;  %2249 = vmatprep.mubr.bf16.mxu0 %v10228_v48  ;;  %v8784_v57 = vld [vmem:[#allocation2 + $0x544] ss:$48 sps:$4 sm:$0xff]   ;;  %v8786_v58 = vld [vmem:[#allocation2 + $0x4e8] ss:$48 sps:$4 sm:$0xff]   ;;  %v8788_v59 = vld [vmem:[#allocation2 + $0x54c] ss:$48 sps:$4 sm:$0xff]  }
  0xbb   : > { %2372 = vmatprep.mubr.bf16.mxu1 %v10228_v48  ;;  %v8787_v60 = vld [vmem:[#allocation2 + $0x540] ss:$48 sps:$4 sm:$0xff]   ;;  %v8790_v61 = vld [vmem:[#allocation2 + $0x5a4] ss:$48 sps:$4 sm:$0xff]   ;;  %v8792_v62 = vld [vmem:[#allocation2 + $0x548] ss:$48 sps:$4 sm:$0xff]  }
  0xbc   : > { %2228 = vmatpush1.bf16.msra.mxu0 %v8733_v22  ;;  %v8794_v63 = vld [vmem:[#allocation2 + $0x5ac] ss:$48 sps:$4 sm:$0xff]   ;;  %v8793_v0 = vld [vmem:[#allocation2 + $0x5a0] ss:$48 sps:$4 sm:$0xff]   ;;  %v8799_v1 = vld [vmem:[#allocation2 + $0x604] ss:$48 sps:$4 sm:$0xff]  }
  0xbd   : > { %2229 = vmatprep.subr.bf16.mxu0 %v8736_v23  ;;  %2351 = vmatpush1.bf16.msra.mxu1 %v8738_v24  ;;  %v8800_v2 = vld [vmem:[#allocation2 + $0x5a8] ss:$48 sps:$4 sm:$0xff]   ;;  %v8804_v4 = vld [vmem:[#allocation2 + $0x60c] ss:$48 sps:$4 sm:$0xff]   ;;  %v8797_v5 = vld [vmem:[#allocation2 + $0x600] ss:$48 sps:$4 sm:$0xff]  }
  0xbe   : > { %2352 = vmatprep.subr.bf16.mxu1 %v8740_v25  ;;  %v8807_v6 = vld [vmem:[#allocation2 + $0x664] ss:$48 sps:$4 sm:$0xff]   ;;  %v8802_v7 = vld [vmem:[#allocation2 + $0x608] ss:$48 sps:$4 sm:$0xff]   ;;  %v8810_v8 = vld [vmem:[#allocation2 + $0x66c] ss:$48 sps:$4 sm:$0xff]  }
  0xbf   : > { %v8805_v9 = vld [vmem:[#allocation2 + $0x660] ss:$48 sps:$4 sm:$0xff]   ;;  %v8813_v10 = vld [vmem:[#allocation2 + $0x6c4] ss:$48 sps:$4 sm:$0xff]   ;;  %v8808_v11 = vld [vmem:[#allocation2 + $0x668] ss:$48 sps:$4 sm:$0xff]  }
  0xc0   : > { %2230 = vmatpush1.bf16.msra.mxu0 %v8739_v26  ;;  %v8816_v12 = vld [vmem:[#allocation2 + $0x6cc] ss:$48 sps:$4 sm:$0xff]   ;;  %v8811_v13 = vld [vmem:[#allocation2 + $0x6c0] ss:$48 sps:$4 sm:$0xff]   ;;  %v8819_v14 = vld [vmem:[#allocation2 + $0x724] ss:$48 sps:$4 sm:$0xff]  }
  0xc1   : > { %2231 = vmatprep.subr.bf16.mxu0 %v8742_v27  ;;  %2353 = vmatpush1.bf16.msra.mxu1 %v8744_v28  ;;  %v8814_v15 = vld [vmem:[#allocation2 + $0x6c8] ss:$48 sps:$4 sm:$0xff]   ;;  %v8822_v16 = vld [vmem:[#allocation2 + $0x72c] ss:$48 sps:$4 sm:$0xff]   ;;  %v8817_v17 = vld [vmem:[#allocation2 + $0x720] ss:$48 sps:$4 sm:$0xff]  }
  0xc2   : > { %2354 = vmatprep.subr.bf16.mxu1 %v8746_v29  ;;  %v8825_v18 = vld [vmem:[#allocation2 + $0x784] ss:$48 sps:$4 sm:$0xff]   ;;  %v8820_v19 = vld [vmem:[#allocation2 + $0x728] ss:$48 sps:$4 sm:$0xff]   ;;  %v8828_v20 = vld [vmem:[#allocation2 + $0x78c] ss:$48 sps:$4 sm:$0xff]  }
  0xc3   : > { %v8823_v21 = vld [vmem:[#allocation2 + $0x780] ss:$48 sps:$4 sm:$0xff]   ;;  %v8831_v22 = vld [vmem:[#allocation2 + $0x7e4] ss:$48 sps:$4 sm:$0xff]   ;;  %v8826_v23 = vld [vmem:[#allocation2 + $0x788] ss:$48 sps:$4 sm:$0xff]  }
  0xc4   : > { %2232 = vmatpush1.bf16.msra.mxu0 %v8745_v30  ;;  %v8834_v24 = vld [vmem:[#allocation2 + $0x7ec] ss:$48 sps:$4 sm:$0xff]   ;;  %v8829_v25 = vld [vmem:[#allocation2 + $0x7e0] ss:$48 sps:$4 sm:$0xff]   ;;  %v8837_v26 = vld [vmem:[#allocation2 + $0x844] ss:$48 sps:$4 sm:$0xff]  }
  0xc5   : > { %2233 = vmatprep.subr.bf16.mxu0 %v8748_v31  ;;  %2355 = vmatpush1.bf16.msra.mxu1 %v8750_v32  ;;  %v8832_v27 = vld [vmem:[#allocation2 + $0x7e8] ss:$48 sps:$4 sm:$0xff]   ;;  %v8840_v29 = vld [vmem:[#allocation2 + $0x84c] ss:$48 sps:$4 sm:$0xff]   ;;  %v8835_v31 = vld [vmem:[#allocation2 + $0x840] ss:$48 sps:$4 sm:$0xff]  }
  0xc6   : > { %2356 = vmatprep.subr.bf16.mxu1 %v8752_v33  ;;  %v10237_v28 = vld [vmem:[%s10225_s15 + $0x8] sm:$0xff]  ;;  %v8843_v32 = vld [vmem:[#allocation2 + $0x8a4] ss:$48 sps:$4 sm:$0xff]   ;;  %vm9981_vm5 = vmmov 0  }
  0xc7   : > { %v10241_v30 = vcombine.high %v10237_v28, %v10237_v28  ;;  %v8838_v33 = vld [vmem:[#allocation2 + $0x848] ss:$48 sps:$4 sm:$0xff]   ;;  %v8864_v46 = vld [vmem:[#allocation2 + $0x9cc] ss:$48 sps:$4 sm:$0xff]  }
  0xc8   : > { %2234 = vmatpush1.bf16.msra.mxu0 %v8751_v34  ;;  %v8846_v34 = vld [vmem:[#allocation2 + $0x8ac] ss:$48 sps:$4 sm:$0xff]  }
  0xc9   : > { %2235 = vmatprep.subr.bf16.mxu0 %v8754_v35  ;;  %2357 = vmatpush1.bf16.msra.mxu1 %v8756_v36  ;;  %v8841_v35 = vld [vmem:[#allocation2 + $0x8a0] ss:$48 sps:$4 sm:$0xff]   ;;  %v8849_v36 = vld [vmem:[#allocation2 + $0x904] ss:$48 sps:$4 sm:$0xff]  }
  0xca   : > { %2358 = vmatprep.subr.bf16.mxu1 %v8758_v37  ;;  %v8844_v37 = vld [vmem:[#allocation2 + $0x8a8] ss:$48 sps:$4 sm:$0xff]  }
  0xcc   : > { %2236 = vmatpush1.bf16.msra.mxu0 %v8757_v38  ;;  %v8852_v38 = vld [vmem:[#allocation2 + $0x90c] ss:$48 sps:$4 sm:$0xff]  }
  0xcd   : > { %2237 = vmatprep.subr.bf16.mxu0 %v8760_v39  ;;  %2359 = vmatpush1.bf16.msra.mxu1 %v8762_v40  ;;  %v8847_v39 = vld [vmem:[#allocation2 + $0x900] ss:$48 sps:$4 sm:$0xff]   ;;  %v8855_v40 = vld [vmem:[#allocation2 + $0x964] ss:$48 sps:$4 sm:$0xff]  }
  0xce   : > { %2360 = vmatprep.subr.bf16.mxu1 %v8764_v41  ;;  %v8850_v41 = vld [vmem:[#allocation2 + $0x908] ss:$48 sps:$4 sm:$0xff]  }
  0xd0   : > { %2238 = vmatpush1.bf16.msra.mxu0 %v8763_v42  ;;  %v8858_v42 = vld [vmem:[#allocation2 + $0x96c] ss:$48 sps:$4 sm:$0xff]  }
  0xd1   : > { %2239 = vmatprep.subr.bf16.mxu0 %v8766_v43  ;;  %2361 = vmatpush1.bf16.msra.mxu1 %v8768_v44  ;;  %v8853_v43 = vld [vmem:[#allocation2 + $0x960] ss:$48 sps:$4 sm:$0xff]   ;;  %v8861_v44 = vld [vmem:[#allocation2 + $0x9c4] ss:$48 sps:$4 sm:$0xff]  }
  0xd2   : > { %2362 = vmatprep.subr.bf16.mxu1 %v8770_v45  ;;  %v8856_v45 = vld [vmem:[#allocation2 + $0x968] ss:$48 sps:$4 sm:$0xff]  }
  0xd4   : > { %2240 = vmatpush1.bf16.msra.mxu0 %v8769_v47  ;;  %v8859_v47 = vld [vmem:[#allocation2 + $0x9c0] ss:$48 sps:$4 sm:$0xff]  }
  0xd5   : > { %2241 = vmatprep.subr.bf16.mxu0 %v8772_v49  ;;  %2363 = vmatpush1.bf16.msra.mxu1 %v8774_v50  ;;  %v8867_v49 = vld [vmem:[#allocation2 + $0xa24] ss:$48 sps:$4 sm:$0xff]   ;;  %v8862_v50 = vld [vmem:[#allocation2 + $0x9c8] ss:$48 sps:$4 sm:$0xff]  }
  0xd6   : > { %2364 = vmatprep.subr.bf16.mxu1 %v8776_v51  ;;  %v8870_v51 = vld [vmem:[#allocation2 + $0xa2c] ss:$48 sps:$4 sm:$0xff]  }
  0xd8   : > { %2242 = vmatpush1.bf16.msra.mxu0 %v8775_v52  ;;  %v8865_v52 = vld [vmem:[#allocation2 + $0xa20] ss:$48 sps:$4 sm:$0xff]  }
  0xd9   : > { %2243 = vmatprep.subr.bf16.mxu0 %v8778_v53  ;;  %2365 = vmatpush1.bf16.msra.mxu1 %v8780_v54  ;;  %v8873_v53 = vld [vmem:[#allocation2 + $0xa84] ss:$48 sps:$4 sm:$0xff]   ;;  %v8868_v54 = vld [vmem:[#allocation2 + $0xa28] ss:$48 sps:$4 sm:$0xff]  }
  0xda   : > { %2366 = vmatprep.subr.bf16.mxu1 %v8782_v55  ;;  %v8876_v55 = vld [vmem:[#allocation2 + $0xa8c] ss:$48 sps:$4 sm:$0xff]  }
  0xdc   : > { %2244 = vmatpush1.bf16.msra.mxu0 %v8781_v56  ;;  %v8871_v56 = vld [vmem:[#allocation2 + $0xa80] ss:$48 sps:$4 sm:$0xff]  }
  0xdd   : > { %2245 = vmatprep.subr.bf16.mxu0 %v8784_v57  ;;  %2367 = vmatpush1.bf16.msra.mxu1 %v8786_v58  ;;  %v8879_v57 = vld [vmem:[#allocation2 + $0xae4] ss:$48 sps:$4 sm:$0xff]   ;;  %v8874_v58 = vld [vmem:[#allocation2 + $0xa88] ss:$48 sps:$4 sm:$0xff]  }
  0xde   : > { %2368 = vmatprep.subr.bf16.mxu1 %v8788_v59  ;;  %v8882_v59 = vld [vmem:[#allocation2 + $0xaec] ss:$48 sps:$4 sm:$0xff]  }
  0xe0   : > { %2246 = vmatpush1.bf16.msra.mxu0 %v8787_v60  ;;  %v8877_v60 = vld [vmem:[#allocation2 + $0xae0] ss:$48 sps:$4 sm:$0xff]  }
  0xe1   : > { %2247 = vmatprep.subr.bf16.mxu0 %v8790_v61  ;;  %2369 = vmatpush1.bf16.msra.mxu1 %v8792_v62  ;;  %v8885_v61 = vld [vmem:[#allocation2 + $0xb44] ss:$48 sps:$4 sm:$0xff]   ;;  %v8880_v62 = vld [vmem:[#allocation2 + $0xae8] ss:$48 sps:$4 sm:$0xff]  }
  0xe2   : > { %2370 = vmatprep.subr.bf16.mxu1 %v8794_v63  ;;  %v8888_v63 = vld [vmem:[#allocation2 + $0xb4c] ss:$48 sps:$4 sm:$0xff]  }
  0xe4   : > { %2248 = vmatpush1.bf16.msra.mxu0 %v8793_v0  ;;  %v8883_v0 = vld [vmem:[#allocation2 + $0xb40] ss:$48 sps:$4 sm:$0xff]  }
  0xe5   : > { %2258 = vmatprep.subr.bf16.mxu0 %v8799_v1  ;;  %2371 = vmatpush1.bf16.msra.mxu1 %v8800_v2  ;;  %v8891_v1 = vld [vmem:[#allocation2 + $0xba4] ss:$48 sps:$4 sm:$0xff]   ;;  %v8886_v2 = vld [vmem:[#allocation2 + $0xb48] ss:$48 sps:$4 sm:$0xff]  }
  0xe6   : > { %2381 = vmatprep.subr.bf16.mxu1 %v8804_v4  ;;  %v8894_v4 = vld [vmem:[#allocation2 + $0xbac] ss:$48 sps:$4 sm:$0xff]  }
  0xe7   : > { %2250 = vmatmul.mubr.bf16.vlgmr.msra.gmra.mrb[0].mxu0 %v10232_v3 }
  0xe8   : > { %2259 = vmatpush1.bf16.msra.mxu0 %v8797_v5  ;;  %2373 = vmatmul.mubr.bf16.vlgmr.msra.gmra.mrb[0].mxu1 %v10232_v3  ;;  %v8889_v5 = vld [vmem:[#allocation2 + $0xba0] ss:$48 sps:$4 sm:$0xff]  }
  0xe9   : > { %2260 = vmatprep.subr.bf16.mxu0 %v8807_v6  ;;  %2382 = vmatpush1.bf16.msra.mxu1 %v8802_v7  ;;  %v8898_v6 = vld [vmem:[#allocation2 + $0xc04] ss:$48 sps:$4 sm:$0xff]   ;;  %v8892_v7 = vld [vmem:[#allocation2 + $0xba8] ss:$48 sps:$4 sm:$0xff]  }
  0xea   : > { %2383 = vmatprep.subr.bf16.mxu1 %v8810_v8  ;;  %2290 = vmatprep.mubr.bf16.mxu0 %v10241_v30  ;;  %v10247_v8 = vcombine.low %v10237_v28, %v10237_v28  ;;  %v8921_v28 = vld [vmem:[#allocation2 + $0xd80] ss:$48 sps:$4 sm:$0xff]  }
  0xeb   : > { %2413 = vmatprep.mubr.bf16.mxu1 %v10241_v30 }
  0xec   : > { %2261 = vmatpush1.bf16.msra.mxu0 %v8805_v9  ;;  %v8902_v9 = vld [vmem:[#allocation2 + $0xc0c] ss:$48 sps:$4 sm:$0xff]  }
  0xed   : > { %2262 = vmatprep.subr.bf16.mxu0 %v8813_v10  ;;  %2384 = vmatpush1.bf16.msra.mxu1 %v8808_v11  ;;  %v8896_v10 = vld [vmem:[#allocation2 + $0xc00] ss:$48 sps:$4 sm:$0xff]  }
  0xee   : > { %2385 = vmatprep.subr.bf16.mxu1 %v8816_v12  ;;  %v10250_v11 = vld [vmem:[%s10225_s15 + $0x10] sm:$0xff] }
  0xef   : > { %v8905_v12 = vld [vmem:[#allocation2 + $0xc64] ss:$48 sps:$4 sm:$0xff]  }
  0xf0   : > { %2263 = vmatpush1.bf16.msra.mxu0 %v8811_v13  ;;  %v10254_v13 = vcombine.high %v10250_v11, %v10250_v11 }
  0xf1   : > { %2264 = vmatprep.subr.bf16.mxu0 %v8819_v14  ;;  %2386 = vmatpush1.bf16.msra.mxu1 %v8814_v15  ;;  %v8900_v14 = vld [vmem:[#allocation2 + $0xc08] ss:$48 sps:$4 sm:$0xff]   ;;  %v8908_v15 = vld [vmem:[#allocation2 + $0xc6c] ss:$48 sps:$4 sm:$0xff]  }
  0xf2   : > { %2387 = vmatprep.subr.bf16.mxu1 %v8822_v16  ;;  %v8903_v16 = vld [vmem:[#allocation2 + $0xc60] ss:$48 sps:$4 sm:$0xff]  }
  0xf4   : > { %2265 = vmatpush1.bf16.msra.mxu0 %v8817_v17  ;;  %v8911_v17 = vld [vmem:[#allocation2 + $0xcc4] ss:$48 sps:$4 sm:$0xff]  }
  0xf5   : > { %2266 = vmatprep.subr.bf16.mxu0 %v8825_v18  ;;  %2388 = vmatpush1.bf16.msra.mxu1 %v8820_v19  ;;  %v8906_v18 = vld [vmem:[#allocation2 + $0xc68] ss:$48 sps:$4 sm:$0xff]   ;;  %v8914_v19 = vld [vmem:[#allocation2 + $0xccc] ss:$48 sps:$4 sm:$0xff]  }
  0xf6   : > { %2389 = vmatprep.subr.bf16.mxu1 %v8828_v20  ;;  %v8909_v20 = vld [vmem:[#allocation2 + $0xcc0] ss:$48 sps:$4 sm:$0xff]  }
  0xf8   : > { %2267 = vmatpush1.bf16.msra.mxu0 %v8823_v21  ;;  %v8917_v21 = vld [vmem:[#allocation2 + $0xd24] ss:$48 sps:$4 sm:$0xff]  }
  0xf9   : > { %2268 = vmatprep.subr.bf16.mxu0 %v8831_v22  ;;  %2390 = vmatpush1.bf16.msra.mxu1 %v8826_v23  ;;  %v8912_v22 = vld [vmem:[#allocation2 + $0xcc8] ss:$48 sps:$4 sm:$0xff]   ;;  %v8920_v23 = vld [vmem:[#allocation2 + $0xd2c] ss:$48 sps:$4 sm:$0xff]  }
  0xfa   : > { %2391 = vmatprep.subr.bf16.mxu1 %v8834_v24  ;;  %v8915_v24 = vld [vmem:[#allocation2 + $0xd20] ss:$48 sps:$4 sm:$0xff]  }
  0xfc   : > { %2269 = vmatpush1.bf16.msra.mxu0 %v8829_v25  ;;  %v8923_v25 = vld [vmem:[#allocation2 + $0xd84] ss:$48 sps:$4 sm:$0xff]  }
  0xfd   : > { %2270 = vmatprep.subr.bf16.mxu0 %v8837_v26  ;;  %2392 = vmatpush1.bf16.msra.mxu1 %v8832_v27  ;;  %v8918_v26 = vld [vmem:[#allocation2 + $0xd28] ss:$48 sps:$4 sm:$0xff]   ;;  %v8926_v27 = vld [vmem:[#allocation2 + $0xd8c] ss:$48 sps:$4 sm:$0xff]  }
  0xfe   : > { %2393 = vmatprep.subr.bf16.mxu1 %v8840_v29  ;;  %v8929_v29 = vld [vmem:[#allocation2 + $0xde4] ss:$48 sps:$4 sm:$0xff]  }
 0x100   : > { %2271 = vmatpush1.bf16.msra.mxu0 %v8835_v31  ;;  %v8924_v31 = vld [vmem:[#allocation2 + $0xd88] ss:$48 sps:$4 sm:$0xff]  }
 0x101   : > { %2272 = vmatprep.subr.bf16.mxu0 %v8843_v32  ;;  %2394 = vmatpush1.bf16.msra.mxu1 %v8838_v33  ;;  %v8932_v32 = vld [vmem:[#allocation2 + $0xdec] ss:$48 sps:$4 sm:$0xff]   ;;  %v8927_v33 = vld [vmem:[#allocation2 + $0xde0] ss:$48 sps:$4 sm:$0xff]  }
 0x102   : > { %2395 = vmatprep.subr.bf16.mxu1 %v8846_v34  ;;  %v8935_v34 = vld [vmem:[#allocation2 + $0xe44] ss:$48 sps:$4 sm:$0xff]  }
 0x104   : > { %2273 = vmatpush1.bf16.msra.mxu0 %v8841_v35  ;;  %v8930_v35 = vld [vmem:[#allocation2 + $0xde8] ss:$48 sps:$4 sm:$0xff]  }
 0x105   : > { %2274 = vmatprep.subr.bf16.mxu0 %v8849_v36  ;;  %2396 = vmatpush1.bf16.msra.mxu1 %v8844_v37  ;;  %v8938_v36 = vld [vmem:[#allocation2 + $0xe4c] ss:$48 sps:$4 sm:$0xff]   ;;  %v8933_v37 = vld [vmem:[#allocation2 + $0xe40] ss:$48 sps:$4 sm:$0xff]  }
 0x106   : > { %2397 = vmatprep.subr.bf16.mxu1 %v8852_v38  ;;  %v8941_v38 = vld [vmem:[#allocation2 + $0xea4] ss:$48 sps:$4 sm:$0xff]  }
 0x108   : > { %2275 = vmatpush1.bf16.msra.mxu0 %v8847_v39  ;;  %v8936_v39 = vld [vmem:[#allocation2 + $0xe48] ss:$48 sps:$4 sm:$0xff]  }
 0x109   : > { %2276 = vmatprep.subr.bf16.mxu0 %v8855_v40  ;;  %2398 = vmatpush1.bf16.msra.mxu1 %v8850_v41  ;;  %v8944_v40 = vld [vmem:[#allocation2 + $0xeac] ss:$48 sps:$4 sm:$0xff]   ;;  %v8939_v41 = vld [vmem:[#allocation2 + $0xea0] ss:$48 sps:$4 sm:$0xff]  }
 0x10a   : > { %2399 = vmatprep.subr.bf16.mxu1 %v8858_v42  ;;  %v8947_v42 = vld [vmem:[#allocation2 + $0xf04] ss:$48 sps:$4 sm:$0xff]  }
 0x10c   : > { %2277 = vmatpush1.bf16.msra.mxu0 %v8853_v43  ;;  %v8942_v43 = vld [vmem:[#allocation2 + $0xea8] ss:$48 sps:$4 sm:$0xff]  }
 0x10d   : > { %2278 = vmatprep.subr.bf16.mxu0 %v8861_v44  ;;  %2400 = vmatpush1.bf16.msra.mxu1 %v8856_v45  ;;  %v8950_v44 = vld [vmem:[#allocation2 + $0xf0c] ss:$48 sps:$4 sm:$0xff]   ;;  %v8945_v45 = vld [vmem:[#allocation2 + $0xf00] ss:$48 sps:$4 sm:$0xff]  }
 0x10e   : > { %2401 = vmatprep.subr.bf16.mxu1 %v8864_v46  ;;  %v8948_v46 = vld [vmem:[#allocation2 + $0xf08] ss:$48 sps:$4 sm:$0xff]  }
 0x110   : > { %2279 = vmatpush1.bf16.msra.mxu0 %v8859_v47  ;;  %v8953_v47 = vld [vmem:[#allocation2 + $0xf64] ss:$48 sps:$4 sm:$0xff]  }
 0x111   : > { %2280 = vmatprep.subr.bf16.mxu0 %v8867_v49  ;;  %2402 = vmatpush1.bf16.msra.mxu1 %v8862_v50  ;;  %v8951_v49 = vld [vmem:[#allocation2 + $0xf60] ss:$48 sps:$4 sm:$0xff]   ;;  %v8956_v50 = vld [vmem:[#allocation2 + $0xf6c] ss:$48 sps:$4 sm:$0xff]  }
 0x112   : > { %2403 = vmatprep.subr.bf16.mxu1 %v8870_v51  ;;  %v8954_v51 = vld [vmem:[#allocation2 + $0xf68] ss:$48 sps:$4 sm:$0xff]  }
 0x114   : > { %2281 = vmatpush1.bf16.msra.mxu0 %v8865_v52  ;;  %v8959_v52 = vld [vmem:[#allocation2 + $0xfc4] ss:$48 sps:$4 sm:$0xff]  }
 0x115   : > { %2282 = vmatprep.subr.bf16.mxu0 %v8873_v53  ;;  %2404 = vmatpush1.bf16.msra.mxu1 %v8868_v54  ;;  %v8962_v53 = vld [vmem:[#allocation2 + $0xfcc] ss:$48 sps:$4 sm:$0xff]   ;;  %v8957_v54 = vld [vmem:[#allocation2 + $0xfc0] ss:$48 sps:$4 sm:$0xff]  }
 0x116   : > { %2405 = vmatprep.subr.bf16.mxu1 %v8876_v55  ;;  %v8960_v55 = vld [vmem:[#allocation2 + $0xfc8] ss:$48 sps:$4 sm:$0xff]  }
 0x118   : > { %2283 = vmatpush1.bf16.msra.mxu0 %v8871_v56  ;;  %v8965_v56 = vld [vmem:[#allocation2 + $0x1024] ss:$48 sps:$4 sm:$0xff]  }
 0x119   : > { %2284 = vmatprep.subr.bf16.mxu0 %v8879_v57  ;;  %2406 = vmatpush1.bf16.msra.mxu1 %v8874_v58  ;;  %v8968_v57 = vld [vmem:[#allocation2 + $0x102c] ss:$48 sps:$4 sm:$0xff]   ;;  %v8963_v58 = vld [vmem:[#allocation2 + $0x1020] ss:$48 sps:$4 sm:$0xff]  }
 0x11a   : > { %2407 = vmatprep.subr.bf16.mxu1 %v8882_v59  ;;  %v8966_v59 = vld [vmem:[#allocation2 + $0x1028] ss:$48 sps:$4 sm:$0xff]  }
 0x11c   : > { %2285 = vmatpush1.bf16.msra.mxu0 %v8877_v60  ;;  %v8971_v60 = vld [vmem:[#allocation2 + $0x1084] ss:$48 sps:$4 sm:$0xff]  }
 0x11d   : > { %2286 = vmatprep.subr.bf16.mxu0 %v8885_v61  ;;  %2408 = vmatpush1.bf16.msra.mxu1 %v8880_v62  ;;  %v8974_v61 = vld [vmem:[#allocation2 + $0x108c] ss:$48 sps:$4 sm:$0xff]   ;;  %v8969_v62 = vld [vmem:[#allocation2 + $0x1080] ss:$48 sps:$4 sm:$0xff]  }
 0x11e   : > { %2409 = vmatprep.subr.bf16.mxu1 %v8888_v63  ;;  %v8972_v63 = vld [vmem:[#allocation2 + $0x1088] ss:$48 sps:$4 sm:$0xff]  }
 0x120   : > { %2287 = vmatpush1.bf16.msra.mxu0 %v8883_v0  ;;  %v8977_v0 = vld [vmem:[#allocation2 + $0x10e4] ss:$48 sps:$4 sm:$0xff]  }
 0x121   : > { %2288 = vmatprep.subr.bf16.mxu0 %v8891_v1  ;;  %2410 = vmatpush1.bf16.msra.mxu1 %v8886_v2  ;;  %v8980_v1 = vld [vmem:[#allocation2 + $0x10ec] ss:$48 sps:$4 sm:$0xff]   ;;  %v8975_v2 = vld [vmem:[#allocation2 + $0x10e0] ss:$48 sps:$4 sm:$0xff]  }
 0x122   : > { %2411 = vmatprep.subr.bf16.mxu1 %v8894_v4  ;;  %v8978_v4 = vld [vmem:[#allocation2 + $0x10e8] ss:$48 sps:$4 sm:$0xff]  }
 0x124   : > { %2289 = vmatpush1.bf16.msra.mxu0 %v8889_v5  ;;  %v8983_v5 = vld [vmem:[#allocation2 + $0x1144] ss:$48 sps:$4 sm:$0xff]  }
 0x125   : > { %2299 = vmatprep.subr.bf16.mxu0 %v8898_v6  ;;  %2412 = vmatpush1.bf16.msra.mxu1 %v8892_v7  ;;  %v8986_v6 = vld [vmem:[#allocation2 + $0x114c] ss:$48 sps:$4 sm:$0xff]   ;;  %v8981_v7 = vld [vmem:[#allocation2 + $0x1140] ss:$48 sps:$4 sm:$0xff]  }
 0x126   : > { %2422 = vmatprep.subr.bf16.mxu1 %v8902_v9  ;;  %v8984_v9 = vld [vmem:[#allocation2 + $0x1148] ss:$48 sps:$4 sm:$0xff]  }
 0x127   : > { %2291 = vmatmul.mubr.bf16.vlgmr.msra.gmra.mrb[0].mxu0 %v10247_v8 }
 0x128   : > { %2300 = vmatpush1.bf16.msra.mxu0 %v8896_v10  ;;  %2331 = vmatprep.mubr.bf16.mxu0 %v10254_v13  ;;  %v8989_v10 = vld [vmem:[#allocation2 + $0x11a4] ss:$48 sps:$4 sm:$0xff]  }
 0x129   : > { %2301 = vmatprep.subr.bf16.mxu0 %v8905_v12  ;;  %2414 = vmatmul.mubr.bf16.vlgmr.msra.gmra.mrb[0].mxu1 %v10247_v8  ;;  %v8993_v12 = vld [vmem:[#allocation2 + $0x11ac] ss:$48 sps:$4 sm:$0xff]  }
 0x12a   : > { %2423 = vmatpush1.bf16.msra.mxu1 %v8900_v14  ;;  %2454 = vmatprep.mubr.bf16.mxu1 %v10254_v13  ;;  %v8987_v14 = vld [vmem:[#allocation2 + $0x11a0] ss:$48 sps:$4 sm:$0xff]  }
 0x12b   : > { %2424 = vmatprep.subr.bf16.mxu1 %v8908_v15  ;;  %v8991_v15 = vld [vmem:[#allocation2 + $0x11a8] ss:$48 sps:$4 sm:$0xff]  }
 0x12c   : > { %2302 = vmatpush1.bf16.msra.mxu0 %v8903_v16  ;;  %v8997_v16 = vld [vmem:[#allocation2 + $0x14] ss:$48 sps:$4 sm:$0xff]  }
 0x12d   : > { %2303 = vmatprep.subr.bf16.mxu0 %v8911_v17  ;;  %v10262_v17 = vcombine.low %v10250_v11, %v10250_v11  ;;  %v9004_v11 = vld [vmem:[#allocation2 + $0x130] ss:$48 sps:$4 sm:$0xff]  }
 0x12e   : > { %2425 = vmatpush1.bf16.msra.mxu1 %v8906_v18  ;;  %v8995_v18 = vld [vmem:[#allocation2 + $0x10] ss:$48 sps:$4 sm:$0xff]  }
 0x12f   : > { %2426 = vmatprep.subr.bf16.mxu1 %v8914_v19  ;;  %v9000_v19 = vld [vmem:[#allocation2 + $0x74] ss:$48 sps:$4 sm:$0xff]  }
 0x130   : > { %2304 = vmatpush1.bf16.msra.mxu0 %v8909_v20  ;;  %v8998_v20 = vld [vmem:[#allocation2 + $0x70] ss:$48 sps:$4 sm:$0xff]  }
 0x131   : > { %2305 = vmatprep.subr.bf16.mxu0 %v8917_v21  ;;  %v9003_v21 = vld [vmem:[#allocation2 + $0xd4] ss:$48 sps:$4 sm:$0xff]  }
 0x132   : > { %2427 = vmatpush1.bf16.msra.mxu1 %v8912_v22  ;;  %v9001_v22 = vld [vmem:[#allocation2 + $0xd0] ss:$48 sps:$4 sm:$0xff]  }
 0x133   : > { %2428 = vmatprep.subr.bf16.mxu1 %v8920_v23  ;;  %v9006_v23 = vld [vmem:[#allocation2 + $0x134] ss:$48 sps:$4 sm:$0xff]  }
 0x134   : > { %2306 = vmatpush1.bf16.msra.mxu0 %v8915_v24  ;;  %v9009_v24 = vld [vmem:[#allocation2 + $0x194] ss:$48 sps:$4 sm:$0xff]  }
 0x135   : > { %2307 = vmatprep.subr.bf16.mxu0 %v8923_v25  ;;  %v9007_v25 = vld [vmem:[#allocation2 + $0x190] ss:$48 sps:$4 sm:$0xff]  }
 0x136   : > { %2429 = vmatpush1.bf16.msra.mxu1 %v8918_v26  ;;  %v9012_v26 = vld [vmem:[#allocation2 + $0x1f4] ss:$48 sps:$4 sm:$0xff]  }
 0x137   : > { %2430 = vmatprep.subr.bf16.mxu1 %v8926_v27  ;;  %v9010_v27 = vld [vmem:[#allocation2 + $0x1f0] ss:$48 sps:$4 sm:$0xff]  }
 0x138   : > { %2308 = vmatpush1.bf16.msra.mxu0 %v8921_v28  ;;  %v9015_v28 = vld [vmem:[#allocation2 + $0x254] ss:$48 sps:$4 sm:$0xff]  }
 0x139   : > { %2309 = vmatprep.subr.bf16.mxu0 %v8929_v29  ;;  %v9018_v29 = vld [vmem:[#allocation2 + $0x2b4] ss:$48 sps:$4 sm:$0xff]  }
 0x13a   : > { %2431 = vmatpush1.bf16.msra.mxu1 %v8924_v31  ;;  %v9016_v31 = vld [vmem:[#allocation2 + $0x2b0] ss:$48 sps:$4 sm:$0xff]  }
 0x13b   : > { %2432 = vmatprep.subr.bf16.mxu1 %v8932_v32  ;;  %v9021_v32 = vld [vmem:[#allocation2 + $0x314] ss:$48 sps:$4 sm:$0xff]  }
 0x13c   : > { %2310 = vmatpush1.bf16.msra.mxu0 %v8927_v33  ;;  %v9019_v33 = vld [vmem:[#allocation2 + $0x310] ss:$48 sps:$4 sm:$0xff]  }
 0x13d   : > { %2311 = vmatprep.subr.bf16.mxu0 %v8935_v34  ;;  %v9024_v34 = vld [vmem:[#allocation2 + $0x374] ss:$48 sps:$4 sm:$0xff]  }
 0x13e   : > { %2433 = vmatpush1.bf16.msra.mxu1 %v8930_v35  ;;  %v9022_v35 = vld [vmem:[#allocation2 + $0x370] ss:$48 sps:$4 sm:$0xff]  }
 0x13f   : > { %2434 = vmatprep.subr.bf16.mxu1 %v8938_v36  ;;  %v9027_v36 = vld [vmem:[#allocation2 + $0x3d4] ss:$48 sps:$4 sm:$0xff]  }
 0x140   : > { %2312 = vmatpush1.bf16.msra.mxu0 %v8933_v37  ;;  %v9025_v37 = vld [vmem:[#allocation2 + $0x3d0] ss:$48 sps:$4 sm:$0xff]  }
 0x141   : > { %2313 = vmatprep.subr.bf16.mxu0 %v8941_v38  ;;  %v9030_v38 = vld [vmem:[#allocation2 + $0x434] ss:$48 sps:$4 sm:$0xff]  }
 0x142   : > { %2435 = vmatpush1.bf16.msra.mxu1 %v8936_v39  ;;  %v9028_v39 = vld [vmem:[#allocation2 + $0x430] ss:$48 sps:$4 sm:$0xff]  }
 0x143   : > { %2436 = vmatprep.subr.bf16.mxu1 %v8944_v40  ;;  %v9033_v40 = vld [vmem:[#allocation2 + $0x494] ss:$48 sps:$4 sm:$0xff]  }
 0x144   : > { %2314 = vmatpush1.bf16.msra.mxu0 %v8939_v41  ;;  %v9031_v41 = vld [vmem:[#allocation2 + $0x490] ss:$48 sps:$4 sm:$0xff]  }
 0x145   : > { %2315 = vmatprep.subr.bf16.mxu0 %v8947_v42  ;;  %v9036_v42 = vld [vmem:[#allocation2 + $0x4f4] ss:$48 sps:$4 sm:$0xff]  }
 0x146   : > { %2437 = vmatpush1.bf16.msra.mxu1 %v8942_v43  ;;  %v9034_v43 = vld [vmem:[#allocation2 + $0x4f0] ss:$48 sps:$4 sm:$0xff]  }
 0x147   : > { %2438 = vmatprep.subr.bf16.mxu1 %v8950_v44  ;;  %v9039_v44 = vld [vmem:[#allocation2 + $0x554] ss:$48 sps:$4 sm:$0xff]  }
 0x148   : > { %2316 = vmatpush1.bf16.msra.mxu0 %v8945_v45  ;;  %v9037_v45 = vld [vmem:[#allocation2 + $0x550] ss:$48 sps:$4 sm:$0xff]  }
 0x149   : > { %2317 = vmatprep.subr.bf16.mxu0 %v8953_v47  ;;  %v9040_v47 = vld [vmem:[#allocation2 + $0x5b0] ss:$48 sps:$4 sm:$0xff]  }
 0x14a   : > { %2439 = vmatpush1.bf16.msra.mxu1 %v8948_v46  ;;  %v9042_v46 = vld [vmem:[#allocation2 + $0x5b4] ss:$48 sps:$4 sm:$0xff]  }
 0x14b   : > { %2440 = vmatprep.subr.bf16.mxu1 %v8956_v50  ;;  %v9043_v50 = vld [vmem:[#allocation2 + $0x610] ss:$48 sps:$4 sm:$0xff]  }
 0x14c   : > { %2318 = vmatpush1.bf16.msra.mxu0 %v8951_v49  ;;  %v9045_v49 = vld [vmem:[#allocation2 + $0x614] ss:$48 sps:$4 sm:$0xff]  }
 0x14d   : > { %2319 = vmatprep.subr.bf16.mxu0 %v8959_v52  ;;  %v9046_v52 = vld [vmem:[#allocation2 + $0x670] ss:$48 sps:$4 sm:$0xff]  }
 0x14e   : > { %2441 = vmatpush1.bf16.msra.mxu1 %v8954_v51  ;;  %v9048_v51 = vld [vmem:[#allocation2 + $0x674] ss:$48 sps:$4 sm:$0xff]  }
 0x14f   : > { %2442 = vmatprep.subr.bf16.mxu1 %v8962_v53  ;;  %v9051_v53 = vld [vmem:[#allocation2 + $0x6d4] ss:$48 sps:$4 sm:$0xff]  }
 0x150   : > { %2320 = vmatpush1.bf16.msra.mxu0 %v8957_v54  ;;  %v9049_v54 = vld [vmem:[#allocation2 + $0x6d0] ss:$48 sps:$4 sm:$0xff]  }
 0x151   : > { %2321 = vmatprep.subr.bf16.mxu0 %v8965_v56  ;;  %v9052_v56 = vld [vmem:[#allocation2 + $0x730] ss:$48 sps:$4 sm:$0xff]  }
 0x152   : > { %2443 = vmatpush1.bf16.msra.mxu1 %v8960_v55  ;;  %v9054_v55 = vld [vmem:[#allocation2 + $0x734] ss:$48 sps:$4 sm:$0xff]  }
 0x153   : > { %2444 = vmatprep.subr.bf16.mxu1 %v8968_v57  ;;  %v9057_v57 = vld [vmem:[#allocation2 + $0x794] ss:$48 sps:$4 sm:$0xff]  }
 0x154   : > { %2322 = vmatpush1.bf16.msra.mxu0 %v8963_v58  ;;  %v9055_v58 = vld [vmem:[#allocation2 + $0x790] ss:$48 sps:$4 sm:$0xff]  }
 0x155   : > { %2323 = vmatprep.subr.bf16.mxu0 %v8971_v60  ;;  %v9058_v60 = vld [vmem:[#allocation2 + $0x7f0] ss:$48 sps:$4 sm:$0xff]  }
 0x156   : > { %2445 = vmatpush1.bf16.msra.mxu1 %v8966_v59  ;;  %v9060_v59 = vld [vmem:[#allocation2 + $0x7f4] ss:$48 sps:$4 sm:$0xff]  }
 0x157   : > { %2446 = vmatprep.subr.bf16.mxu1 %v8974_v61  ;;  %v9061_v61 = vld [vmem:[#allocation2 + $0x850] ss:$48 sps:$4 sm:$0xff]  }
 0x158   : > { %2324 = vmatpush1.bf16.msra.mxu0 %v8969_v62  ;;  %v9066_v62 = vld [vmem:[#allocation2 + $0x8b4] ss:$48 sps:$4 sm:$0xff]  }
 0x159   : > { %2325 = vmatprep.subr.bf16.mxu0 %v8977_v0  ;;  %v9067_v0 = vld [vmem:[#allocation2 + $0x910] ss:$48 sps:$4 sm:$0xff]  }
 0x15a   : > { %2447 = vmatpush1.bf16.msra.mxu1 %v8972_v63  ;;  %v9069_v63 = vld [vmem:[#allocation2 + $0x914] ss:$48 sps:$4 sm:$0xff]  }
 0x15b   : > { %2448 = vmatprep.subr.bf16.mxu1 %v8980_v1  ;;  %v9072_v1 = vld [vmem:[#allocation2 + $0x974] ss:$48 sps:$4 sm:$0xff]  }
 0x15c   : > { %2326 = vmatpush1.bf16.msra.mxu0 %v8975_v2  ;;  %v9070_v2 = vld [vmem:[#allocation2 + $0x970] ss:$48 sps:$4 sm:$0xff]  }
 0x15d   : > { %2327 = vmatprep.subr.bf16.mxu0 %v8983_v5  ;;  %v9073_v5 = vld [vmem:[#allocation2 + $0x9d0] ss:$48 sps:$4 sm:$0xff]  }
 0x15e   : > { %2449 = vmatpush1.bf16.msra.mxu1 %v8978_v4  ;;  %v9075_v4 = vld [vmem:[#allocation2 + $0x9d4] ss:$48 sps:$4 sm:$0xff]  }
 0x15f   : > { %2450 = vmatprep.subr.bf16.mxu1 %v8986_v6  ;;  %v9078_v6 = vld [vmem:[#allocation2 + $0xa34] ss:$48 sps:$4 sm:$0xff]  }
 0x160   : > { %2328 = vmatpush1.bf16.msra.mxu0 %v8981_v7  ;;  %v9076_v7 = vld [vmem:[#allocation2 + $0xa30] ss:$48 sps:$4 sm:$0xff]  }
 0x161   : > { %2329 = vmatprep.subr.bf16.mxu0 %v8989_v10  ;;  %v9079_v10 = vld [vmem:[#allocation2 + $0xa90] ss:$48 sps:$4 sm:$0xff]  }
 0x162   : > { %2451 = vmatpush1.bf16.msra.mxu1 %v8984_v9  ;;  %v9081_v9 = vld [vmem:[#allocation2 + $0xa94] ss:$48 sps:$4 sm:$0xff]  }
 0x163   : > { %2452 = vmatprep.subr.bf16.mxu1 %v8993_v12  ;;  %v9084_v12 = vld [vmem:[#allocation2 + $0xaf4] ss:$48 sps:$4 sm:$0xff]  }
 0x164   : > { %2330 = vmatpush1.bf16.msra.mxu0 %v8987_v14  ;;  %v9082_v14 = vld [vmem:[#allocation2 + $0xaf0] ss:$48 sps:$4 sm:$0xff]  }
 0x165   : > { %2463 = vmatprep.subr.bf16.mxu0 %v8997_v16  ;;  %v9085_v16 = vld [vmem:[#allocation2 + $0xb50] ss:$48 sps:$4 sm:$0xff]  }
 0x166   : > { %2453 = vmatpush1.bf16.msra.mxu1 %v8991_v15  ;;  %v9087_v15 = vld [vmem:[#allocation2 + $0xb54] ss:$48 sps:$4 sm:$0xff]  }
 0x167   : > { %2332 = vmatmul.mubr.bf16.vlgmr.msra.gmra.mrb[0].mxu0 %v10262_v17 }
 0x168   : > { %2464 = vmatpush1.bf16.msra.mxu0 %v8995_v18  ;;  %2495 = vmatprep.mubr.bf16.mxu0 %v10228_v48  ;;  %v9013_v48 = vld [vmem:[#allocation2 + $0x250] ss:$48 sps:$4 sm:$0xff]   ;;  %v9090_v18 = vld [vmem:[#allocation2 + $0xbb4] ss:$48 sps:$4 sm:$0xff]  }
 0x169   : > { %2455 = vmatmul.mubr.bf16.vlgmr.msra.gmra.mrb[0].mxu1 %v10262_v17  ;;  %2465 = vmatprep.subr.bf16.mxu0 %v9000_v19  ;;  %v9088_v19 = vld [vmem:[#allocation2 + $0xbb0] ss:$48 sps:$4 sm:$0xff]  }
 0x16c   : > { %2466 = vmatpush1.bf16.msra.mxu0 %v8998_v20  ;;  %v9093_v20 = vld [vmem:[#allocation2 + $0xc14] ss:$48 sps:$4 sm:$0xff]  }
 0x16d   : > { %2467 = vmatprep.subr.bf16.mxu0 %v9003_v21  ;;  %v9091_v21 = vld [vmem:[#allocation2 + $0xc10] ss:$48 sps:$4 sm:$0xff]  }
 0x170   : > { %2468 = vmatpush1.bf16.msra.mxu0 %v9001_v22  ;;  %v9096_v22 = vld [vmem:[#allocation2 + $0xc74] ss:$48 sps:$4 sm:$0xff]  }
 0x171   : > { %2469 = vmatprep.subr.bf16.mxu0 %v9006_v23  ;;  %v9094_v23 = vld [vmem:[#allocation2 + $0xc70] ss:$48 sps:$4 sm:$0xff]  }
 0x174   : > { %2470 = vmatpush1.bf16.msra.mxu0 %v9004_v11  ;;  %v9099_v11 = vld [vmem:[#allocation2 + $0xcd4] ss:$48 sps:$4 sm:$0xff]  }
 0x175   : > { %2471 = vmatprep.subr.bf16.mxu0 %v9009_v24  ;;  %v9097_v24 = vld [vmem:[#allocation2 + $0xcd0] ss:$48 sps:$4 sm:$0xff]  }
 0x178   : > { %2472 = vmatpush1.bf16.msra.mxu0 %v9007_v25  ;;  %v9102_v25 = vld [vmem:[#allocation2 + $0xd34] ss:$48 sps:$4 sm:$0xff]  }
 0x179   : > { %2473 = vmatprep.subr.bf16.mxu0 %v9012_v26  ;;  %v9100_v26 = vld [vmem:[#allocation2 + $0xd30] ss:$48 sps:$4 sm:$0xff]  }
 0x17c   : > { %2474 = vmatpush1.bf16.msra.mxu0 %v9010_v27  ;;  %v9105_v27 = vld [vmem:[#allocation2 + $0xd94] ss:$48 sps:$4 sm:$0xff]  }
 0x17d   : > { %2475 = vmatprep.subr.bf16.mxu0 %v9015_v28  ;;  %v9103_v28 = vld [vmem:[#allocation2 + $0xd90] ss:$48 sps:$4 sm:$0xff]  }
 0x180   : > { %2476 = vmatpush1.bf16.msra.mxu0 %v9013_v48  ;;  %v9108_v48 = vld [vmem:[#allocation2 + $0xdf4] ss:$48 sps:$4 sm:$0xff]  }
 0x181   : > { %2477 = vmatprep.subr.bf16.mxu0 %v9018_v29  ;;  %v9106_v29 = vld [vmem:[#allocation2 + $0xdf0] ss:$48 sps:$4 sm:$0xff]  }
 0x184   : > { %2478 = vmatpush1.bf16.msra.mxu0 %v9016_v31  ;;  %v9111_v31 = vld [vmem:[#allocation2 + $0xe54] ss:$48 sps:$4 sm:$0xff]  }
 0x185   : > { %2479 = vmatprep.subr.bf16.mxu0 %v9021_v32  ;;  %v9114_v32 = vld [vmem:[#allocation2 + $0xeb4] ss:$48 sps:$4 sm:$0xff]  }
 0x188   : > { %2480 = vmatpush1.bf16.msra.mxu0 %v9019_v33  ;;  %v9117_v33 = vld [vmem:[#allocation2 + $0xf14] ss:$48 sps:$4 sm:$0xff]  }
 0x189   : > { %2481 = vmatprep.subr.bf16.mxu0 %v9024_v34  ;;  %v9115_v34 = vld [vmem:[#allocation2 + $0xf10] ss:$48 sps:$4 sm:$0xff]  }
 0x18c   : > { %2482 = vmatpush1.bf16.msra.mxu0 %v9022_v35  ;;  %v9120_v35 = vld [vmem:[#allocation2 + $0xf74] ss:$48 sps:$4 sm:$0xff]  }
 0x18d   : > { %2483 = vmatprep.subr.bf16.mxu0 %v9027_v36  ;;  %v9118_v36 = vld [vmem:[#allocation2 + $0xf70] ss:$48 sps:$4 sm:$0xff]  }
 0x190   : > { %2484 = vmatpush1.bf16.msra.mxu0 %v9025_v37  ;;  %v9123_v37 = vld [vmem:[#allocation2 + $0xfd4] ss:$48 sps:$4 sm:$0xff]  }
 0x191   : > { %2485 = vmatprep.subr.bf16.mxu0 %v9030_v38  ;;  %v9121_v38 = vld [vmem:[#allocation2 + $0xfd0] ss:$48 sps:$4 sm:$0xff]  }
 0x194   : > { %2486 = vmatpush1.bf16.msra.mxu0 %v9028_v39  ;;  %v9126_v39 = vld [vmem:[#allocation2 + $0x1034] ss:$48 sps:$4 sm:$0xff]  }
 0x195   : > { %2487 = vmatprep.subr.bf16.mxu0 %v9033_v40  ;;  %v9124_v40 = vld [vmem:[#allocation2 + $0x1030] ss:$48 sps:$4 sm:$0xff]  }
 0x198   : > { %2488 = vmatpush1.bf16.msra.mxu0 %v9031_v41  ;;  %v9129_v41 = vld [vmem:[#allocation2 + $0x1094] ss:$48 sps:$4 sm:$0xff]  }
 0x199   : > { %2489 = vmatprep.subr.bf16.mxu0 %v9036_v42  ;;  %v9127_v42 = vld [vmem:[#allocation2 + $0x1090] ss:$48 sps:$4 sm:$0xff]  }
 0x19c   : > { %2490 = vmatpush1.bf16.msra.mxu0 %v9034_v43  ;;  %v9132_v43 = vld [vmem:[#allocation2 + $0x10f4] ss:$48 sps:$4 sm:$0xff]  }
 0x19d   : > { %2491 = vmatprep.subr.bf16.mxu0 %v9039_v44  ;;  %v9130_v44 = vld [vmem:[#allocation2 + $0x10f0] ss:$48 sps:$4 sm:$0xff]  }
 0x1a0   : > { %2492 = vmatpush1.bf16.msra.mxu0 %v9037_v45  ;;  %v9135_v45 = vld [vmem:[#allocation2 + $0x1154] ss:$48 sps:$4 sm:$0xff]  }
 0x1a1   : > { %2493 = vmatprep.subr.bf16.mxu0 %v9042_v46  ;;  %v9133_v46 = vld [vmem:[#allocation2 + $0x1150] ss:$48 sps:$4 sm:$0xff]  }
 0x1a4   : > { %2494 = vmatpush1.bf16.msra.mxu0 %v9040_v47  ;;  %v9138_v47 = vld [vmem:[#allocation2 + $0x11b4] ss:$48 sps:$4 sm:$0xff]  }
 0x1a5   : > { %2504 = vmatprep.subr.bf16.mxu0 %v9045_v49  ;;  %v9136_v49 = vld [vmem:[#allocation2 + $0x11b0] ss:$48 sps:$4 sm:$0xff]  }
 0x1a7   : > { %2496 = vmatmul.mubr.bf16.vlgmr.msra.gmra.mrb[4].mxu0 %v10232_v3  ;;  %v9063_v3 = vld [vmem:[#allocation2 + $0x854] ss:$48 sps:$4 sm:$0xff]  }
 0x1a8   : > { %2505 = vmatpush1.bf16.msra.mxu0 %v9043_v50  ;;  %2536 = vmatprep.mubr.bf16.mxu0 %v10241_v30  ;;  %v9064_v30 = vld [vmem:[#allocation2 + $0x8b0] ss:$48 sps:$4 sm:$0xff]  }
 0x1a9   : > { %2506 = vmatprep.subr.bf16.mxu0 %v9048_v51 }
 0x1ac   : > { %2507 = vmatpush1.bf16.msra.mxu0 %v9046_v52 }
 0x1ad   : > { %2508 = vmatprep.subr.bf16.mxu0 %v9051_v53 }
 0x1b0   : > { %2509 = vmatpush1.bf16.msra.mxu0 %v9049_v54 }
 0x1b1   : > { %2510 = vmatprep.subr.bf16.mxu0 %v9054_v55 }
 0x1b4   : > { %2511 = vmatpush1.bf16.msra.mxu0 %v9052_v56 }
 0x1b5   : > { %2512 = vmatprep.subr.bf16.mxu0 %v9057_v57 }
 0x1b8   : > { %2513 = vmatpush1.bf16.msra.mxu0 %v9055_v58  ;;  %v11149_v58 = vlaneseq }
 0x1b9   : > { %2514 = vmatprep.subr.bf16.mxu0 %v9060_v59 }
 0x1ba   : > { %v727_v59 = vshrl.u32 %v11149_v58, 7 }
 0x1bc   : > { %2515 = vmatpush1.bf16.msra.mxu0 %v9058_v60  ;;  %v722_v60 = vld [vmem:[#allocation4] ss:$8 sm:$0xf] }
 0x1bd   : > { %2516 = vmatprep.subr.bf16.mxu0 %v9063_v3  ;;  %v723_v3 = vld [vmem:[#allocation4] ss:$8 sm:$0x30] }
 0x1c0   : > { %2517 = vmatpush1.bf16.msra.mxu0 %v9061_v61  ;;  %v724_v61 = vor.u32 %v723_v3, %v722_v60 }
 0x1c1   : > { %2518 = vmatprep.subr.bf16.mxu0 %v9066_v62  ;;  %v10273_v62 = vsub.s32 0, %v727_v59 }
 0x1c3   : > { %11185 = vst [vmem:[#allocation16_spill] sm:$0xff] %v10273_v62 }
 0x1c4   : > { %2519 = vmatpush1.bf16.msra.mxu0 %v9064_v30  ;;  %v10275_v30 = vsub.s32 1, %v727_v59 }
 0x1c5   : > { %2520 = vmatprep.subr.bf16.mxu0 %v9069_v63 }
 0x1c6   : > { %v733_v63 = vrot.slane %v724_v61, %v10275_v30 }
 0x1c8   : > { %2521 = vmatpush1.bf16.msra.mxu0 %v9067_v0  ;;  %v10279_v0 = vsub.s32 2, %v727_v59 }
 0x1c9   : > { %2522 = vmatprep.subr.bf16.mxu0 %v9072_v1 }
 0x1ca   : > { %11186 = vst [vmem:[#allocation17_spill] sm:$0xff] %v10279_v0 }
 0x1cc   : > { %2523 = vmatpush1.bf16.msra.mxu0 %v9070_v2  ;;  %v10283_v2 = vsub.s32 3, %v727_v59 }
 0x1cd   : > { %2524 = vmatprep.subr.bf16.mxu0 %v9075_v4 }
 0x1d0   : > { %2525 = vmatpush1.bf16.msra.mxu0 %v9073_v5  ;;  %v737_v5 = vrot.slane %v724_v61, %v10279_v0 }
 0x1d1   : > { %2526 = vmatprep.subr.bf16.mxu0 %v9078_v6 }
 0x1d4   : > { %2527 = vmatpush1.bf16.msra.mxu0 %v9076_v7  ;;  %v741_v7 = vrot.slane %v724_v61, %v10283_v2 }
 0x1d5   : > { %2528 = vmatprep.subr.bf16.mxu0 %v9081_v9 }
 0x1d8   : > { %2529 = vmatpush1.bf16.msra.mxu0 %v9079_v10 }
 0x1d9   : > { %2530 = vmatprep.subr.bf16.mxu0 %v9084_v12 }
 0x1dc   : > { %2531 = vmatpush1.bf16.msra.mxu0 %v9082_v14 }
 0x1dd   : > { %2532 = vmatprep.subr.bf16.mxu0 %v9087_v15 }
 0x1e0   : > { %2533 = vmatpush1.bf16.msra.mxu0 %v9085_v16 }
 0x1e1   : > { %2534 = vmatprep.subr.bf16.mxu0 %v9090_v18 }
 0x1e4   : > { %2535 = vmatpush1.bf16.msra.mxu0 %v9088_v19 }
 0x1e5   : > { %2545 = vmatprep.subr.bf16.mxu0 %v9093_v20 }
 0x1e7   : > { %2537 = vmatmul.mubr.bf16.vlgmr.msra.gmra.mrb[4].mxu0 %v10247_v8  ;;  %v9109_v8 = vld [vmem:[#allocation2 + $0xe50] ss:$48 sps:$4 sm:$0xff]  }
 0x1e8   : > { %2546 = vmatpush1.bf16.msra.mxu0 %v9091_v21  ;;  %2577 = vmatprep.mubr.bf16.mxu0 %v10254_v13  ;;  %v9112_v13 = vld [vmem:[#allocation2 + $0xeb0] ss:$48 sps:$4 sm:$0xff]  }
 0x1e9   : > { %2547 = vmatprep.subr.bf16.mxu0 %v9096_v22 }
 0x1ec   : > { %2548 = vmatpush1.bf16.msra.mxu0 %v9094_v23 }
 0x1ed   : > { %2549 = vmatprep.subr.bf16.mxu0 %v9099_v11 }
 0x1f0   : > { %2550 = vmatpush1.bf16.msra.mxu0 %v9097_v24 }
 0x1f1   : > { %2551 = vmatprep.subr.bf16.mxu0 %v9102_v25 }
 0x1f4   : > { %2552 = vmatpush1.bf16.msra.mxu0 %v9100_v26 }
 0x1f5   : > { %2553 = vmatprep.subr.bf16.mxu0 %v9105_v27 }
 0x1f8   : > { %2554 = vmatpush1.bf16.msra.mxu0 %v9103_v28 }
 0x1f9   : > { %2555 = vmatprep.subr.bf16.mxu0 %v9108_v48 }
 0x1fc   : > { %2556 = vmatpush1.bf16.msra.mxu0 %v9106_v29 }
 0x1fd   : > { %2557 = vmatprep.subr.bf16.mxu0 %v9111_v31  ;;  %v10309_v31 = vsub.s32 4, %v727_v59 }
 0x1ff   : > { %11187 = vst [vmem:[#allocation18_spill] sm:$0xff] %v10309_v31 }
 0x200   : > { %2558 = vmatpush1.bf16.msra.mxu0 %v9109_v8  ;;  %v10311_v8 = vsub.s32 5, %v727_v59 }
 0x201   : > { %2559 = vmatprep.subr.bf16.mxu0 %v9114_v32 }
 0x202   : > { %11188 = vst [vmem:[#allocation19_spill] sm:$0xff] %v10311_v8 }
 0x204   : > { %2560 = vmatpush1.bf16.msra.mxu0 %v9112_v13  ;;  %v745_v13 = vrot.slane %v724_v61, %v10309_v31 }
 0x205   : > { %2561 = vmatprep.subr.bf16.mxu0 %v9117_v33  ;;  %v749_v33 = vrot.slane %v724_v61, %v10311_v8 }
 0x208   : > { %2562 = vmatpush1.bf16.msra.mxu0 %v9115_v34 }
 0x209   : > { %2563 = vmatprep.subr.bf16.mxu0 %v9120_v35 }
 0x20c   : > { %2564 = vmatpush1.bf16.msra.mxu0 %v9118_v36 }
 0x20d   : > { %2565 = vmatprep.subr.bf16.mxu0 %v9123_v37 }
 0x210   : > { %2566 = vmatpush1.bf16.msra.mxu0 %v9121_v38 }
 0x211   : > { %2567 = vmatprep.subr.bf16.mxu0 %v9126_v39 }
 0x214   : > { %2568 = vmatpush1.bf16.msra.mxu0 %v9124_v40 }
 0x215   : > { %2569 = vmatprep.subr.bf16.mxu0 %v9129_v41 }
 0x218   : > { %2570 = vmatpush1.bf16.msra.mxu0 %v9127_v42 }
 0x219   : > { %2571 = vmatprep.subr.bf16.mxu0 %v9132_v43 }
 0x21c   : > { %2572 = vmatpush1.bf16.msra.mxu0 %v9130_v44 }
 0x21d   : > { %2573 = vmatprep.subr.bf16.mxu0 %v9135_v45 }
 0x220   : > { %2574 = vmatpush1.bf16.msra.mxu0 %v9133_v46 }
 0x221   : > { %2575 = vmatprep.subr.bf16.mxu0 %v9138_v47 }
 0x224   : > { %2576 = vmatpush1.bf16.msra.mxu0 %v9136_v49 }
 0x227   : > { %2578 = vmatmul.mubr.bf16.vlgmr.msra.gmra.mrb[4].mxu0 %v10262_v17  ;;  %v729_v17 = vrot.slane %v724_v61, %v10273_v62  ;;  %v9773_v61 = vld [vmem:[%s10225_s15] sm:$0xff] }
 0x23a   : > { %v2333_v50 = vpop.f32.mrb[0].mxu0 }
 0x23b   : > { %v2335_v51 = vpop.f32.mrb[1].mxu0  ;;  %v10281_v1 = vadd.f32 %v2333_v50, %v729_v17  ;;  %v2640_v17 = vunpack.c.l.bf16 %v9773_v61 }
 0x23c   : > { %v2337_v52 = vpop.f32.mrb[2].mxu0  ;;  %v2456_v53 = vpop.f32.mrb[0].mxu1  ;;  %v10285_v4 = vadd.f32 %v2335_v51, %v733_v63  ;;  %v2641_v63 = vunpack.c.h.bf16 %v9773_v61  ;;  %v9172_v61 = vld [vmem:[#allocation2 + $0x200] ss:$48 sps:$4 sm:$0xff]  }
 0x23d   : > { %v2338_v54 = vpop.f32.mrb[3].mxu0  ;;  %v2458_v55 = vpop.f32.mrb[1].mxu1  ;;  %v2586_v6 = vmul.f32 %v10281_v1, %v10281_v1  ;;  %v10293_v10 = vadd.f32 %v2456_v53, %v737_v5 }
 0x23e   : > { %v2460_v56 = vpop.f32.mrb[2].mxu1  ;;  %v2587_v9 = vmul.f32 %v10285_v4, %v10285_v4  ;;  %v10296_v14 = vadd.f32 %v2458_v55, %v741_v7 }
 0x23f   : > { %v2461_v57 = vpop.f32.mrb[3].mxu1  ;;  %v2592_v12 = vmul.f32 %v10281_v1, %v2586_v6  ;;  %v2588_v16 = vmul.f32 %v10293_v10, %v10293_v10 }
 0x240   : > { %v2593_v15 = vmul.f32 %v10285_v4, %v2587_v9  ;;  %v2589_v19 = vmul.f32 %v10296_v14, %v10296_v14  ;;  %v9774_v9 = vld [vmem:[%s10225_s15 + $0x8] sm:$0xff] }
 0x241   : > { %v2598_v18 = vmul.f32 0.044715, %v2592_v12  ;;  %v2594_v21 = vmul.f32 %v10293_v10, %v2588_v16  ;;  %v2642_v12 = vunpack.c.l.bf16 %v9774_v9 }
 0x242   : > { %v2599_v20 = vmul.f32 0.044715, %v2593_v15  ;;  %v2595_v23 = vmul.f32 %v10296_v14, %v2589_v19 }
 0x243   : > { %v2604_v22 = vadd.f32 %v10281_v1, %v2598_v18  ;;  %v2600_v24 = vmul.f32 0.044715, %v2594_v21  ;;  %v2643_v21 = vunpack.c.h.bf16 %v9774_v9  ;;  %v9186_v9 = vld [vmem:[#allocation2 + $0x2c4] ss:$48 sps:$4 sm:$0xff]  }
 0x244   : > { %v2605_v11 = vadd.f32 %v10285_v4, %v2599_v20  ;;  %v2601_v26 = vmul.f32 0.044715, %v2595_v23 }
 0x245   : > { %v2610_v25 = vmul.f32 0.7978846, %v2604_v22  ;;  %v2606_v28 = vadd.f32 %v10293_v10, %v2600_v24 }
 0x246   : > { %v2611_v27 = vmul.f32 0.7978846, %v2605_v11  ;;  %v2607_v48 = vadd.f32 %v10296_v14, %v2601_v26  ;;  %v9775_v26 = vld [vmem:[%s10225_s15 + $0x10] sm:$0xff] }
 0x247   : > { %9731 = vtanh.f32 %v2610_v25  ;;  %v2612_v29 = vmul.f32 0.7978846, %v2606_v28 }
 0x248   : > { %9733 = vtanh.f32 %v2611_v27  ;;  %v2613_v32 = vmul.f32 0.7978846, %v2607_v48 }
 0x249   : > { %9735 = vtanh.f32 %v2612_v29  ;;  %v2645_v29 = vunpack.c.h.bf16 %v9775_v26 }
 0x24a   : > { %9737 = vtanh.f32 %v2613_v32 }
 0x251   : > { %v9732_v37 = vpop.eup %9731 }
 0x252   : > { %v9734_v40 = vpop.eup %9733  ;;  %v2622_v45 = vadd.f32 1.0, %v9732_v37 }
 0x253   : > { %v2623_v46 = vadd.f32 1.0, %v9734_v40  ;;  %v9736_v49 = vpop.eup %9735  ;;  %v9141_v40 = vld [vmem:[#allocation2 + $0x1c] ss:$48 sps:$4 sm:$0xff]  }
 0x254   : > { %v9738_v53 = vpop.eup %9737  ;;  %v2628_v54 = vmul.f32 0.5, %v2622_v45  ;;  %v2624_v56 = vadd.f32 1.0, %v9736_v49  ;;  %4540 = vmatprep.subr.bf16.mxu1 %v9141_v40  ;;  %v9153_v45 = vld [vmem:[#allocation2 + $0xdc] ss:$48 sps:$4 sm:$0xff]   ;;  %v9154_v49 = vld [vmem:[#allocation2 + $0xe0] ss:$48 sps:$4 sm:$0xff]  }
 0x255   : > { %v2629_v55 = vmul.f32 0.5, %v2623_v46  ;;  %v2625_v3 = vadd.f32 1.0, %v9738_v53  ;;  %v9156_v46 = vld [vmem:[#allocation2 + $0xe4] ss:$48 sps:$4 sm:$0xff]   ;;  %v9160_v53 = vld [vmem:[#allocation2 + $0x140] ss:$48 sps:$4 sm:$0xff]  }
 0x256   : > { %v2634_v5 = vmul.f32 %v10281_v1, %v2628_v54  ;;  %v2630_v7 = vmul.f32 0.5, %v2624_v56  ;;  %v9165_v54 = vld [vmem:[#allocation2 + $0x19c] ss:$48 sps:$4 sm:$0xff]   ;;  %v9163_v56 = vld [vmem:[#allocation2 + $0x198] ss:$48 sps:$4 sm:$0xff]  }
 0x257   : > { %v2635_v6 = vmul.f32 %v10285_v4, %v2629_v55  ;;  %v2631_v16 = vmul.f32 0.5, %v2625_v3  ;;  %v9168_v55 = vld [vmem:[#allocation2 + $0x1a4] ss:$48 sps:$4 sm:$0xff]   ;;  %v9169_v3 = vld [vmem:[#allocation2 + $0x1f8] ss:$48 sps:$4 sm:$0xff]  }
 0x258   : > { %v2636_v15 = vmul.f32 %v10293_v10, %v2630_v7  ;;  %v10320_v18 = vadd.f32 %v2640_v17, %v2634_v5  ;;  %v2644_v10 = vunpack.c.l.bf16 %v9775_v26  ;;  %v9177_v17 = vld [vmem:[#allocation2 + $0x25c] ss:$48 sps:$4 sm:$0xff]   ;;  %v9175_v5 = vld [vmem:[#allocation2 + $0x258] ss:$48 sps:$4 sm:$0xff]   ;;  %v9204_v26 = vld [vmem:[#allocation2 + $0x3e4] ss:$48 sps:$4 sm:$0xff]  }
 0x259   : > { %v10322_v19 = vadd.f32 %v2641_v63, %v2635_v6  ;;  %v2637_v20 = vmul.f32 %v10296_v14, %v2631_v16  ;;  %v9180_v63 = vld [vmem:[#allocation2 + $0x264] ss:$48 sps:$4 sm:$0xff]   ;;  %v9178_v6 = vld [vmem:[#allocation2 + $0x260] ss:$48 sps:$4 sm:$0xff]   ;;  %v9183_v7 = vld [vmem:[#allocation2 + $0x2bc] ss:$48 sps:$4 sm:$0xff]  }
 0x25a   : > { %v10325_v22 = vadd.f32 %v2642_v12, %v2636_v15  ;;  %v9181_v12 = vld [vmem:[#allocation2 + $0x2b8] ss:$48 sps:$4 sm:$0xff]   ;;  %v9184_v15 = vld [vmem:[#allocation2 + $0x2c0] ss:$48 sps:$4 sm:$0xff]   ;;  %v9189_v16 = vld [vmem:[#allocation2 + $0x31c] ss:$48 sps:$4 sm:$0xff]  }
 0x25b   : > { %v2660_v1 = vadd.f32 %v10322_v19, %v10320_v18  ;;  %v10330_v27 = vadd.f32 %v2643_v21, %v2637_v20  ;;  %v9192_v20 = vld [vmem:[#allocation2 + $0x324] ss:$48 sps:$4 sm:$0xff]   ;;  %v9187_v21 = vld [vmem:[#allocation2 + $0x318] ss:$48 sps:$4 sm:$0xff]  }
 0x25d   : > { %v2661_v28 = vadd.f32 %v2660_v1, %v10325_v22  ;;  %v9190_v1 = vld [vmem:[#allocation2 + $0x320] ss:$48 sps:$4 sm:$0xff]  }
 0x2fa   : > { %v2579_v34 = vpop.f32.mrb[4].mxu0 }
 0x2fb   : > { %v8561_v35 = vadd.f32 %v2579_v34, %v745_v13  ;;  %v2581_v36 = vpop.f32.mrb[5].mxu0 }
 0x2fc   : > { %v8562_v38 = vadd.f32 %v2581_v36, %v749_v33  ;;  %v2583_v39 = vpop.f32.mrb[6].mxu0  ;;  %v2662_v33 = vadd.f32 %v2661_v28, %v10330_v27  ;;  %v9202_v28 = vld [vmem:[#allocation2 + $0x3e0] ss:$48 sps:$4 sm:$0xff]  }
 0x2fd   : > { %v2590_v41 = vmul.f32 %v8561_v35, %v8561_v35  ;;  %v2584_v42 = vpop.f32.mrb[7].mxu0  ;;  %v9139_v39 = vld [vmem:[#allocation2 + $0x18] ss:$48 sps:$4 sm:$0xff]  }
 0x2fe   : > { %v2591_v43 = vmul.f32 %v8562_v38, %v8562_v38  ;;  %v9144_v42 = vld [vmem:[#allocation2 + $0x24] ss:$48 sps:$4 sm:$0xff]   ;;  %4541 = vmatpush1.bf16.msra.mxu1 %v9139_v39 }
 0x2ff   : > { %v2596_v44 = vmul.f32 %v8561_v35, %v2590_v41  ;;  %v9142_v41 = vld [vmem:[#allocation2 + $0x20] ss:$48 sps:$4 sm:$0xff]   ;;  %4663 = vmatprep.subr.bf16.mxu0 %v9144_v42 }
 0x300   : > { %v2597_v47 = vmul.f32 %v8562_v38, %v2591_v43  ;;  %v9147_v43 = vld [vmem:[#allocation2 + $0x7c] ss:$48 sps:$4 sm:$0xff]   ;;  %4664 = vmatpush1.bf16.msra.mxu0 %v9142_v41 }
 0x301   : > { %v2602_v50 = vmul.f32 0.044715, %v2596_v44  ;;  %v9150_v44 = vld [vmem:[#allocation2 + $0x84] ss:$48 sps:$4 sm:$0xff]   ;;  %4542 = vmatprep.subr.bf16.mxu1 %v9147_v43 }
 0x302   : > { %v2603_v51 = vmul.f32 0.044715, %v2597_v47  ;;  %4665 = vmatprep.subr.bf16.mxu0 %v9150_v44  ;;  %v9151_v47 = vld [vmem:[#allocation2 + $0xd8] ss:$48 sps:$4 sm:$0xff]  }
 0x303   : > { %v2608_v52 = vadd.f32 %v8561_v35, %v2602_v50  ;;  %v9159_v50 = vld [vmem:[#allocation2 + $0x13c] ss:$48 sps:$4 sm:$0xff]  }
 0x304   : > { %v2609_v57 = vadd.f32 %v8562_v38, %v2603_v51  ;;  %v9162_v51 = vld [vmem:[#allocation2 + $0x144] ss:$48 sps:$4 sm:$0xff]  }
 0x305   : > { %v2614_v59 = vmul.f32 0.7978846, %v2608_v52  ;;  %v9157_v52 = vld [vmem:[#allocation2 + $0x138] ss:$48 sps:$4 sm:$0xff]  }
 0x306   : > { %v2615_v60 = vmul.f32 0.7978846, %v2609_v57  ;;  %v9166_v57 = vld [vmem:[#allocation2 + $0x1a0] ss:$48 sps:$4 sm:$0xff]  }
 0x307   : > { %9739 = vtanh.f32 %v2614_v59  ;;  %v9171_v59 = vld [vmem:[#allocation2 + $0x1fc] ss:$48 sps:$4 sm:$0xff]  }
 0x308   : > { %9741 = vtanh.f32 %v2615_v60  ;;  %v9174_v60 = vld [vmem:[#allocation2 + $0x204] ss:$48 sps:$4 sm:$0xff]  }
 0x311   : > { %v9740_v4 = vpop.eup %9739 }
 0x312   : > { %v9742_v23 = vpop.eup %9741  ;;  %v2626_v11 = vadd.f32 1.0, %v9740_v4  ;;  %v9195_v4 = vld [vmem:[#allocation2 + $0x37c] ss:$48 sps:$4 sm:$0xff]  }
 0x313   : > { %v2627_v24 = vadd.f32 1.0, %v9742_v23  ;;  %v9198_v23 = vld [vmem:[#allocation2 + $0x384] ss:$48 sps:$4 sm:$0xff]  }
 0x314   : > { %v2632_v25 = vmul.f32 0.5, %v2626_v11  ;;  %v9193_v11 = vld [vmem:[#allocation2 + $0x378] ss:$48 sps:$4 sm:$0xff]  }
 0x315   : > { %v2633_v48 = vmul.f32 0.5, %v2627_v24  ;;  %v9196_v24 = vld [vmem:[#allocation2 + $0x380] ss:$48 sps:$4 sm:$0xff]  }
 0x316   : > { %v2638_v14 = vmul.f32 %v8561_v35, %v2632_v25  ;;  %v9145_v35 = vld [vmem:[#allocation2 + $0x78] ss:$48 sps:$4 sm:$0xff]   ;;  %v9201_v25 = vld [vmem:[#allocation2 + $0x3dc] ss:$48 sps:$4 sm:$0xff]  }
 0x317   : > { %v2639_v32 = vmul.f32 %v8562_v38, %v2633_v48  ;;  %v9148_v38 = vld [vmem:[#allocation2 + $0x80] ss:$48 sps:$4 sm:$0xff]   ;;  %4543 = vmatpush1.bf16.msra.mxu1 %v9145_v35 }
 0x318   : > { %v10333_v13 = vadd.f32 %v2644_v10, %v2638_v14  ;;  %4666 = vmatpush1.bf16.msra.mxu0 %v9148_v38  ;;  %4544 = vmatprep.subr.bf16.mxu1 %v9153_v45  ;;  %v9199_v10 = vld [vmem:[#allocation2 + $0x3d8] ss:$48 sps:$4 sm:$0xff]   ;;  %v9207_v38 = vld [vmem:[#allocation2 + $0x43c] ss:$48 sps:$4 sm:$0xff]   ;;  %v9210_v45 = vld [vmem:[#allocation2 + $0x444] ss:$48 sps:$4 sm:$0xff]  }
 0x319   : > { %v10336_v34 = vadd.f32 %v2645_v29, %v2639_v32  ;;  %4667 = vmatprep.subr.bf16.mxu0 %v9156_v46  ;;  %v9205_v46 = vld [vmem:[#allocation2 + $0x438] ss:$48 sps:$4 sm:$0xff]  }
 0x31a   : > { %v2663_v36 = vadd.f32 %v2662_v33, %v10333_v13 }
 0x31b   : > { %4545 = vmatpush1.bf16.msra.mxu1 %v9151_v47  ;;  %v9208_v47 = vld [vmem:[#allocation2 + $0x440] ss:$48 sps:$4 sm:$0xff]  }
 0x31c   : > { %v2664_v37 = vadd.f32 %v2663_v36, %v10336_v34  ;;  %4668 = vmatpush1.bf16.msra.mxu0 %v9154_v49  ;;  %4546 = vmatprep.subr.bf16.mxu1 %v9159_v50  ;;  %v9211_v49 = vld [vmem:[#allocation2 + $0x498] ss:$48 sps:$4 sm:$0xff]   ;;  %v9214_v50 = vld [vmem:[#allocation2 + $0x4a0] ss:$48 sps:$4 sm:$0xff]  }
 0x31d   : > { %4669 = vmatprep.subr.bf16.mxu0 %v9162_v51  ;;  %v9216_v51 = vld [vmem:[#allocation2 + $0x4a4] ss:$48 sps:$4 sm:$0xff]  }
 0x31e   : > { %2665 = vadd.xlane.f32.xlu0 %v2664_v37 }
 0x31f   : > { %4547 = vmatpush1.bf16.msra.mxu1 %v9157_v52  ;;  %v9219_v52 = vld [vmem:[#allocation2 + $0x4fc] ss:$48 sps:$4 sm:$0xff]  }
 0x320   : > { %4670 = vmatpush1.bf16.msra.mxu0 %v9160_v53  ;;  %4548 = vmatprep.subr.bf16.mxu1 %v9165_v54  ;;  %v9222_v53 = vld [vmem:[#allocation2 + $0x504] ss:$48 sps:$4 sm:$0xff]   ;;  %v9217_v54 = vld [vmem:[#allocation2 + $0x4f8] ss:$48 sps:$4 sm:$0xff]  }
 0x321   : > { %4671 = vmatprep.subr.bf16.mxu0 %v9168_v55  ;;  %v9220_v55 = vld [vmem:[#allocation2 + $0x500] ss:$48 sps:$4 sm:$0xff]  }
 0x323   : > { %4549 = vmatpush1.bf16.msra.mxu1 %v9163_v56  ;;  %v9225_v56 = vld [vmem:[#allocation2 + $0x55c] ss:$48 sps:$4 sm:$0xff]  }
 0x324   : > { %4672 = vmatpush1.bf16.msra.mxu0 %v9166_v57  ;;  %4550 = vmatprep.subr.bf16.mxu1 %v9171_v59  ;;  %v9228_v57 = vld [vmem:[#allocation2 + $0x564] ss:$48 sps:$4 sm:$0xff]   ;;  %v9223_v59 = vld [vmem:[#allocation2 + $0x558] ss:$48 sps:$4 sm:$0xff]  }
 0x325   : > { %4673 = vmatprep.subr.bf16.mxu0 %v9174_v60  ;;  %v9226_v60 = vld [vmem:[#allocation2 + $0x560] ss:$48 sps:$4 sm:$0xff]  }
 0x327   : > { %4551 = vmatpush1.bf16.msra.mxu1 %v9169_v3  ;;  %v9231_v3 = vld [vmem:[#allocation2 + $0x5bc] ss:$48 sps:$4 sm:$0xff]  }
 0x328   : > { %4674 = vmatpush1.bf16.msra.mxu0 %v9172_v61  ;;  %4552 = vmatprep.subr.bf16.mxu1 %v9177_v17  ;;  %v9234_v61 = vld [vmem:[#allocation2 + $0x5c4] ss:$48 sps:$4 sm:$0xff]   ;;  %v9229_v17 = vld [vmem:[#allocation2 + $0x5b8] ss:$48 sps:$4 sm:$0xff]  }
 0x329   : > { %4675 = vmatprep.subr.bf16.mxu0 %v9180_v63  ;;  %v9232_v63 = vld [vmem:[#allocation2 + $0x5c0] ss:$48 sps:$4 sm:$0xff]  }
 0x32b   : > { %4553 = vmatpush1.bf16.msra.mxu1 %v9175_v5  ;;  %v9237_v5 = vld [vmem:[#allocation2 + $0x61c] ss:$48 sps:$4 sm:$0xff]  }
 0x32c   : > { %4676 = vmatpush1.bf16.msra.mxu0 %v9178_v6  ;;  %4554 = vmatprep.subr.bf16.mxu1 %v9183_v7  ;;  %v9240_v6 = vld [vmem:[#allocation2 + $0x624] ss:$48 sps:$4 sm:$0xff]   ;;  %v9978_v7 = vmov 0  }
 0x32d   : > { %4677 = vmatprep.subr.bf16.mxu0 %v9186_v9  ;;  %8695 = vset.pattern.permute.xlu0 %v9978_v7  ;;  %v5013_v9 = vld [vmem:[%s426_s21] sm:$0xff]  ;;  %s429_s21 = scalar_lea.vmem %s11144_s9, %s11235_s12 }
 0x32e   : > { %8696 = vset.pattern.permute.xlu1 %v9978_v7 }
 0x32f   : > { %4555 = vmatpush1.bf16.msra.mxu1 %v9181_v12 }
 0x330   : > { %4678 = vmatpush1.bf16.msra.mxu0 %v9184_v15  ;;  %4556 = vmatprep.subr.bf16.mxu1 %v9189_v16 }
 0x331   : > { %4679 = vmatprep.subr.bf16.mxu0 %v9192_v20  ;;  %v2653_v20 = vld [vmem:[#allocation4 + $0x1] ss:$8 sm:$0xf] }
 0x333   : > { %4557 = vmatpush1.bf16.msra.mxu1 %v9187_v21  ;;  %v2654_v21 = vld [vmem:[#allocation4 + $0x1] ss:$8 sm:$0x30] }
 0x334   : > { %4680 = vmatpush1.bf16.msra.mxu0 %v9190_v1  ;;  %4558 = vmatprep.subr.bf16.mxu1 %v9195_v4  ;;  %v2657_v1 = vld [vmem:[#allocation4 + $0x2] ss:$8 sm:$0xf] }
 0x335   : > { %4681 = vmatprep.subr.bf16.mxu0 %v9198_v23  ;;  %v2658_v4 = vld [vmem:[#allocation4 + $0x2] ss:$8 sm:$0x30]  ;;  %v2655_v23 = vor.u32 %v2654_v21, %v2653_v20  ;;  %v9243_v21 = vld [vmem:[#allocation2 + $0x67c] ss:$48 sps:$4 sm:$0xff]  }
 0x337   : > { %4559 = vmatpush1.bf16.msra.mxu1 %v9193_v11  ;;  %v10376_v11 = vor.u32 %v2658_v4, %v2657_v1  ;;  %v9246_v1 = vld [vmem:[#allocation2 + $0x684] ss:$48 sps:$4 sm:$0xff]  }
 0x338   : > { %4682 = vmatpush1.bf16.msra.mxu0 %v9196_v24  ;;  %4560 = vmatprep.subr.bf16.mxu1 %v9201_v25  ;;  %v4916_v24 = vld [vmem:[#allocation4 + $0x4] ss:$8 sm:$0xf] }
 0x339   : > { %4683 = vmatprep.subr.bf16.mxu0 %v9204_v26  ;;  %v4917_v25 = vld [vmem:[#allocation4 + $0x4] ss:$8 sm:$0x30]  ;;  %v4964_v26 = vld [vmem:[#allocation4 + $0x5] ss:$8 sm:$0xf] }
 0x33b   : > { %4561 = vmatpush1.bf16.msra.mxu1 %v9199_v10  ;;  %v4965_v10 = vld [vmem:[#allocation4 + $0x5] ss:$8 sm:$0x30] }
 0x33c   : > { %4684 = vmatpush1.bf16.msra.mxu0 %v9202_v28  ;;  %4562 = vmatprep.subr.bf16.mxu1 %v9207_v38  ;;  %v2705_v28 = vrot.slane %v2655_v23, %v10275_v30 }
 0x33d   : > { %4685 = vmatprep.subr.bf16.mxu0 %v9210_v45 }
 0x33f   : > { %4563 = vmatpush1.bf16.msra.mxu1 %v9205_v46 }
 0x340   : > { %4686 = vmatpush1.bf16.msra.mxu0 %v9208_v47 }
 0x341   : > { %4687 = vmatprep.subr.bf16.mxu0 %v9216_v51 }
 0x344   : > { %4688 = vmatpush1.bf16.msra.mxu0 %v9214_v50 }
 0x345   : > { %4689 = vmatprep.subr.bf16.mxu0 %v9222_v53 }
 0x348   : > { %4690 = vmatpush1.bf16.msra.mxu0 %v9220_v55 }
 0x349   : > { %4691 = vmatprep.subr.bf16.mxu0 %v9228_v57 }
 0x34c   : > { %4692 = vmatpush1.bf16.msra.mxu0 %v9226_v60 }
 0x34d   : > { %4693 = vmatprep.subr.bf16.mxu0 %v9234_v61 }
 0x350   : > { %4694 = vmatpush1.bf16.msra.mxu0 %v9232_v63  ;;  %v9238_v63 = vld [vmem:[#allocation2 + $0x620] ss:$48 sps:$4 sm:$0xff]  }
 0x351   : > { %4704 = vmatprep.subr.bf16.mxu0 %v9240_v6 }
 0x3ab   : > { %v2666_v48 = vpop.xlane.xlu0 %2665 }
 0x3ac   : > { %v2668_v29 = vmul.f32 0.0013020834, %v2666_v48  ;;  %v2701_v48 = vrot.slane %v2655_v23, %v10273_v62 }
 0x3ae   : > { %v10341_v14 = vsub.f32 %v10320_v18, %v2668_v29  ;;  %v10344_v32 = vsub.f32 %v10322_v19, %v2668_v29  ;;  %v10347_v33 = vsub.f32 %v10325_v22, %v2668_v29  ;;  %v10350_v36 = vsub.f32 %v10330_v27, %v2668_v29 }
 0x3af   : > { %v10357_v40 = vsub.f32 %v10333_v13, %v2668_v29  ;;  %v10362_v41 = vsub.f32 %v10336_v34, %v2668_v29  ;;  %v9213_v34 = vld [vmem:[#allocation2 + $0x49c] ss:$48 sps:$4 sm:$0xff]   ;;  %v2713_v29 = vrot.slane %v2655_v23, %v10283_v2 }
 0x3b0   : > { %v2675_v37 = vmul.f32 %v10341_v14, %v10341_v14  ;;  %v2676_v39 = vmul.f32 %v10344_v32, %v10344_v32  ;;  %v2677_v18 = vmul.f32 %v10347_v33, %v10347_v33  ;;  %v2678_v22 = vmul.f32 %v10350_v36, %v10350_v36  ;;  %4564 = vmatprep.subr.bf16.mxu1 %v9213_v34 }
 0x3b1   : > { %v2679_v42 = vmul.f32 %v10357_v40, %v10357_v40  ;;  %v2680_v44 = vmul.f32 %v10362_v41, %v10362_v41  ;;  %4565 = vmatpush1.bf16.msra.mxu1 %v9211_v49  ;;  %v2754_v34 = vrot.slane %v10376_v11, %v10309_v31  ;;  %v2758_v49 = vrot.slane %v10376_v11, %v10311_v8 }
 0x3b2   : > { %v2681_v19 = vadd.f32 %v2676_v39, %v2675_v37  ;;  %4566 = vmatprep.subr.bf16.mxu1 %v9219_v52  ;;  %v10381_v37 = vor.u32 %v4917_v25, %v4916_v24  ;;  %v2742_v39 = vrot.slane %v10376_v11, %v10275_v30 }
 0x3b4   : > { %v2682_v27 = vadd.f32 %v2681_v19, %v2677_v18  ;;  %v2709_v18 = vrot.slane %v2655_v23, %v10279_v0  ;;  %v2717_v19 = vrot.slane %v2655_v23, %v10309_v31  ;;  %v4923_v50 = vrot.slane %v10381_v37, %v10273_v62 }
 0x3b5   : > { %4567 = vmatpush1.bf16.msra.mxu1 %v9217_v54  ;;  %v4935_v60 = vrot.slane %v10381_v37, %v10283_v2 }
 0x3b6   : > { %v2683_v43 = vadd.f32 %v2682_v27, %v2678_v22  ;;  %4568 = vmatprep.subr.bf16.mxu1 %v9225_v56  ;;  %v2721_v22 = vrot.slane %v2655_v23, %v10311_v8 }
 0x3b8   : > { %v2684_v13 = vadd.f32 %v2683_v43, %v2679_v42  ;;  %v2738_v42 = vrot.slane %v10376_v11, %v10273_v62  ;;  %v2750_v43 = vrot.slane %v10376_v11, %v10283_v2 }
 0x3b9   : > { %4569 = vmatpush1.bf16.msra.mxu1 %v9223_v59 }
 0x3ba   : > { %v2685_v35 = vadd.f32 %v2684_v13, %v2680_v44  ;;  %4570 = vmatprep.subr.bf16.mxu1 %v9231_v3  ;;  %v2746_v44 = vrot.slane %v10376_v11, %v10279_v0  ;;  %v10394_v13 = vor.u32 %v4965_v10, %v4964_v26  ;;  %v4939_v3 = vrot.slane %v10381_v37, %v10309_v31  ;;  %v9241_v10 = vld [vmem:[#allocation2 + $0x678] ss:$48 sps:$4 sm:$0xff]  }
 0x3bc   : > { %2686 = vadd.xlane.f32.xlu0 %v2685_v35  ;;  %v4975_v57 = vrot.slane %v10394_v13, %v10275_v30  ;;  %v4983_v20 = vrot.slane %v10394_v13, %v10283_v2 }
 0x3bd   : > { %4571 = vmatpush1.bf16.msra.mxu1 %v9229_v17  ;;  %v9235_v17 = vld [vmem:[#allocation2 + $0x618] ss:$48 sps:$4 sm:$0xff]  }
 0x3be   : > { %4581 = vmatprep.subr.bf16.mxu1 %v9237_v5 }
 0x3d2   : > { %5016 = vperm.xlu0 %8695, %v5013_v9   ;;  %v4979_v9 = vrot.slane %v10394_v13, %v10279_v0 }
 0x449   : > { %v2687_v12 = vpop.xlane.xlu0 %2686 }
 0x44a   : > { %v2688_v15 = vmul.f32 0.0013020834, %v2687_v12 }
 0x44c   : > { %v2689_v16 = vadd.f32 1e-05, %v2688_v15  ;;  %v4943_v15 = vrot.slane %v10381_v37, %v10311_v8 }
 0x44e   : > { %9743 = vrsqrt.f32 %v2689_v16 }
 0x458   : > { %v9744_v27 = vpop.eup %9743 }
 0x459   : > { %v2692_v35 = vmul.f32 %v9744_v27, %v10344_v32  ;;  %v2691_v38 = vmul.f32 %v9744_v27, %v10341_v14  ;;  %v2694_v45 = vmul.f32 %v9744_v27, %v10350_v36  ;;  %v2693_v46 = vmul.f32 %v9744_v27, %v10347_v33 }
 0x45a   : > { %v2695_v47 = vmul.f32 %v9744_v27, %v10357_v40  ;;  %v2696_v14 = vmul.f32 %v9744_v27, %v10362_v41  ;;  %v4927_v33 = vrot.slane %v10381_v37, %v10275_v30  ;;  %v4931_v36 = vrot.slane %v10381_v37, %v10279_v0 }
 0x45b   : > { %v2729_v51 = vmul.f32 %v2705_v28, %v2692_v35  ;;  %v2728_v52 = vmul.f32 %v2701_v48, %v2691_v38  ;;  %v2731_v32 = vmul.f32 %v2713_v29, %v2694_v45  ;;  %v2730_v53 = vmul.f32 %v2709_v18, %v2693_v46  ;;  %v9244_v28 = vld [vmem:[#allocation2 + $0x680] ss:$48 sps:$4 sm:$0xff]   ;;  %v9252_v18 = vld [vmem:[#allocation2 + $0x6e4] ss:$48 sps:$4 sm:$0xff]   ;;  %v9247_v38 = vld [vmem:[#allocation2 + $0x6d8] ss:$48 sps:$4 sm:$0xff]  }
 0x45c   : > { %v4971_v40 = vrot.slane %v10394_v13, %v10273_v62  ;;  %v2732_v56 = vmul.f32 %v2717_v19, %v2695_v47  ;;  %v2733_v12 = vmul.f32 %v2721_v22, %v2696_v14  ;;  %v4987_v48 = vrot.slane %v10394_v13, %v10309_v31  ;;  %v9250_v45 = vld [vmem:[#allocation2 + $0x6e0] ss:$48 sps:$4 sm:$0xff]   ;;  %v9253_v14 = vld [vmem:[#allocation2 + $0x738] ss:$48 sps:$4 sm:$0xff]  }
 0x45d   : > { %v10414_v54 = vadd.f32 %v2742_v39, %v2729_v51  ;;  %v10416_v55 = vadd.f32 %v2738_v42, %v2728_v52  ;;  %v10420_v59 = vadd.f32 %v2750_v43, %v2731_v32  ;;  %v10422_v41 = vadd.f32 %v2746_v44, %v2730_v53  ;;  %v9249_v39 = vld [vmem:[#allocation2 + $0x6dc] ss:$48 sps:$4 sm:$0xff]   ;;  %v9258_v52 = vld [vmem:[#allocation2 + $0x744] ss:$48 sps:$4 sm:$0xff]  }
 0x45e   : > { %v10446_v4 = vadd.f32 %v2754_v34, %v2732_v56  ;;  %v10462_v19 = vadd.f32 %v2758_v49, %v2733_v12  ;;  %v4991_v46 = vrot.slane %v10394_v13, %v10311_v8  ;;  %v9276_v12 = vld [vmem:[#allocation2 + $0x864] ss:$48 sps:$4 sm:$0xff]  }
 0x45f   : > { %v10430_v61 = vpack.c.bf16 %v10414_v54, %v10414_v54  ;;  %v10434_v5 = vpack.c.bf16 %v10416_v55, %v10416_v55  ;;  %v4950_v6 = vmul.f32 %v4923_v50, %v10416_v55  ;;  %v4951_v16 = vmul.f32 %v4927_v33, %v10414_v54  ;;  %v9255_v50 = vld [vmem:[#allocation2 + $0x73c] ss:$48 sps:$4 sm:$0xff]   ;;  %v9256_v33 = vld [vmem:[#allocation2 + $0x740] ss:$48 sps:$4 sm:$0xff]  }
 0x460   : > { %v4998_v23 = vmul.f32 %v4971_v40, %v10416_v55  ;;  %v4999_v11 = vmul.f32 %v4975_v57, %v10414_v54  ;;  %v10454_v24 = vpack.c.bf16 %v10420_v59, %v10420_v59  ;;  %v4952_v25 = vmul.f32 %v4931_v36, %v10422_v41  ;;  %v9261_v36 = vld [vmem:[#allocation2 + $0x79c] ss:$48 sps:$4 sm:$0xff]   ;;  %v9264_v40 = vld [vmem:[#allocation2 + $0x7a4] ss:$48 sps:$4 sm:$0xff]   ;;  %v9259_v57 = vld [vmem:[#allocation2 + $0x798] ss:$48 sps:$4 sm:$0xff]  }
 0x461   : > { %4572 = vmatprep.mubr.bf16.mxu1 %v10430_v61  ;;  %4695 = vmatprep.mubr.bf16.mxu0 %v10430_v61  ;;  %v4956_v26 = vadd.f32 %v4951_v16, %v4950_v6  ;;  %v5000_v29 = vmul.f32 %v4979_v9, %v10422_v41  ;;  %v4953_v22 = vmul.f32 %v4935_v60, %v10420_v59  ;;  %v9262_v60 = vld [vmem:[#allocation2 + $0x7a0] ss:$48 sps:$4 sm:$0xff]   ;;  %v9273_v9 = vld [vmem:[#allocation2 + $0x85c] ss:$48 sps:$4 sm:$0xff]  }
 0x462   : > { %4573 = vmatmul.mubr.bf16.vlgmr.msra.gmra.mrb[4].mxu1 %v10434_v5  ;;  %4696 = vmatmul.mubr.bf16.vlgmr.msra.gmra.mrb[8].mxu0 %v10434_v5  ;;  %v5004_v37 = vadd.f32 %v4999_v11, %v4998_v23  ;;  %v5001_v42 = vmul.f32 %v4983_v20, %v10420_v59  ;;  %v4954_v44 = vmul.f32 %v4939_v3, %v10446_v4  ;;  %v9267_v3 = vld [vmem:[#allocation2 + $0x7fc] ss:$48 sps:$4 sm:$0xff]   ;;  %v9268_v6 = vld [vmem:[#allocation2 + $0x800] ss:$48 sps:$4 sm:$0xff]  }
 0x463   : > { %4582 = vmatpush1.bf16.msra.mxu1 %v9235_v17  ;;  %4705 = vmatpush1.bf16.msra.mxu0 %v9238_v63  ;;  %v4957_v27 = vadd.f32 %v4956_v26, %v4952_v25  ;;  %v4955_v34 = vmul.f32 %v4943_v15, %v10462_v19  ;;  %v5002_v51 = vmul.f32 %v4987_v48, %v10446_v4  ;;  %v9270_v17 = vld [vmem:[#allocation2 + $0x804] ss:$48 sps:$4 sm:$0xff]   ;;  %v9265_v63 = vld [vmem:[#allocation2 + $0x7f8] ss:$48 sps:$4 sm:$0xff]   ;;  %v9274_v16 = vld [vmem:[#allocation2 + $0x860] ss:$48 sps:$4 sm:$0xff]  }
 0x464   : > { %4613 = vmatprep.mubr.bf16.mxu1 %v10454_v24  ;;  %4736 = vmatprep.mubr.bf16.mxu0 %v10454_v24  ;;  %v5005_v43 = vadd.f32 %v5004_v37, %v5000_v29  ;;  %v5003_v13 = vmul.f32 %v4991_v46, %v10462_v19  ;;  %v9271_v15 = vld [vmem:[#allocation2 + $0x858] ss:$48 sps:$4 sm:$0xff]   ;;  %v9279_v20 = vld [vmem:[#allocation2 + $0x8bc] ss:$48 sps:$4 sm:$0xff]   ;;  %v9280_v23 = vld [vmem:[#allocation2 + $0x8c0] ss:$48 sps:$4 sm:$0xff]  }
 0x465   : > { %4583 = vmatprep.subr.bf16.mxu1 %v9243_v21  ;;  %4706 = vmatprep.subr.bf16.mxu0 %v9246_v1  ;;  %v4958_v35 = vadd.f32 %v4957_v27, %v4953_v22  ;;  %v9282_v21 = vld [vmem:[#allocation2 + $0x8c4] ss:$48 sps:$4 sm:$0xff]   ;;  %v9277_v1 = vld [vmem:[#allocation2 + $0x8b8] ss:$48 sps:$4 sm:$0xff]   ;;  %v9285_v11 = vld [vmem:[#allocation2 + $0x91c] ss:$48 sps:$4 sm:$0xff]  }
 0x466   : > { %v5006_v47 = vadd.f32 %v5005_v43, %v5001_v42  ;;  %v9288_v25 = vld [vmem:[#allocation2 + $0x924] ss:$48 sps:$4 sm:$0xff]   ;;  %v9283_v26 = vld [vmem:[#allocation2 + $0x918] ss:$48 sps:$4 sm:$0xff]   ;;  %v9292_v37 = vld [vmem:[#allocation2 + $0x980] ss:$48 sps:$4 sm:$0xff]  }
 0x467   : > { %4584 = vmatpush1.bf16.msra.mxu1 %v9241_v10  ;;  %4707 = vmatpush1.bf16.msra.mxu0 %v9244_v28  ;;  %v4959_v49 = vadd.f32 %v4958_v35, %v4954_v44  ;;  %v9286_v10 = vld [vmem:[#allocation2 + $0x920] ss:$48 sps:$4 sm:$0xff]   ;;  %v9291_v28 = vld [vmem:[#allocation2 + $0x97c] ss:$48 sps:$4 sm:$0xff]   ;;  %v9294_v48 = vld [vmem:[#allocation2 + $0x984] ss:$48 sps:$4 sm:$0xff]  }
 0x468   : > { %4585 = vmatprep.subr.bf16.mxu1 %v9249_v39  ;;  %4708 = vmatprep.subr.bf16.mxu0 %v9252_v18  ;;  %v5007_v53 = vadd.f32 %v5006_v47, %v5002_v51  ;;  %v9289_v29 = vld [vmem:[#allocation2 + $0x978] ss:$48 sps:$4 sm:$0xff]   ;;  %v9297_v39 = vld [vmem:[#allocation2 + $0x9dc] ss:$48 sps:$4 sm:$0xff]   ;;  %v9300_v18 = vld [vmem:[#allocation2 + $0x9e4] ss:$48 sps:$4 sm:$0xff]  }
 0x469   : > { %v4960_v32 = vadd.f32 %v4959_v49, %v4955_v34  ;;  %v9295_v22 = vld [vmem:[#allocation2 + $0x9d8] ss:$48 sps:$4 sm:$0xff]   ;;  %v9298_v27 = vld [vmem:[#allocation2 + $0x9e0] ss:$48 sps:$4 sm:$0xff]   ;;  %v9303_v42 = vld [vmem:[#allocation2 + $0xa3c] ss:$48 sps:$4 sm:$0xff]  }
 0x46a   : > { %v5008_v56 = vadd.f32 %v5007_v53, %v5003_v13  ;;  %v9306_v43 = vld [vmem:[#allocation2 + $0xa44] ss:$48 sps:$4 sm:$0xff]   ;;  %v9301_v44 = vld [vmem:[#allocation2 + $0xa38] ss:$48 sps:$4 sm:$0xff]   ;;  %v9304_v35 = vld [vmem:[#allocation2 + $0xa40] ss:$48 sps:$4 sm:$0xff]  }
 0x46b   : > { %4586 = vmatpush1.bf16.msra.mxu1 %v9247_v38  ;;  %4709 = vmatpush1.bf16.msra.mxu0 %v9250_v45  ;;  %v9309_v38 = vld [vmem:[#allocation2 + $0xa9c] ss:$48 sps:$4 sm:$0xff]   ;;  %v9312_v45 = vld [vmem:[#allocation2 + $0xaa4] ss:$48 sps:$4 sm:$0xff]   ;;  %v9307_v46 = vld [vmem:[#allocation2 + $0xa98] ss:$48 sps:$4 sm:$0xff]  }
 0x46c   : > { %4961 = vadd.xlane.f32.xlu1 %v4960_v32  ;;  %4587 = vmatprep.subr.bf16.mxu1 %v9255_v50  ;;  %v9310_v47 = vld [vmem:[#allocation2 + $0xaa0] ss:$48 sps:$4 sm:$0xff]   ;;  %v9315_v34 = vld [vmem:[#allocation2 + $0xafc] ss:$48 sps:$4 sm:$0xff]   ;;  %v9318_v49 = vld [vmem:[#allocation2 + $0xb04] ss:$48 sps:$4 sm:$0xff]  }
 0x46d   : > { %4710 = vmatprep.subr.bf16.mxu0 %v9258_v52  ;;  %v9313_v50 = vld [vmem:[#allocation2 + $0xaf8] ss:$48 sps:$4 sm:$0xff]   ;;  %v9316_v51 = vld [vmem:[#allocation2 + $0xb00] ss:$48 sps:$4 sm:$0xff]   ;;  %v9321_v52 = vld [vmem:[#allocation2 + $0xb5c] ss:$48 sps:$4 sm:$0xff]  }
 0x46e   : > { %v9324_v32 = vld [vmem:[#allocation2 + $0xb64] ss:$48 sps:$4 sm:$0xff]   ;;  %v9319_v53 = vld [vmem:[#allocation2 + $0xb58] ss:$48 sps:$4 sm:$0xff]  }
 0x46f   : > { %4588 = vmatpush1.bf16.msra.mxu1 %v9253_v14  ;;  %4711 = vmatpush1.bf16.msra.mxu0 %v9256_v33  ;;  %v9322_v14 = vld [vmem:[#allocation2 + $0xb60] ss:$48 sps:$4 sm:$0xff]   ;;  %v9327_v33 = vld [vmem:[#allocation2 + $0xbbc] ss:$48 sps:$4 sm:$0xff]   ;;  %v9330_v13 = vld [vmem:[#allocation2 + $0xbc4] ss:$48 sps:$4 sm:$0xff]  }
 0x470   : > { %5009 = vadd.xlane.f32.xlu1 %v5008_v56  ;;  %4589 = vmatprep.subr.bf16.mxu1 %v9261_v36  ;;  %v9325_v36 = vld [vmem:[#allocation2 + $0xbb8] ss:$48 sps:$4 sm:$0xff]   ;;  %v9333_v56 = vld [vmem:[#allocation2 + $0xc1c] ss:$48 sps:$4 sm:$0xff]  }
 0x471   : > { %4712 = vmatprep.subr.bf16.mxu0 %v9264_v40  ;;  %v9328_v40 = vld [vmem:[#allocation2 + $0xbc0] ss:$48 sps:$4 sm:$0xff]  }
 0x473   : > { %4590 = vmatpush1.bf16.msra.mxu1 %v9259_v57  ;;  %4713 = vmatpush1.bf16.msra.mxu0 %v9262_v60  ;;  %v9336_v57 = vld [vmem:[#allocation2 + $0xc24] ss:$48 sps:$4 sm:$0xff]   ;;  %v9331_v60 = vld [vmem:[#allocation2 + $0xc18] ss:$48 sps:$4 sm:$0xff]  }
 0x474   : > { %4591 = vmatprep.subr.bf16.mxu1 %v9267_v3  ;;  %4714 = vmatprep.subr.bf16.mxu0 %v9270_v17  ;;  %v10474_v3 = vpack.c.bf16 %v10422_v41, %v10422_v41  ;;  %v9334_v17 = vld [vmem:[#allocation2 + $0xc20] ss:$48 sps:$4 sm:$0xff]  }
 0x477   : > { %4592 = vmatpush1.bf16.msra.mxu1 %v9265_v63  ;;  %4715 = vmatpush1.bf16.msra.mxu0 %v9268_v6  ;;  %v10478_v63 = vpack.c.bf16 %v10462_v19, %v10462_v19  ;;  %v9339_v6 = vld [vmem:[#allocation2 + $0xc7c] ss:$48 sps:$4 sm:$0xff]  }
 0x478   : > { %4593 = vmatprep.subr.bf16.mxu1 %v9273_v9  ;;  %4716 = vmatprep.subr.bf16.mxu0 %v9276_v12  ;;  %v9342_v9 = vld [vmem:[#allocation2 + $0xc84] ss:$48 sps:$4 sm:$0xff]   ;;  %v9337_v12 = vld [vmem:[#allocation2 + $0xc78] ss:$48 sps:$4 sm:$0xff]  }
 0x47b   : > { %4594 = vmatpush1.bf16.msra.mxu1 %v9271_v15  ;;  %4717 = vmatpush1.bf16.msra.mxu0 %v9274_v16  ;;  %v9340_v15 = vld [vmem:[#allocation2 + $0xc80] ss:$48 sps:$4 sm:$0xff]   ;;  %v9345_v16 = vld [vmem:[#allocation2 + $0xcdc] ss:$48 sps:$4 sm:$0xff]  }
 0x47c   : > { %4595 = vmatprep.subr.bf16.mxu1 %v9279_v20  ;;  %4718 = vmatprep.subr.bf16.mxu0 %v9282_v21  ;;  %v9348_v20 = vld [vmem:[#allocation2 + $0xce4] ss:$48 sps:$4 sm:$0xff]   ;;  %v9343_v21 = vld [vmem:[#allocation2 + $0xcd8] ss:$48 sps:$4 sm:$0xff]  }
 0x47f   : > { %4596 = vmatpush1.bf16.msra.mxu1 %v9277_v1  ;;  %4719 = vmatpush1.bf16.msra.mxu0 %v9280_v23  ;;  %v9346_v1 = vld [vmem:[#allocation2 + $0xce0] ss:$48 sps:$4 sm:$0xff]   ;;  %v9351_v23 = vld [vmem:[#allocation2 + $0xd3c] ss:$48 sps:$4 sm:$0xff]  }
 0x480   : > { %4597 = vmatprep.subr.bf16.mxu1 %v9285_v11  ;;  %4720 = vmatprep.subr.bf16.mxu0 %v9288_v25  ;;  %v9354_v11 = vld [vmem:[#allocation2 + $0xd44] ss:$48 sps:$4 sm:$0xff]   ;;  %v9349_v25 = vld [vmem:[#allocation2 + $0xd38] ss:$48 sps:$4 sm:$0xff]  }
 0x483   : > { %4598 = vmatpush1.bf16.msra.mxu1 %v9283_v26  ;;  %4721 = vmatpush1.bf16.msra.mxu0 %v9286_v10  ;;  %v9352_v26 = vld [vmem:[#allocation2 + $0xd40] ss:$48 sps:$4 sm:$0xff]   ;;  %v9357_v10 = vld [vmem:[#allocation2 + $0xd9c] ss:$48 sps:$4 sm:$0xff]  }
 0x484   : > { %4599 = vmatprep.subr.bf16.mxu1 %v9291_v28  ;;  %4722 = vmatprep.subr.bf16.mxu0 %v9294_v48  ;;  %v9360_v28 = vld [vmem:[#allocation2 + $0xda4] ss:$48 sps:$4 sm:$0xff]   ;;  %v9355_v48 = vld [vmem:[#allocation2 + $0xd98] ss:$48 sps:$4 sm:$0xff]  }
 0x487   : > { %4600 = vmatpush1.bf16.msra.mxu1 %v9289_v29  ;;  %4723 = vmatpush1.bf16.msra.mxu0 %v9292_v37  ;;  %v9358_v29 = vld [vmem:[#allocation2 + $0xda0] ss:$48 sps:$4 sm:$0xff]   ;;  %v9363_v37 = vld [vmem:[#allocation2 + $0xdfc] ss:$48 sps:$4 sm:$0xff]  }
 0x488   : > { %4601 = vmatprep.subr.bf16.mxu1 %v9297_v39  ;;  %4724 = vmatprep.subr.bf16.mxu0 %v9300_v18  ;;  %v9366_v39 = vld [vmem:[#allocation2 + $0xe04] ss:$48 sps:$4 sm:$0xff]   ;;  %v9361_v18 = vld [vmem:[#allocation2 + $0xdf8] ss:$48 sps:$4 sm:$0xff]  }
 0x48b   : > { %4602 = vmatpush1.bf16.msra.mxu1 %v9295_v22  ;;  %4725 = vmatpush1.bf16.msra.mxu0 %v9298_v27  ;;  %v9364_v22 = vld [vmem:[#allocation2 + $0xe00] ss:$48 sps:$4 sm:$0xff]   ;;  %v9369_v27 = vld [vmem:[#allocation2 + $0xe5c] ss:$48 sps:$4 sm:$0xff]  }
 0x48c   : > { %4603 = vmatprep.subr.bf16.mxu1 %v9303_v42  ;;  %4726 = vmatprep.subr.bf16.mxu0 %v9306_v43  ;;  %v9372_v42 = vld [vmem:[#allocation2 + $0xe64] ss:$48 sps:$4 sm:$0xff]   ;;  %v9367_v43 = vld [vmem:[#allocation2 + $0xe58] ss:$48 sps:$4 sm:$0xff]  }
 0x48f   : > { %4604 = vmatpush1.bf16.msra.mxu1 %v9301_v44  ;;  %4727 = vmatpush1.bf16.msra.mxu0 %v9304_v35  ;;  %v9370_v44 = vld [vmem:[#allocation2 + $0xe60] ss:$48 sps:$4 sm:$0xff]   ;;  %v9375_v35 = vld [vmem:[#allocation2 + $0xebc] ss:$48 sps:$4 sm:$0xff]  }
 0x490   : > { %4605 = vmatprep.subr.bf16.mxu1 %v9309_v38  ;;  %4728 = vmatprep.subr.bf16.mxu0 %v9312_v45  ;;  %v9378_v38 = vld [vmem:[#allocation2 + $0xec4] ss:$48 sps:$4 sm:$0xff]   ;;  %v9373_v45 = vld [vmem:[#allocation2 + $0xeb8] ss:$48 sps:$4 sm:$0xff]  }
 0x493   : > { %4606 = vmatpush1.bf16.msra.mxu1 %v9307_v46  ;;  %4729 = vmatpush1.bf16.msra.mxu0 %v9310_v47  ;;  %v9376_v46 = vld [vmem:[#allocation2 + $0xec0] ss:$48 sps:$4 sm:$0xff]   ;;  %v9381_v47 = vld [vmem:[#allocation2 + $0xf1c] ss:$48 sps:$4 sm:$0xff]  }
 0x494   : > { %4607 = vmatprep.subr.bf16.mxu1 %v9315_v34  ;;  %4730 = vmatprep.subr.bf16.mxu0 %v9318_v49  ;;  %v9384_v34 = vld [vmem:[#allocation2 + $0xf24] ss:$48 sps:$4 sm:$0xff]   ;;  %v9379_v49 = vld [vmem:[#allocation2 + $0xf18] ss:$48 sps:$4 sm:$0xff]  }
 0x497   : > { %4608 = vmatpush1.bf16.msra.mxu1 %v9313_v50  ;;  %4731 = vmatpush1.bf16.msra.mxu0 %v9316_v51  ;;  %v9382_v50 = vld [vmem:[#allocation2 + $0xf20] ss:$48 sps:$4 sm:$0xff]   ;;  %v9387_v51 = vld [vmem:[#allocation2 + $0xf7c] ss:$48 sps:$4 sm:$0xff]  }
 0x498   : > { %4609 = vmatprep.subr.bf16.mxu1 %v9321_v52  ;;  %4732 = vmatprep.subr.bf16.mxu0 %v9324_v32  ;;  %v9390_v52 = vld [vmem:[#allocation2 + $0xf84] ss:$48 sps:$4 sm:$0xff]   ;;  %v9385_v32 = vld [vmem:[#allocation2 + $0xf78] ss:$48 sps:$4 sm:$0xff]  }
 0x49b   : > { %4610 = vmatpush1.bf16.msra.mxu1 %v9319_v53  ;;  %4733 = vmatpush1.bf16.msra.mxu0 %v9322_v14  ;;  %v9388_v53 = vld [vmem:[#allocation2 + $0xf80] ss:$48 sps:$4 sm:$0xff]   ;;  %v9393_v14 = vld [vmem:[#allocation2 + $0xfdc] ss:$48 sps:$4 sm:$0xff]  }
 0x49c   : > { %4611 = vmatprep.subr.bf16.mxu1 %v9327_v33  ;;  %4734 = vmatprep.subr.bf16.mxu0 %v9330_v13  ;;  %v9396_v33 = vld [vmem:[#allocation2 + $0xfe4] ss:$48 sps:$4 sm:$0xff]   ;;  %v9391_v13 = vld [vmem:[#allocation2 + $0xfd8] ss:$48 sps:$4 sm:$0xff]  }
 0x49f   : > { %4612 = vmatpush1.bf16.msra.mxu1 %v9325_v36  ;;  %4735 = vmatpush1.bf16.msra.mxu0 %v9328_v40  ;;  %v9394_v36 = vld [vmem:[#allocation2 + $0xfe0] ss:$48 sps:$4 sm:$0xff]   ;;  %v9399_v40 = vld [vmem:[#allocation2 + $0x103c] ss:$48 sps:$4 sm:$0xff]  }
 0x4a0   : > { %4622 = vmatprep.subr.bf16.mxu1 %v9333_v56  ;;  %4745 = vmatprep.subr.bf16.mxu0 %v9336_v57  ;;  %v9402_v56 = vld [vmem:[#allocation2 + $0x1044] ss:$48 sps:$4 sm:$0xff]   ;;  %v9397_v57 = vld [vmem:[#allocation2 + $0x1038] ss:$48 sps:$4 sm:$0xff]  }
 0x4a2   : > { %4614 = vmatmul.mubr.bf16.vlgmr.msra.gmra.mrb[4].mxu1 %v10474_v3  ;;  %4737 = vmatmul.mubr.bf16.vlgmr.msra.gmra.mrb[8].mxu0 %v10474_v3 }
 0x4a3   : > { %4623 = vmatpush1.bf16.msra.mxu1 %v9331_v60  ;;  %4654 = vmatprep.mubr.bf16.mxu1 %v10478_v63  ;;  %v9400_v60 = vld [vmem:[#allocation2 + $0x1040] ss:$48 sps:$4 sm:$0xff]  }
 0x4a4   : > { %4746 = vmatpush1.bf16.msra.mxu0 %v9334_v17  ;;  %4777 = vmatprep.mubr.bf16.mxu0 %v10478_v63  ;;  %v9405_v17 = vld [vmem:[#allocation2 + $0x109c] ss:$48 sps:$4 sm:$0xff]  }
 0x4a5   : > { %4624 = vmatprep.subr.bf16.mxu1 %v9339_v6  ;;  %4747 = vmatprep.subr.bf16.mxu0 %v9342_v9  ;;  %v9408_v6 = vld [vmem:[#allocation2 + $0x10a4] ss:$48 sps:$4 sm:$0xff]   ;;  %v9403_v9 = vld [vmem:[#allocation2 + $0x1098] ss:$48 sps:$4 sm:$0xff]  }
 0x4a7   : > { %4625 = vmatpush1.bf16.msra.mxu1 %v9337_v12  ;;  %v9406_v12 = vld [vmem:[#allocation2 + $0x10a0] ss:$48 sps:$4 sm:$0xff]  }
 0x4a8   : > { %4748 = vmatpush1.bf16.msra.mxu0 %v9340_v15  ;;  %4626 = vmatprep.subr.bf16.mxu1 %v9345_v16  ;;  %v9411_v15 = vld [vmem:[#allocation2 + $0x10fc] ss:$48 sps:$4 sm:$0xff]   ;;  %v9414_v16 = vld [vmem:[#allocation2 + $0x1104] ss:$48 sps:$4 sm:$0xff]  }
 0x4a9   : > { %4749 = vmatprep.subr.bf16.mxu0 %v9348_v20  ;;  %v9409_v20 = vld [vmem:[#allocation2 + $0x10f8] ss:$48 sps:$4 sm:$0xff]  }
 0x4ab   : > { %4627 = vmatpush1.bf16.msra.mxu1 %v9343_v21  ;;  %v9412_v21 = vld [vmem:[#allocation2 + $0x1100] ss:$48 sps:$4 sm:$0xff]  }
 0x4ac   : > { %4750 = vmatpush1.bf16.msra.mxu0 %v9346_v1  ;;  %4628 = vmatprep.subr.bf16.mxu1 %v9351_v23  ;;  %v9417_v1 = vld [vmem:[#allocation2 + $0x115c] ss:$48 sps:$4 sm:$0xff]   ;;  %v9420_v23 = vld [vmem:[#allocation2 + $0x1164] ss:$48 sps:$4 sm:$0xff]  }
 0x4ad   : > { %4751 = vmatprep.subr.bf16.mxu0 %v9354_v11  ;;  %v9415_v11 = vld [vmem:[#allocation2 + $0x1158] ss:$48 sps:$4 sm:$0xff]  }
 0x4af   : > { %4629 = vmatpush1.bf16.msra.mxu1 %v9349_v25  ;;  %v9418_v25 = vld [vmem:[#allocation2 + $0x1160] ss:$48 sps:$4 sm:$0xff]  }
 0x4b0   : > { %4752 = vmatpush1.bf16.msra.mxu0 %v9352_v26  ;;  %4630 = vmatprep.subr.bf16.mxu1 %v9357_v10  ;;  %v9423_v26 = vld [vmem:[#allocation2 + $0x11bc] ss:$48 sps:$4 sm:$0xff]   ;;  %v9426_v10 = vld [vmem:[#allocation2 + $0x11c4] ss:$48 sps:$4 sm:$0xff]  }
 0x4b1   : > { %4753 = vmatprep.subr.bf16.mxu0 %v9360_v28  ;;  %v9421_v28 = vld [vmem:[#allocation2 + $0x11b8] ss:$48 sps:$4 sm:$0xff]  }
 0x4b3   : > { %4631 = vmatpush1.bf16.msra.mxu1 %v9355_v48  ;;  %v9424_v48 = vld [vmem:[#allocation2 + $0x11c0] ss:$48 sps:$4 sm:$0xff]  }
 0x4b4   : > { %4754 = vmatpush1.bf16.msra.mxu0 %v9358_v29  ;;  %4632 = vmatprep.subr.bf16.mxu1 %v9363_v37  ;;  %v9429_v29 = vld [vmem:[#allocation2 + $0x2c] ss:$48 sps:$4 sm:$0xff]   ;;  %v9427_v37 = vld [vmem:[#allocation2 + $0x28] ss:$48 sps:$4 sm:$0xff]  }
 0x4b5   : > { %4755 = vmatprep.subr.bf16.mxu0 %v9366_v39  ;;  %v10486_v39 = vpack.c.bf16 %v10446_v4, %v10446_v4 }
 0x4b7   : > { %4633 = vmatpush1.bf16.msra.mxu1 %v9361_v18  ;;  %v9432_v18 = vld [vmem:[#allocation2 + $0x8c] ss:$48 sps:$4 sm:$0xff]  }
 0x4b8   : > { %4756 = vmatpush1.bf16.msra.mxu0 %v9364_v22  ;;  %4634 = vmatprep.subr.bf16.mxu1 %v9369_v27  ;;  %v9430_v22 = vld [vmem:[#allocation2 + $0x88] ss:$48 sps:$4 sm:$0xff]   ;;  %v9435_v27 = vld [vmem:[#allocation2 + $0xec] ss:$48 sps:$4 sm:$0xff]  }
 0x4b9   : > { %4757 = vmatprep.subr.bf16.mxu0 %v9372_v42  ;;  %v9433_v42 = vld [vmem:[#allocation2 + $0xe8] ss:$48 sps:$4 sm:$0xff]  }
 0x4bb   : > { %4635 = vmatpush1.bf16.msra.mxu1 %v9367_v43  ;;  %v9438_v43 = vld [vmem:[#allocation2 + $0x14c] ss:$48 sps:$4 sm:$0xff]  }
 0x4bc   : > { %4758 = vmatpush1.bf16.msra.mxu0 %v9370_v44  ;;  %4636 = vmatprep.subr.bf16.mxu1 %v9375_v35  ;;  %v9436_v44 = vld [vmem:[#allocation2 + $0x148] ss:$48 sps:$4 sm:$0xff]   ;;  %v9441_v35 = vld [vmem:[#allocation2 + $0x1ac] ss:$48 sps:$4 sm:$0xff]  }
 0x4bd   : > { %4759 = vmatprep.subr.bf16.mxu0 %v9378_v38  ;;  %v9439_v38 = vld [vmem:[#allocation2 + $0x1a8] ss:$48 sps:$4 sm:$0xff]  }
 0x4bf   : > { %4637 = vmatpush1.bf16.msra.mxu1 %v9373_v45  ;;  %v9444_v45 = vld [vmem:[#allocation2 + $0x20c] ss:$48 sps:$4 sm:$0xff]  }
 0x4c0   : > { %4760 = vmatpush1.bf16.msra.mxu0 %v9376_v46  ;;  %4638 = vmatprep.subr.bf16.mxu1 %v9381_v47  ;;  %v9442_v46 = vld [vmem:[#allocation2 + $0x208] ss:$48 sps:$4 sm:$0xff]   ;;  %v9447_v47 = vld [vmem:[#allocation2 + $0x26c] ss:$48 sps:$4 sm:$0xff]  }
 0x4c1   : > { %4761 = vmatprep.subr.bf16.mxu0 %v9384_v34  ;;  %v9450_v34 = vld [vmem:[#allocation2 + $0x2cc] ss:$48 sps:$4 sm:$0xff]  }
 0x4c3   : > { %4639 = vmatpush1.bf16.msra.mxu1 %v9379_v49 }
 0x4c4   : > { %4762 = vmatpush1.bf16.msra.mxu0 %v9382_v50  ;;  %4640 = vmatprep.subr.bf16.mxu1 %v9387_v51  ;;  %v9448_v50 = vld [vmem:[#allocation2 + $0x2c8] ss:$48 sps:$4 sm:$0xff]   ;;  %v5017_v51 = vpop.permute.xlu0 %5016 }
 0x4c5   : > { %4763 = vmatprep.subr.bf16.mxu0 %v9390_v52  ;;  %v9453_v52 = vld [vmem:[#allocation2 + $0x32c] ss:$48 sps:$4 sm:$0xff]  }
 0x4c7   : > { %4641 = vmatpush1.bf16.msra.mxu1 %v9385_v32 }
 0x4c8   : > { %4764 = vmatpush1.bf16.msra.mxu0 %v9388_v53  ;;  %4642 = vmatprep.subr.bf16.mxu1 %v9393_v14 }
 0x4c9   : > { %4765 = vmatprep.subr.bf16.mxu0 %v9396_v33  ;;  %v9451_v33 = vld [vmem:[#allocation2 + $0x328] ss:$48 sps:$4 sm:$0xff]  }
 0x4cb   : > { %4643 = vmatpush1.bf16.msra.mxu1 %v9391_v13  ;;  %v9456_v13 = vld [vmem:[#allocation2 + $0x38c] ss:$48 sps:$4 sm:$0xff]  }
 0x4cc   : > { %4766 = vmatpush1.bf16.msra.mxu0 %v9394_v36  ;;  %4644 = vmatprep.subr.bf16.mxu1 %v9399_v40 }
 0x4cd   : > { %4767 = vmatprep.subr.bf16.mxu0 %v9402_v56  ;;  %v9454_v56 = vld [vmem:[#allocation2 + $0x388] ss:$48 sps:$4 sm:$0xff]  }
 0x4cf   : > { %4645 = vmatpush1.bf16.msra.mxu1 %v9397_v57 }
 0x4d0   : > { %4768 = vmatpush1.bf16.msra.mxu0 %v9400_v60  ;;  %4646 = vmatprep.subr.bf16.mxu1 %v9405_v17  ;;  %v9459_v60 = vld [vmem:[#allocation2 + $0x3ec] ss:$48 sps:$4 sm:$0xff]  }
 0x4d1   : > { %4769 = vmatprep.subr.bf16.mxu0 %v9408_v6  ;;  %v9457_v6 = vld [vmem:[#allocation2 + $0x3e8] ss:$48 sps:$4 sm:$0xff]  }
 0x4d3   : > { %4647 = vmatpush1.bf16.msra.mxu1 %v9403_v9 }
 0x4d4   : > { %4770 = vmatpush1.bf16.msra.mxu0 %v9406_v12  ;;  %4648 = vmatprep.subr.bf16.mxu1 %v9411_v15  ;;  %v9462_v12 = vld [vmem:[#allocation2 + $0x44c] ss:$48 sps:$4 sm:$0xff]  }
 0x4d5   : > { %4771 = vmatprep.subr.bf16.mxu0 %v9414_v16  ;;  %v9460_v16 = vld [vmem:[#allocation2 + $0x448] ss:$48 sps:$4 sm:$0xff]  }
 0x4d7   : > { %4649 = vmatpush1.bf16.msra.mxu1 %v9409_v20 }
 0x4d8   : > { %4772 = vmatpush1.bf16.msra.mxu0 %v9412_v21  ;;  %4650 = vmatprep.subr.bf16.mxu1 %v9417_v1  ;;  %v9465_v21 = vld [vmem:[#allocation2 + $0x4ac] ss:$48 sps:$4 sm:$0xff]  }
 0x4d9   : > { %4773 = vmatprep.subr.bf16.mxu0 %v9420_v23  ;;  %v9463_v23 = vld [vmem:[#allocation2 + $0x4a8] ss:$48 sps:$4 sm:$0xff]  }
 0x4db   : > { %4651 = vmatpush1.bf16.msra.mxu1 %v9415_v11 }
 0x4dc   : > { %4774 = vmatpush1.bf16.msra.mxu0 %v9418_v25  ;;  %4652 = vmatprep.subr.bf16.mxu1 %v9423_v26  ;;  %v9468_v25 = vld [vmem:[#allocation2 + $0x50c] ss:$48 sps:$4 sm:$0xff]   ;;  %v9466_v26 = vld [vmem:[#allocation2 + $0x508] ss:$48 sps:$4 sm:$0xff]  }
 0x4dd   : > { %4775 = vmatprep.subr.bf16.mxu0 %v9426_v10  ;;  %v9471_v10 = vld [vmem:[#allocation2 + $0x56c] ss:$48 sps:$4 sm:$0xff]  }
 0x4df   : > { %4653 = vmatpush1.bf16.msra.mxu1 %v9421_v28  ;;  %v9469_v28 = vld [vmem:[#allocation2 + $0x568] ss:$48 sps:$4 sm:$0xff]  }
 0x4e0   : > { %4776 = vmatpush1.bf16.msra.mxu0 %v9424_v48  ;;  %4786 = vmatprep.subr.bf16.mxu1 %v9429_v29  ;;  %v9474_v48 = vld [vmem:[#allocation2 + $0x5cc] ss:$48 sps:$4 sm:$0xff]   ;;  %v9472_v29 = vld [vmem:[#allocation2 + $0x5c8] ss:$48 sps:$4 sm:$0xff]  }
 0x4e2   : > { %4655 = vmatmul.mubr.bf16.vlgmr.msra.gmra.mrb[4].mxu1 %v10486_v39 }
 0x4e3   : > { %4778 = vmatmul.mubr.bf16.vlgmr.msra.gmra.mrb[8].mxu0 %v10486_v39  ;;  %4787 = vmatpush1.bf16.msra.mxu1 %v9427_v37 }
 0x4e4   : > { %4818 = vmatprep.mubr.bf16.mxu1 %v10430_v61  ;;  %4788 = vmatprep.subr.bf16.mxu1 %v9432_v18  ;;  %v9445_v61 = vld [vmem:[#allocation2 + $0x268] ss:$48 sps:$4 sm:$0xff]   ;;  %v9477_v18 = vld [vmem:[#allocation2 + $0x62c] ss:$48 sps:$4 sm:$0xff]  }
 0x4e7   : > { %4789 = vmatpush1.bf16.msra.mxu1 %v9430_v22 }
 0x4e8   : > { %4790 = vmatprep.subr.bf16.mxu1 %v9435_v27 }
 0x4eb   : > { %4791 = vmatpush1.bf16.msra.mxu1 %v9433_v42  ;;  %v9475_v42 = vld [vmem:[#allocation2 + $0x628] ss:$48 sps:$4 sm:$0xff]  }
 0x4ec   : > { %4792 = vmatprep.subr.bf16.mxu1 %v9438_v43 }
 0x4ef   : > { %4793 = vmatpush1.bf16.msra.mxu1 %v9436_v44  ;;  %v9480_v44 = vld [vmem:[#allocation2 + $0x68c] ss:$48 sps:$4 sm:$0xff]  }
 0x4f0   : > { %4794 = vmatprep.subr.bf16.mxu1 %v9441_v35 }
 0x4f3   : > { %4795 = vmatpush1.bf16.msra.mxu1 %v9439_v38  ;;  %v10494_v38 = vld [vmem:[#allocation6 + $0x1c0] sm:$0xff]  }
 0x4f4   : > { %4796 = vmatprep.subr.bf16.mxu1 %v9444_v45  ;;  %v10496_v45 = vld [vmem:[#allocation6 + $0x180] sm:$0xff]   ;;  %8169 = vmatprep.subr.bf16.mxu0 %v10494_v38 }
 0x4f5   : > { %8170 = vmatpush3.bf16.msra.mxu0 %v10496_v45 }
 0x4f7   : > { %4797 = vmatpush1.bf16.msra.mxu1 %v9442_v46  ;;  %v9478_v46 = vld [vmem:[#allocation2 + $0x688] ss:$48 sps:$4 sm:$0xff]  }
 0x4f8   : > { %4798 = vmatprep.subr.bf16.mxu1 %v9447_v47  ;;  %v10499_v47 = vld [vmem:[#allocation6 + $0x1c8] sm:$0xff]  }
 0x4f9   : > { %v4962_v49 = vpop.xlane.xlu1 %4961  ;;  %8171 = vmatprep.subr.bf16.mxu0 %v10499_v47 }
 0x4fb   : > { %4799 = vmatpush1.bf16.msra.mxu1 %v9445_v61 }
 0x4fc   : > { %4800 = vmatprep.subr.bf16.mxu1 %v9450_v34  ;;  %v9483_v34 = vld [vmem:[#allocation2 + $0x6ec] ss:$48 sps:$4 sm:$0xff]  }
 0x4fd   : > { %v5010_v32 = vpop.xlane.xlu1 %5009 }
 0x4fe   : > { %v5012_v53 = vsel %vm5011_vm0, %v4962_v49, %v5010_v32  ;;  %v10503_v49 = vld [vmem:[#allocation6 + $0x188] sm:$0xff]   ;;  %v10509_v32 = vld [vmem:[#allocation6 + $0x190] sm:$0xff]  }
 0x4ff   : > { %v5019_v14 = vadd.f32 %v5017_v51, %v5012_v53  ;;  %4801 = vmatpush1.bf16.msra.mxu1 %v9448_v50  ;;  %v9481_v50 = vld [vmem:[#allocation2 + $0x6e8] ss:$48 sps:$4 sm:$0xff]   ;;  %v10506_v51 = vld [vmem:[#allocation6 + $0x1d0] sm:$0xff]   ;;  %8172 = vmatpush3.bf16.msra.mxu0 %v10503_v49 }
 0x500   : > { %4802 = vmatprep.subr.bf16.mxu1 %v9453_v52  ;;  %v9486_v52 = vld [vmem:[#allocation2 + $0x74c] ss:$48 sps:$4 sm:$0xff]   ;;  %8173 = vmatprep.subr.bf16.mxu0 %v10506_v51  ;;  %v9484_v53 = vld [vmem:[#allocation2 + $0x748] ss:$48 sps:$4 sm:$0xff]  }
 0x501   : > { %v5021_v36 = vsel %vm5020_vm1, %v5019_v14, -inf }
 0x502   : > { %v5022_v40 = vrot.slane %v5021_v36, 4 }
 0x503   : > { %4803 = vmatpush1.bf16.msra.mxu1 %v9451_v33  ;;  %8174 = vmatpush3.bf16.msra.mxu0 %v10509_v32  ;;  %v9487_v33 = vld [vmem:[#allocation2 + $0x7a8] ss:$48 sps:$4 sm:$0xff]  }
 0x504   : > { %v5023_v57 = vmax.f32 %v5021_v36, %v5022_v40  ;;  %4804 = vmatprep.subr.bf16.mxu1 %v9456_v13  ;;  %v9492_v13 = vld [vmem:[#allocation2 + $0x80c] ss:$48 sps:$4 sm:$0xff]   ;;  %v9490_v36 = vld [vmem:[#allocation2 + $0x808] ss:$48 sps:$4 sm:$0xff]  }
 0x506   : > { %v5024_v17 = vrot.slane %v5023_v57, 2 }
 0x507   : > { %4805 = vmatpush1.bf16.msra.mxu1 %v9454_v56  ;;  %v9495_v56 = vld [vmem:[#allocation2 + $0x86c] ss:$48 sps:$4 sm:$0xff]  }
 0x508   : > { %v5025_v9 = vmax.f32 %v5023_v57, %v5024_v17  ;;  %4806 = vmatprep.subr.bf16.mxu1 %v9459_v60  ;;  %v9493_v60 = vld [vmem:[#allocation2 + $0x868] ss:$48 sps:$4 sm:$0xff]   ;;  %v9498_v17 = vld [vmem:[#allocation2 + $0x8cc] ss:$48 sps:$4 sm:$0xff]  }
 0x50a   : > { %v5026_v15 = vrot.slane %v5025_v9, 1 }
 0x50b   : > { %4807 = vmatpush1.bf16.msra.mxu1 %v9457_v6  ;;  %v10513_v6 = vld [vmem:[#allocation6 + $0x1d8] sm:$0xff]  }
 0x50c   : > { %v5027_v20 = vmax.f32 %v5025_v9, %v5026_v15  ;;  %4808 = vmatprep.subr.bf16.mxu1 %v9462_v12  ;;  %v10515_v9 = vld [vmem:[#allocation6 + $0x198] sm:$0xff]   ;;  %8175 = vmatprep.subr.bf16.mxu0 %v10513_v6  ;;  %v11147_v12 = vmov 1  }
 0x50d   : > { %v9496_v15 = vld [vmem:[#allocation2 + $0x8c8] ss:$48 sps:$4 sm:$0xff]   ;;  %8176 = vmatpush3.bf16.msra.mxu0 %v10515_v9 }
 0x50e   : > { %v5028_v1 = vsub.f32 %v5019_v14, %v5027_v20  ;;  %v9489_v14 = vld [vmem:[#allocation2 + $0x7ac] ss:$48 sps:$4 sm:$0xff]   ;;  %v10519_v20 = vld [vmem:[#allocation6 + $0x1e0] sm:$0xff]  }
 0x50f   : > { %4809 = vmatpush1.bf16.msra.mxu1 %v9460_v16  ;;  %v9501_v16 = vld [vmem:[#allocation2 + $0x92c] ss:$48 sps:$4 sm:$0xff]   ;;  %8177 = vmatprep.subr.bf16.mxu0 %v10519_v20 }
 0x510   : > { %v5029_v11 = vmul.f32 1.442695, %v5028_v1  ;;  %4810 = vmatprep.subr.bf16.mxu1 %v9465_v21  ;;  %v10522_v21 = vld [vmem:[#allocation6 + $0x1a0] sm:$0xff]   ;;  %v9499_v1 = vld [vmem:[#allocation2 + $0x928] ss:$48 sps:$4 sm:$0xff]  }
 0x511   : > { %8178 = vmatpush3.bf16.msra.mxu0 %v10522_v21 }
 0x512   : > { %9745 = vpow2.f32 %v5029_v11  ;;  %v10525_v11 = vld [vmem:[#allocation6 + $0x1e8] sm:$0xff]  }
 0x513   : > { %4811 = vmatpush1.bf16.msra.mxu1 %v9463_v23  ;;  %v9504_v23 = vld [vmem:[#allocation2 + $0x98c] ss:$48 sps:$4 sm:$0xff]   ;;  %8179 = vmatprep.subr.bf16.mxu0 %v10525_v11 }
 0x514   : > { %4812 = vmatprep.subr.bf16.mxu1 %v9468_v25  ;;  %v10529_v25 = vld [vmem:[#allocation6 + $0x1a8] sm:$0xff]  }
 0x515   : > { %8180 = vmatpush3.bf16.msra.mxu0 %v10529_v25 }
 0x517   : > { %4813 = vmatpush1.bf16.msra.mxu1 %v9466_v26  ;;  %v10532_v26 = vld [vmem:[#allocation6 + $0x1f0] sm:$0xff]  }
 0x518   : > { %4814 = vmatprep.subr.bf16.mxu1 %v9471_v10  ;;  %v9502_v10 = vld [vmem:[#allocation2 + $0x988] ss:$48 sps:$4 sm:$0xff]   ;;  %8181 = vmatprep.subr.bf16.mxu0 %v10532_v26 }
 0x51b   : > { %4815 = vmatpush1.bf16.msra.mxu1 %v9469_v28  ;;  %v9507_v28 = vld [vmem:[#allocation2 + $0x9ec] ss:$48 sps:$4 sm:$0xff]  }
 0x51c   : > { %v9746_v37 = vpop.eup %9745  ;;  %4816 = vmatprep.subr.bf16.mxu1 %v9474_v48  ;;  %v10535_v48 = vld [vmem:[#allocation6 + $0x1b0] sm:$0xff]  }
 0x51d   : > { %v5031_v22 = vsel %vm5020_vm1, %v9746_v37, 0.0  ;;  %8182 = vmatpush3.bf16.msra.mxu0 %v10535_v48 }
 0x51e   : > { %v5032_v27 = vrot.slane %v5031_v22, 4 }
 0x51f   : > { %4817 = vmatpush1.bf16.msra.mxu1 %v9472_v29  ;;  %v10538_v29 = vld [vmem:[#allocation6 + $0x1f8] sm:$0xff]  }
 0x520   : > { %v5033_v43 = vadd.f32 %v5032_v27, %v5031_v22  ;;  %4827 = vmatprep.subr.bf16.mxu1 %v9477_v18  ;;  %v10541_v18 = vld [vmem:[#allocation6 + $0x1b8] sm:$0xff]   ;;  %8183 = vmatprep.subr.bf16.mxu0 %v10538_v29 }
 0x521   : > { %v9508_v22 = vld [vmem:[#allocation2 + $0xa48] ss:$48 sps:$4 sm:$0xff]   ;;  %v9513_v27 = vld [vmem:[#allocation2 + $0xaac] ss:$48 sps:$4 sm:$0xff]   ;;  %8184 = vmatpush3.bf16.msra.mxu0 %v10541_v18 }
 0x522   : > { %v5034_v35 = vrot.slane %v5033_v43, 2  ;;  %4819 = vmatmul.mubr.bf16.vlgmr.msra.gmra.mrb[8].mxu1 %v10434_v5 }
 0x523   : > { %4828 = vmatpush1.bf16.msra.mxu1 %v9475_v42  ;;  %4859 = vmatprep.mubr.bf16.mxu1 %v10454_v24  ;;  %v10544_v42 = vld [vmem:[#allocation6 + $0x2c0] sm:$0xff]  }
 0x524   : > { %v5035_v61 = vadd.f32 %v5034_v35, %v5033_v43  ;;  %4829 = vmatprep.subr.bf16.mxu1 %v9480_v44  ;;  %8213 = vmatprep.subr.bf16.mxu0 %v10544_v42  ;;  %v9511_v43 = vld [vmem:[#allocation2 + $0xaa8] ss:$48 sps:$4 sm:$0xff]   ;;  %v9516_v44 = vld [vmem:[#allocation2 + $0xb0c] ss:$48 sps:$4 sm:$0xff]  }
 0x525   : > { %v9514_v35 = vld [vmem:[#allocation2 + $0xb08] ss:$48 sps:$4 sm:$0xff]  }
 0x526   : > { %v5036_v5 = vrot.slane %v5035_v61, 1 }
 0x527   : > { %4830 = vmatpush1.bf16.msra.mxu1 %v9478_v46  ;;  %v9519_v46 = vld [vmem:[#allocation2 + $0xb6c] ss:$48 sps:$4 sm:$0xff]  }
 0x528   : > { %v5037_v24 = vadd.f32 %v5036_v5, %v5035_v61  ;;  %4831 = vmatprep.subr.bf16.mxu1 %v9483_v34  ;;  %v9517_v61 = vld [vmem:[#allocation2 + $0xb68] ss:$48 sps:$4 sm:$0xff]   ;;  %v9522_v34 = vld [vmem:[#allocation2 + $0xbcc] ss:$48 sps:$4 sm:$0xff]  }
 0x529   : > { %v9520_v5 = vld [vmem:[#allocation2 + $0xbc8] ss:$48 sps:$4 sm:$0xff]  }
 0x52a   : > { %9747 = vrcp.f32 %v5037_v24  ;;  %v9523_v24 = vld [vmem:[#allocation2 + $0xc28] ss:$48 sps:$4 sm:$0xff]  }
 0x52b   : > { %4832 = vmatpush1.bf16.msra.mxu1 %v9481_v50  ;;  %v9525_v50 = vld [vmem:[#allocation2 + $0xc2c] ss:$48 sps:$4 sm:$0xff]  }
 0x52c   : > { %4833 = vmatprep.subr.bf16.mxu1 %v9486_v52  ;;  %v9528_v52 = vld [vmem:[#allocation2 + $0xc8c] ss:$48 sps:$4 sm:$0xff]  }
 0x52f   : > { %4834 = vmatpush1.bf16.msra.mxu1 %v9484_v53  ;;  %v9526_v53 = vld [vmem:[#allocation2 + $0xc88] ss:$48 sps:$4 sm:$0xff]  }
 0x530   : > { %4835 = vmatprep.subr.bf16.mxu1 %v9489_v14  ;;  %v9531_v14 = vld [vmem:[#allocation2 + $0xcec] ss:$48 sps:$4 sm:$0xff]  }
 0x533   : > { %4836 = vmatpush1.bf16.msra.mxu1 %v9487_v33  ;;  %v9529_v33 = vld [vmem:[#allocation2 + $0xce8] ss:$48 sps:$4 sm:$0xff]  }
 0x534   : > { %v9748_v40 = vpop.eup %9747  ;;  %4837 = vmatprep.subr.bf16.mxu1 %v9492_v13  ;;  %v9534_v13 = vld [vmem:[#allocation2 + $0xd4c] ss:$48 sps:$4 sm:$0xff]  }
 0x535   : > { %v5039_v57 = vmul.f32 %v9748_v40, %v9746_v37  ;;  %v9510_v37 = vld [vmem:[#allocation2 + $0xa4c] ss:$48 sps:$4 sm:$0xff]  }
 0x536   : > { %v9537_v40 = vld [vmem:[#allocation2 + $0xdac] ss:$48 sps:$4 sm:$0xff]  }
 0x537   : > { %4838 = vmatpush1.bf16.msra.mxu1 %v9490_v36  ;;  %5042 = vperm.xlu1 %8696, %v5039_v57   ;;  %v9532_v36 = vld [vmem:[#allocation2 + $0xd48] ss:$48 sps:$4 sm:$0xff]  }
 0x538   : > { %4839 = vmatprep.subr.bf16.mxu1 %v9495_v56  ;;  %v9535_v56 = vld [vmem:[#allocation2 + $0xda8] ss:$48 sps:$4 sm:$0xff]  }
 0x53b   : > { %4840 = vmatpush1.bf16.msra.mxu1 %v9493_v60  ;;  %8697 = vset.pattern.permute.xlu1 %v11147_v12  ;;  %v9543_v60 = vld [vmem:[#allocation2 + $0xe6c] ss:$48 sps:$4 sm:$0xff]  }
 0x53c   : > { %5094 = vperm.xlu1 %8697, %v5039_v57   ;;  %4841 = vmatprep.subr.bf16.mxu1 %v9498_v17  ;;  %v9540_v57 = vld [vmem:[#allocation2 + $0xe0c] ss:$48 sps:$4 sm:$0xff]  }
 0x53d   : > { %v9546_v17 = vld [vmem:[#allocation2 + $0xecc] ss:$48 sps:$4 sm:$0xff]  }
 0x53f   : > { %4842 = vmatpush1.bf16.msra.mxu1 %v9496_v15  ;;  %v9544_v15 = vld [vmem:[#allocation2 + $0xec8] ss:$48 sps:$4 sm:$0xff]  }
 0x540   : > { %4843 = vmatprep.subr.bf16.mxu1 %v9501_v16  ;;  %8698 = vset.pattern.permute.xlu1 %v9978_v7  ;;  %v9505_v7 = vld [vmem:[#allocation2 + $0x9e8] ss:$48 sps:$4 sm:$0xff]   ;;  %v9549_v16 = vld [vmem:[#allocation2 + $0xf2c] ss:$48 sps:$4 sm:$0xff]  }
 0x543   : > { %4844 = vmatpush1.bf16.msra.mxu1 %v9499_v1  ;;  %v9547_v1 = vld [vmem:[#allocation2 + $0xf28] ss:$48 sps:$4 sm:$0xff]  }
 0x544   : > { %4845 = vmatprep.subr.bf16.mxu1 %v9504_v23  ;;  %v9552_v23 = vld [vmem:[#allocation2 + $0xf8c] ss:$48 sps:$4 sm:$0xff]  }
 0x547   : > { %4846 = vmatpush1.bf16.msra.mxu1 %v9502_v10  ;;  %v9550_v10 = vld [vmem:[#allocation2 + $0xf88] ss:$48 sps:$4 sm:$0xff]  }
 0x548   : > { %4847 = vmatprep.subr.bf16.mxu1 %v9507_v28  ;;  %v9555_v28 = vld [vmem:[#allocation2 + $0xfec] ss:$48 sps:$4 sm:$0xff]  }
 0x54b   : > { %4848 = vmatpush1.bf16.msra.mxu1 %v9505_v7  ;;  %v9553_v7 = vld [vmem:[#allocation2 + $0xfe8] ss:$48 sps:$4 sm:$0xff]  }
 0x54c   : > { %4849 = vmatprep.subr.bf16.mxu1 %v9510_v37  ;;  %v9558_v37 = vld [vmem:[#allocation2 + $0x104c] ss:$48 sps:$4 sm:$0xff]  }
 0x54f   : > { %4850 = vmatpush1.bf16.msra.mxu1 %v9508_v22  ;;  %v9556_v22 = vld [vmem:[#allocation2 + $0x1048] ss:$48 sps:$4 sm:$0xff]  }
 0x550   : > { %4851 = vmatprep.subr.bf16.mxu1 %v9513_v27  ;;  %v9561_v27 = vld [vmem:[#allocation2 + $0x10ac] ss:$48 sps:$4 sm:$0xff]  }
 0x553   : > { %4852 = vmatpush1.bf16.msra.mxu1 %v9511_v43  ;;  %v9559_v43 = vld [vmem:[#allocation2 + $0x10a8] ss:$48 sps:$4 sm:$0xff]  }
 0x554   : > { %4853 = vmatprep.subr.bf16.mxu1 %v9516_v44  ;;  %v9564_v44 = vld [vmem:[#allocation2 + $0x110c] ss:$48 sps:$4 sm:$0xff]  }
 0x557   : > { %4854 = vmatpush1.bf16.msra.mxu1 %v9514_v35  ;;  %v9562_v35 = vld [vmem:[#allocation2 + $0x1108] ss:$48 sps:$4 sm:$0xff]  }
 0x558   : > { %4855 = vmatprep.subr.bf16.mxu1 %v9519_v46  ;;  %v9567_v46 = vld [vmem:[#allocation2 + $0x116c] ss:$48 sps:$4 sm:$0xff]  }
 0x55b   : > { %4856 = vmatpush1.bf16.msra.mxu1 %v9517_v61  ;;  %v9565_v61 = vld [vmem:[#allocation2 + $0x1168] ss:$48 sps:$4 sm:$0xff]  }
 0x55c   : > { %4857 = vmatprep.subr.bf16.mxu1 %v9522_v34  ;;  %v9570_v34 = vld [vmem:[#allocation2 + $0x11cc] ss:$48 sps:$4 sm:$0xff]  }
 0x55f   : > { %4858 = vmatpush1.bf16.msra.mxu1 %v9520_v5  ;;  %v9568_v5 = vld [vmem:[#allocation2 + $0x11c8] ss:$48 sps:$4 sm:$0xff]  }
 0x560   : > { %4868 = vmatprep.subr.bf16.mxu1 %v9525_v50  ;;  %v10550_v50 = vld [vmem:[#allocation6 + $0x240] sm:$0xff]  }
 0x562   : > { %4860 = vmatmul.mubr.bf16.vlgmr.msra.gmra.mrb[8].mxu1 %v10474_v3  ;;  %v9538_v3 = vld [vmem:[#allocation2 + $0xe08] ss:$48 sps:$4 sm:$0xff]  }
 0x563   : > { %4869 = vmatpush1.bf16.msra.mxu1 %v9523_v24  ;;  %4900 = vmatprep.mubr.bf16.mxu1 %v10478_v63  ;;  %v9541_v63 = vld [vmem:[#allocation2 + $0xe68] ss:$48 sps:$4 sm:$0xff]   ;;  %v10552_v24 = vld [vmem:[#allocation6 + $0x200] sm:$0xff]  }
 0x564   : > { %4870 = vmatprep.subr.bf16.mxu1 %v9528_v52  ;;  %v10555_v52 = vld [vmem:[#allocation6 + $0x248] sm:$0xff]  }
 0x567   : > { %4871 = vmatpush1.bf16.msra.mxu1 %v9526_v53  ;;  %v10559_v53 = vld [vmem:[#allocation6 + $0x208] sm:$0xff]  }
 0x568   : > { %4872 = vmatprep.subr.bf16.mxu1 %v9531_v14  ;;  %v10562_v14 = vld [vmem:[#allocation6 + $0x250] sm:$0xff]  }
 0x56b   : > { %4873 = vmatpush1.bf16.msra.mxu1 %v9529_v33  ;;  %v10565_v33 = vld [vmem:[#allocation6 + $0x210] sm:$0xff]  }
 0x56c   : > { %4874 = vmatprep.subr.bf16.mxu1 %v9534_v13  ;;  %v10568_v13 = vld [vmem:[#allocation6 + $0x258] sm:$0xff]  }
 0x56f   : > { %4875 = vmatpush1.bf16.msra.mxu1 %v9532_v36  ;;  %v10571_v36 = vld [vmem:[#allocation6 + $0x218] sm:$0xff]  }
 0x570   : > { %4876 = vmatprep.subr.bf16.mxu1 %v9537_v40  ;;  %v10577_v40 = vld [vmem:[#allocation6 + $0x220] sm:$0xff]  }
 0x571   : > { %11189 = vst [vmem:[#allocation20_spill] sm:$0xff] %v10577_v40 }
 0x573   : > { %4877 = vmatpush1.bf16.msra.mxu1 %v9535_v56  ;;  %v10580_v56 = vld [vmem:[#allocation6 + $0x268] sm:$0xff]  }
 0x574   : > { %4878 = vmatprep.subr.bf16.mxu1 %v9540_v57  ;;  %11190 = vst [vmem:[#allocation21_spill] sm:$0xff] %v10580_v56  ;;  %v10583_v57 = vld [vmem:[#allocation6 + $0x228] sm:$0xff]  }
 0x575   : > { %11191 = vst [vmem:[#allocation22_spill] sm:$0xff] %v10583_v57 }
 0x577   : > { %4879 = vmatpush1.bf16.msra.mxu1 %v9538_v3  ;;  %v10586_v3 = vld [vmem:[#allocation6 + $0x270] sm:$0xff]  }
 0x578   : > { %4880 = vmatprep.subr.bf16.mxu1 %v9543_v60  ;;  %11192 = vst [vmem:[#allocation23_spill] sm:$0xff] %v10586_v3 }
 0x57b   : > { %4881 = vmatpush1.bf16.msra.mxu1 %v9541_v63 }
 0x57c   : > { %4882 = vmatprep.subr.bf16.mxu1 %v9546_v17 }
 0x57f   : > { %4883 = vmatpush1.bf16.msra.mxu1 %v9544_v15 }
 0x580   : > { %4884 = vmatprep.subr.bf16.mxu1 %v9549_v16 }
 0x583   : > { %4885 = vmatpush1.bf16.msra.mxu1 %v9547_v1  ;;  %v10599_v1 = vld [vmem:[#allocation6 + $0x230] sm:$0xff]  }
 0x584   : > { %4886 = vmatprep.subr.bf16.mxu1 %v9552_v23  ;;  %11197 = vst [vmem:[#allocation28_spill] sm:$0xff] %v10599_v1 }
 0x587   : > { %4887 = vmatpush1.bf16.msra.mxu1 %v9550_v10 }
 0x588   : > { %4888 = vmatprep.subr.bf16.mxu1 %v9555_v28 }
 0x58b   : > { %4889 = vmatpush1.bf16.msra.mxu1 %v9553_v7 }
 0x58c   : > { %4890 = vmatprep.subr.bf16.mxu1 %v9558_v37  ;;  %v10606_v37 = vld [vmem:[#allocation6 + $0x278] sm:$0xff]  }
 0x58d   : > { %11198 = vst [vmem:[#allocation29_spill] sm:$0xff] %v10606_v37 }
 0x58f   : > { %4891 = vmatpush1.bf16.msra.mxu1 %v9556_v22 }
 0x590   : > { %4892 = vmatprep.subr.bf16.mxu1 %v9561_v27 }
 0x593   : > { %4893 = vmatpush1.bf16.msra.mxu1 %v9559_v43 }
 0x594   : > { %4894 = vmatprep.subr.bf16.mxu1 %v9564_v44 }
 0x597   : > { %4895 = vmatpush1.bf16.msra.mxu1 %v9562_v35 }
 0x598   : > { %4896 = vmatprep.subr.bf16.mxu1 %v9567_v46 }
 0x59b   : > { %4897 = vmatpush1.bf16.msra.mxu1 %v9565_v61 }
 0x59c   : > { %4898 = vmatprep.subr.bf16.mxu1 %v9570_v34 }
 0x59f   : > { %4899 = vmatpush1.bf16.msra.mxu1 %v9568_v5  ;;  %v10615_v5 = vld [vmem:[#allocation6 + $0x238] sm:$0xff]  }
 0x5a0   : > { %8191 = vmatprep.subr.bf16.mxu1 %v10550_v50  ;;  %11199 = vst [vmem:[#allocation30_spill] sm:$0xff] %v10615_v5 }
 0x5a2   : > { %4901 = vmatmul.mubr.bf16.vlgmr.msra.gmra.mrb[8].mxu1 %v10486_v39  ;;  %v10574_v39 = vld [vmem:[#allocation6 + $0x260] sm:$0xff]  }
 0x5a3   : > { %8192 = vmatpush3.bf16.msra.mxu1 %v10552_v24 }
 0x5a4   : > { %8193 = vmatprep.subr.bf16.mxu1 %v10555_v52 }
 0x5a7   : > { %8194 = vmatpush3.bf16.msra.mxu1 %v10559_v53 }
 0x5a8   : > { %8195 = vmatprep.subr.bf16.mxu1 %v10562_v14 }
 0x5ab   : > { %8196 = vmatpush3.bf16.msra.mxu1 %v10565_v33 }
 0x5ac   : > { %8197 = vmatprep.subr.bf16.mxu1 %v10568_v13 }
 0x5af   : > { %8198 = vmatpush3.bf16.msra.mxu1 %v10571_v36 }
 0x5b0   : > { %8199 = vmatprep.subr.bf16.mxu1 %v10574_v39 }
 0x5b3   : > { %8200 = vmatpush3.bf16.msra.mxu1 %v10577_v40 }
 0x5b4   : > { %8201 = vmatprep.subr.bf16.mxu1 %v10580_v56 }
 0x5b5   : > { %v10588_v60 = vpop.f32.mrb[4].mxu1 }
 0x5b6   : > { %11193 = vst [vmem:[#allocation24_spill] sm:$0xff] %v10588_v60  ;;  %v10590_v63 = vpop.f32.mrb[8].mxu0  ;;  %v10592_v17 = vpop.f32.mrb[5].mxu1 }
 0x5b7   : > { %11194 = vst [vmem:[#allocation25_spill] sm:$0xff] %v10590_v63  ;;  %11195 = vst [vmem:[#allocation26_spill] sm:$0xff] %v10592_v17  ;;  %v10594_v15 = vpop.f32.mrb[9].mxu0  ;;  %v10596_v16 = vpop.permute.xlu1 %5042  ;;  %8202 = vmatpush3.bf16.msra.mxu1 %v10583_v57 }
 0x5b8   : > { %11196 = vst [vmem:[#allocation27_spill] sm:$0xff] %v10594_v15  ;;  %v5045_v23 = vmul.f32 %v10596_v16, %v10416_v55  ;;  %v5046_v10 = vmul.f32 %v10596_v16, %v10414_v54  ;;  %v4660_v28 = vpop.f32.mrb[6].mxu1  ;;  %v4783_v7 = vpop.f32.mrb[10].mxu0  ;;  %8203 = vmatprep.subr.bf16.mxu1 %v10586_v3  ;;  %v5047_v22 = vmul.f32 %v10596_v16, %v10422_v41 }
 0x5b9   : > { %v5048_v27 = vmul.f32 %v10596_v16, %v10420_v59  ;;  %v4661_v43 = vpop.f32.mrb[7].mxu1  ;;  %v4784_v44 = vpop.f32.mrb[11].mxu0  ;;  %v5050_v7 = vmul.f32 %v10596_v16, %v10462_v19 }
 0x5ba   : > { %v5051_v35 = vrot.slane %v5045_v23, 4  ;;  %v5057_v46 = vrot.slane %v5046_v10, 4  ;;  %v5063_v61 = vrot.slane %v5047_v22, 4 }
 0x5bb   : > { %v10612_v34 = vpop.permute.xlu1 %5094  ;;  %8204 = vmatpush3.bf16.msra.mxu1 %v10599_v1  ;;  %v5069_v28 = vrot.slane %v5048_v27, 4  ;;  %v5081_v0 = vrot.slane %v5050_v7, 4 }
 0x5bc   : > { %v5052_v12 = vadd.f32 %v5051_v35, %v5045_v23  ;;  %8205 = vmatprep.subr.bf16.mxu1 %v10606_v37  ;;  %v5064_v58 = vadd.f32 %v5063_v61, %v5047_v22  ;;  %v5098_v43 = vmul.f32 %v10612_v34, %v10414_v54  ;;  %v5058_v44 = vadd.f32 %v5057_v46, %v5046_v10 }
 0x5bd   : > { %v5070_v8 = vadd.f32 %v5069_v28, %v5048_v27  ;;  %v5082_v35 = vadd.f32 %v5081_v0, %v5050_v7 }
 0x5be   : > { %v5053_v31 = vrot.slane %v5052_v12, 2  ;;  %v5065_v63 = vrot.slane %v5064_v58, 2  ;;  %v5059_v60 = vrot.slane %v5058_v44, 2  ;;  %v5109_v37 = vrot.slane %v5098_v43, 4 }
 0x5bf   : > { %8206 = vmatpush3.bf16.msra.mxu1 %v10615_v5  ;;  %v5071_v62 = vrot.slane %v5070_v8, 2  ;;  %v5083_v10 = vrot.slane %v5082_v35, 2 }
 0x5c0   : > { %8235 = vmatprep.subr.bf16.mxu1 %v10494_v38  ;;  %v5054_v1 = vadd.f32 %v5053_v31, %v5052_v12  ;;  %v5066_v3 = vadd.f32 %v5065_v63, %v5064_v58  ;;  %v5060_v23 = vadd.f32 %v5059_v60, %v5058_v44  ;;  %v5110_v46 = vadd.f32 %v5109_v37, %v5098_v43  ;;  %v10638_v60 = vld [vmem:[#allocation6 + $0x280] sm:$0xff]   ;;  %v10644_v37 = vld [vmem:[#allocation6 + $0x2c8] sm:$0xff]  }
 0x5c1   : > { %v5072_v22 = vadd.f32 %v5071_v62, %v5070_v8  ;;  %v5084_v40 = vadd.f32 %v5083_v10, %v5082_v35  ;;  %v5100_v44 = vmul.f32 %v10612_v34, %v10420_v59  ;;  %v10663_v59 = vld [vmem:[#allocation6 + $0x2d0] sm:$0xff]  }
 0x5c2   : > { %v5055_v61 = vrot.slane %v5054_v1, 1  ;;  %v5067_v57 = vrot.slane %v5066_v3, 1  ;;  %v5061_v54 = vrot.slane %v5060_v23, 1  ;;  %v5111_v15 = vrot.slane %v5110_v46, 2 }
 0x5c3   : > { %v5073_v5 = vrot.slane %v5072_v22, 1  ;;  %v5085_v0 = vrot.slane %v5084_v40, 1 }
 0x5c4   : > { %v5056_v27 = vadd.f32 %v5055_v61, %v5054_v1  ;;  %v5068_v28 = vadd.f32 %v5067_v57, %v5066_v3  ;;  %v5062_v56 = vadd.f32 %v5061_v54, %v5060_v23  ;;  %v5112_v62 = vadd.f32 %v5111_v15, %v5110_v46  ;;  %v10657_v23 = vld [vmem:[#allocation6 + $0x288] sm:$0xff]   ;;  %v10669_v54 = vld [vmem:[#allocation6 + $0x290] sm:$0xff]  }
 0x5c5   : > { %v5074_v38 = vadd.f32 %v5073_v5, %v5072_v22  ;;  %v5086_v63 = vadd.f32 %v5085_v0, %v5084_v40  ;;  %v5097_v5 = vmul.f32 %v10612_v34, %v10416_v55  ;;  %v5102_v40 = vmul.f32 %v10612_v34, %v10462_v19  ;;  %v10681_v0 = vld [vmem:[#allocation6 + $0x2e0] sm:$0xff]  }
 0x5c6   : > { %v10624_v17 = vmul.f32 0.125, %v5056_v27  ;;  %v10626_v31 = vmul.f32 0.125, %v5068_v28  ;;  %v10628_v58 = vmul.f32 0.125, %v5062_v56  ;;  %v5113_v1 = vrot.slane %v5112_v62, 1  ;;  %v10677_v28 = vld [vmem:[#allocation6 + $0x298] sm:$0xff]  }
 0x5c7   : > { %v10630_v8 = vmul.f32 0.125, %v5074_v38  ;;  %v5049_v56 = vmul.f32 %v10596_v16, %v10446_v4  ;;  %v10648_v7 = vmul.f32 0.125, %v5086_v63  ;;  %v5103_v22 = vrot.slane %v5097_v5, 4 }
 0x5c8   : > { %v5347_v12 = vpack.c.bf16 %v10624_v17, %v10624_v17  ;;  %v5348_v57 = vpack.c.bf16 %v10628_v58, %v10628_v58  ;;  %v5349_v3 = vpack.c.bf16 %v10626_v31, %v10626_v31  ;;  %v5114_v43 = vadd.f32 %v5113_v1, %v5112_v62 }
 0x5c9   : > { %v5350_v15 = vpack.c.bf16 %v10630_v8, %v10630_v8  ;;  %v5352_v16 = vpack.c.bf16 %v10648_v7, %v10648_v7  ;;  %v5075_v35 = vrot.slane %v5049_v56, 4  ;;  %v5121_v61 = vrot.slane %v5100_v44, 4 }
 0x5ca   : > { %5673 = vmatprep.mubr.bf16.mxu0 %v5348_v57  ;;  %v10659_v55 = vmul.f32 0.125, %v5114_v43  ;;  %v5133_v10 = vrot.slane %v5102_v40, 4  ;;  %v5104_v27 = vadd.f32 %v5103_v22, %v5097_v5 }
 0x5cb   : > { %5713 = vmatprep.mubr.bf16.mxu1 %v5350_v15  ;;  %5674 = vmatmul.mubr.bf16.vlgmr.msra.gmra.mrb[12].mxu0 %v5347_v12  ;;  %v5076_v46 = vadd.f32 %v5075_v35, %v5049_v56  ;;  %v10697_v15 = vld [vmem:[#allocation6 + $0x2f0] sm:$0xff]  }
 0x5cc   : > { %5714 = vmatmul.mubr.bf16.vlgmr.msra.gmra.mrb[12].mxu1 %v5349_v3  ;;  %8214 = vmatpush3.bf16.msra.mxu0 %v10638_v60  ;;  %v5762_v19 = vpack.c.bf16 %v10659_v55, %v10659_v55  ;;  %v5134_v38 = vadd.f32 %v5133_v10, %v5102_v40  ;;  %v5105_v62 = vrot.slane %v5104_v27, 2  ;;  %v10689_v3 = vld [vmem:[#allocation6 + $0x2e8] sm:$0xff]   ;;  %v10705_v40 = vld [vmem:[#allocation6 + $0x2f8] sm:$0xff]   ;;  %v5099_v10 = vmul.f32 %v10612_v34, %v10422_v41 }
 0x5cd   : > { %8236 = vmatpush3.bf16.msra.mxu1 %v10496_v45  ;;  %8215 = vmatprep.subr.bf16.mxu0 %v10644_v37  ;;  %v10673_v45 = vld [vmem:[#allocation6 + $0x2d8] sm:$0xff]  }
 0x5ce   : > { %5753 = vmatprep.mubr.bf16.mxu0 %v5352_v16  ;;  %8237 = vmatprep.subr.bf16.mxu1 %v10499_v47  ;;  %v5122_v47 = vadd.f32 %v5121_v61, %v5100_v44  ;;  %v5135_v57 = vrot.slane %v5134_v38, 2  ;;  %v5106_v63 = vadd.f32 %v5105_v62, %v5104_v27  ;;  %v11207_v62 = vld [vmem:[#allocation29_spill] sm:$0xff] }
 0x5cf   : > { %5799 = vmatprep.mubr.bf16.mxu1 %v5762_v19 }
 0x5d0   : > { %8216 = vmatpush3.bf16.msra.mxu0 %v10657_v23  ;;  %v5123_v12 = vrot.slane %v5122_v47, 2  ;;  %v5136_v56 = vadd.f32 %v5135_v57, %v5134_v38  ;;  %v5107_v5 = vrot.slane %v5106_v63, 1 }
 0x5d1   : > { %8238 = vmatpush3.bf16.msra.mxu1 %v10503_v49  ;;  %8217 = vmatprep.subr.bf16.mxu0 %v10663_v59  ;;  %v5077_v49 = vrot.slane %v5076_v46, 2 }
 0x5d2   : > { %8239 = vmatprep.subr.bf16.mxu1 %v10506_v51  ;;  %v10685_v51 = vld [vmem:[#allocation6 + $0x2a0] sm:$0xff]   ;;  %v5124_v1 = vadd.f32 %v5123_v12, %v5122_v47  ;;  %v5137_v44 = vrot.slane %v5136_v56, 1  ;;  %v5108_v16 = vadd.f32 %v5107_v5, %v5106_v63  ;;  %v11210_v63 = vld [vmem:[#allocation30_spill] sm:$0xff]  ;;  %v9623_v5 = vld [vmem:[#allocation6 + $0x48] sm:$0xff]  }
 0x5d4   : > { %8218 = vmatpush3.bf16.msra.mxu0 %v10669_v54  ;;  %v5125_v43 = vrot.slane %v5124_v1, 1  ;;  %v5138_v22 = vadd.f32 %v5137_v44, %v5136_v56 }
 0x5d5   : > { %8240 = vmatpush3.bf16.msra.mxu1 %v10509_v32  ;;  %8219 = vmatprep.subr.bf16.mxu0 %v10673_v45  ;;  %v5078_v32 = vadd.f32 %v5077_v49, %v5076_v46  ;;  %v11206_v49 = vld [vmem:[#allocation28_spill] sm:$0xff] }
 0x5d6   : > { %8241 = vmatprep.subr.bf16.mxu1 %v10513_v6  ;;  %v10693_v6 = vld [vmem:[#allocation6 + $0x2a8] sm:$0xff]   ;;  %v5126_v35 = vadd.f32 %v5125_v43, %v5124_v1  ;;  %v9621_v1 = vld [vmem:[#allocation6] sm:$0xff]  }
 0x5d8   : > { %8220 = vmatpush3.bf16.msra.mxu0 %v10677_v28  ;;  %v10718_v61 = vmul.f32 0.125, %v5126_v35  ;;  %v9628_v35 = vld [vmem:[#allocation6 + $0xd0] sm:$0xff]  }
 0x5d9   : > { %8242 = vmatpush3.bf16.msra.mxu1 %v10515_v9  ;;  %8221 = vmatprep.subr.bf16.mxu0 %v10681_v0  ;;  %v5079_v9 = vrot.slane %v5078_v32, 1 }
 0x5da   : > { %8243 = vmatprep.subr.bf16.mxu1 %v10519_v20  ;;  %v10701_v20 = vld [vmem:[#allocation6 + $0x2b0] sm:$0xff]   ;;  %v5764_v27 = vpack.c.bf16 %v10718_v61, %v10718_v61 }
 0x5dc   : > { %8222 = vmatpush3.bf16.msra.mxu0 %v10685_v51 }
 0x5dd   : > { %8244 = vmatpush3.bf16.msra.mxu1 %v10522_v21  ;;  %8223 = vmatprep.subr.bf16.mxu0 %v10689_v3  ;;  %v5080_v21 = vadd.f32 %v5079_v9, %v5078_v32 }
 0x5de   : > { %8245 = vmatprep.subr.bf16.mxu1 %v10525_v11  ;;  %v10709_v11 = vld [vmem:[#allocation6 + $0x2b8] sm:$0xff]  }
 0x5df   : > { %v10713_v19 = vmul.f32 0.125, %v5080_v21  ;;  %v9626_v21 = vld [vmem:[#allocation6 + $0x88] sm:$0xff]  }
 0x5e0   : > { %8224 = vmatpush3.bf16.msra.mxu0 %v10693_v6 }
 0x5e1   : > { %8246 = vmatpush3.bf16.msra.mxu1 %v10529_v25  ;;  %8225 = vmatprep.subr.bf16.mxu0 %v10697_v15  ;;  %v10716_v25 = vmul.f32 0.125, %v5108_v16  ;;  %v9627_v16 = vld [vmem:[#allocation6 + $0x50] sm:$0xff]  }
 0x5e2   : > { %8247 = vmatprep.subr.bf16.mxu1 %v10532_v26  ;;  %v10721_v26 = vmul.f32 0.125, %v5138_v22  ;;  %v9630_v22 = vld [vmem:[#allocation6 + $0x90] sm:$0xff]  }
 0x5e3   : > { %v5761_v46 = vpack.c.bf16 %v10716_v25, %v10716_v25 }
 0x5e4   : > { %8226 = vmatpush3.bf16.msra.mxu0 %v10701_v20  ;;  %v5766_v41 = vpack.c.bf16 %v10721_v26, %v10721_v26 }
 0x5e5   : > { %8248 = vmatpush3.bf16.msra.mxu1 %v10535_v48  ;;  %8227 = vmatprep.subr.bf16.mxu0 %v10705_v40  ;;  %v5351_v48 = vpack.c.bf16 %v10713_v19, %v10713_v19 }
 0x5e6   : > { %8249 = vmatprep.subr.bf16.mxu1 %v10538_v29  ;;  %v5101_v29 = vmul.f32 %v10612_v34, %v10446_v4 }
 0x5e8   : > { %8228 = vmatpush3.bf16.msra.mxu0 %v10709_v11  ;;  %v5127_v4 = vrot.slane %v5101_v29, 4 }
 0x5e9   : > { %8250 = vmatpush3.bf16.msra.mxu1 %v10541_v18  ;;  %8257 = vmatprep.subr.bf16.mxu0 %v10550_v50  ;;  %v5115_v18 = vrot.slane %v5099_v10, 4  ;;  %v3066_v50 = vld [vmem:[#allocation4 + $0x3] ss:$8 sm:$0xf] }
 0x5ea   : > { %8279 = vmatprep.subr.bf16.mxu1 %v10544_v42  ;;  %v3067_v42 = vld [vmem:[#allocation4 + $0x3] ss:$8 sm:$0x30]  ;;  %v5128_v47 = vadd.f32 %v5127_v4, %v5101_v29  ;;  %v11211_v29 = vld [vmem:[#allocation16_spill] sm:$0xff] }
 0x5eb   : > { %5754 = vmatmul.mubr.bf16.vlgmr.msra.gmra.mrb[16].mxu0 %v5351_v48  ;;  %v5116_v34 = vadd.f32 %v5115_v18, %v5099_v10  ;;  %v9631_v10 = vld [vmem:[#allocation6 + $0x58] sm:$0xff]  }
 0x5ec   : > { %5800 = vmatmul.mubr.bf16.vlgmr.msra.gmra.mrb[16].mxu1 %v5761_v46  ;;  %8258 = vmatpush3.bf16.msra.mxu0 %v10552_v24  ;;  %v10745_v24 = vor.u32 %v3067_v42, %v3066_v50  ;;  %v9632_v48 = vld [vmem:[#allocation6 + $0xd8] sm:$0xff]   ;;  %v9635_v50 = vld [vmem:[#allocation6 + $0x60] sm:$0xff]  }
 0x5ed   : > { %5839 = vmatprep.mubr.bf16.mxu0 %v5764_v27  ;;  %8280 = vmatpush3.bf16.msra.mxu1 %v10638_v60  ;;  %v5129_v60 = vrot.slane %v5128_v47, 2  ;;  %v9633_v27 = vld [vmem:[#allocation6 + $0x18] sm:$0xff]   ;;  %v9636_v42 = vld [vmem:[#allocation6 + $0xe0] sm:$0xff]  }
 0x5ee   : > { %5879 = vmatprep.mubr.bf16.mxu1 %v5766_v41  ;;  %8259 = vmatprep.subr.bf16.mxu0 %v10555_v52  ;;  %v5117_v52 = vrot.slane %v5116_v34, 2  ;;  %v4513_v46 = vrot.slane %v10745_v24, %v11211_v29  ;;  %v11212_v41 = vld [vmem:[#allocation17_spill] sm:$0xff]  ;;  %v9634_v4 = vld [vmem:[#allocation6 + $0x98] sm:$0xff]  }
 0x5ef   : > { %8281 = vmatprep.subr.bf16.mxu1 %v10644_v37  ;;  %v11200_v37 = vld [vmem:[#allocation26_spill] sm:$0xff]  ;;  %v4521_v18 = vrot.slane %v10745_v24, %v11212_v41 }
 0x5f0   : > { %8260 = vmatpush3.bf16.msra.mxu0 %v10559_v53  ;;  %v4517_v53 = vrot.slane %v10745_v24, %v10275_v30 }
 0x5f1   : > { %8282 = vmatpush3.bf16.msra.mxu1 %v10657_v23  ;;  %8261 = vmatprep.subr.bf16.mxu0 %v10562_v14  ;;  %v4525_v14 = vrot.slane %v10745_v24, %v10283_v2 }
 0x5f2   : > { %8283 = vmatprep.subr.bf16.mxu1 %v10663_v59  ;;  %v8564_v23 = vadd.f32 %v11200_v37, %v4517_v53  ;;  %v11201_v59 = vld [vmem:[#allocation27_spill] sm:$0xff]  ;;  %v11214_v53 = vld [vmem:[#allocation25_spill] sm:$0xff]  ;;  %v9640_v37 = vld [vmem:[#allocation6 + $0xe8] sm:$0xff]  }
 0x5f3   : > { %v8566_v30 = vadd.f32 %v11201_v59, %v4525_v14  ;;  %v9638_v14 = vld [vmem:[#allocation6 + $0xa0] sm:$0xff]   ;;  %v9643_v59 = vld [vmem:[#allocation6 + $0x70] sm:$0xff]  }
 0x5f4   : > { %8262 = vmatpush3.bf16.msra.mxu0 %v10565_v33  ;;  %v5118_v33 = vadd.f32 %v5117_v52, %v5116_v34  ;;  %9749 = vtanh.f32 %v8564_v23  ;;  %v11213_v34 = vld [vmem:[#allocation24_spill] sm:$0xff]  ;;  %v9637_v52 = vld [vmem:[#allocation6 + $0x20] sm:$0xff]  }
 0x5f5   : > { %8284 = vmatpush3.bf16.msra.mxu1 %v10669_v54  ;;  %8263 = vmatprep.subr.bf16.mxu0 %v10568_v13  ;;  %v5130_v13 = vadd.f32 %v5129_v60, %v5128_v47  ;;  %v11202_v54 = vld [vmem:[#allocation20_spill] sm:$0xff]  ;;  %9751 = vtanh.f32 %v8566_v30  ;;  %v8563_v47 = vadd.f32 %v11213_v34, %v4513_v46  ;;  %v8565_v60 = vadd.f32 %v11214_v53, %v4521_v18  ;;  %v9644_v30 = vld [vmem:[#allocation6 + $0xf0] sm:$0xff]  }
 0x5f6   : > { %8285 = vmatprep.subr.bf16.mxu1 %v10673_v45  ;;  %v11203_v45 = vld [vmem:[#allocation21_spill] sm:$0xff]  ;;  %v5119_v2 = vrot.slane %v5118_v33, 1  ;;  %v9641_v23 = vld [vmem:[#allocation6 + $0x28] sm:$0xff]  }
 0x5f7   : > { %9753 = vtanh.f32 %v8563_v47 }
 0x5f8   : > { %8264 = vmatpush3.bf16.msra.mxu0 %v10571_v36  ;;  %v5131_v36 = vrot.slane %v5130_v13, 1  ;;  %v5120_v38 = vadd.f32 %v5119_v2, %v5118_v33  ;;  %v9639_v33 = vld [vmem:[#allocation6 + $0x68] sm:$0xff]   ;;  %9755 = vtanh.f32 %v8565_v60  ;;  %v9647_v2 = vld [vmem:[#allocation6 + $0x78] sm:$0xff]  }
 0x5f9   : > { %8286 = vmatpush3.bf16.msra.mxu1 %v10677_v28  ;;  %8265 = vmatprep.subr.bf16.mxu0 %v10574_v39  ;;  %v11204_v39 = vld [vmem:[#allocation22_spill] sm:$0xff]  ;;  %v11205_v28 = vld [vmem:[#allocation23_spill] sm:$0xff] }
 0x5fa   : > { %8287 = vmatprep.subr.bf16.mxu1 %v10681_v0  ;;  %v5132_v0 = vadd.f32 %v5131_v36, %v5130_v13  ;;  %v10773_v12 = vmul.f32 0.125, %v5120_v38  ;;  %v9642_v13 = vld [vmem:[#allocation6 + $0xa8] sm:$0xff]   ;;  %v9648_v36 = vld [vmem:[#allocation6 + $0xf8] sm:$0xff]   ;;  %v9651_v38 = vld [vmem:[#allocation6 + $0x140] sm:$0xff]  }
 0x5fc   : > { %8266 = vmatpush3.bf16.msra.mxu0 %v11202_v54  ;;  %11208 = vst [vmem:[#allocation26_spill] sm:$0xff] %v10773_v12  ;;  %v10776_v57 = vmul.f32 0.125, %v5132_v0  ;;  %v5763_v56 = vpack.c.bf16 %v10773_v12, %v10773_v12  ;;  %v9645_v54 = vld [vmem:[#allocation6 + $0x30] sm:$0xff]  }
 0x5fd   : > { %8288 = vmatpush3.bf16.msra.mxu1 %v10685_v51  ;;  %8267 = vmatprep.subr.bf16.mxu0 %v11203_v45  ;;  %v9619_v51 = vld [vmem:[#allocation6 + $0x40] sm:$0xff]   ;;  %v9646_v45 = vld [vmem:[#allocation6 + $0xb0] sm:$0xff]  }
 0x5fe   : > { %8289 = vmatprep.subr.bf16.mxu1 %v10689_v3  ;;  %11209 = vst [vmem:[#allocation27_spill] sm:$0xff] %v10776_v57  ;;  %v9620_v3 = vld [vmem:[#allocation6 + $0xc0] sm:$0xff]   ;;  %v10778_v32 = vpop.eup %9749  ;;  %v5765_v9 = vpack.c.bf16 %v10776_v57, %v10776_v57 }
 0x5ff   : > { %v5342_v43 = vpack.c.bf16 %v10778_v32, %v10778_v32 }
 0x600   : > { %8268 = vmatpush3.bf16.msra.mxu0 %v11204_v39  ;;  %v9649_v39 = vld [vmem:[#allocation6 + $0x38] sm:$0xff]  }
 0x601   : > { %8290 = vmatpush3.bf16.msra.mxu1 %v10693_v6  ;;  %8269 = vmatprep.subr.bf16.mxu0 %v11205_v28  ;;  %v10781_v6 = vpop.eup %9751  ;;  %v9650_v28 = vld [vmem:[#allocation6 + $0xb8] sm:$0xff]  }
 0x602   : > { %8291 = vmatprep.subr.bf16.mxu1 %v10697_v15  ;;  %v9622_v15 = vld [vmem:[#allocation6 + $0x80] sm:$0xff]   ;;  %v5344_v44 = vpack.c.bf16 %v10781_v6, %v10781_v6  ;;  %v10798_v0 = vpop.eup %9753 }
 0x604   : > { %8270 = vmatpush3.bf16.msra.mxu0 %v11206_v49  ;;  %v10800_v49 = vpop.eup %9755 }
 0x605   : > { %8292 = vmatpush3.bf16.msra.mxu1 %v10701_v20  ;;  %8271 = vmatprep.subr.bf16.mxu0 %v11207_v62  ;;  %v9624_v20 = vld [vmem:[#allocation6 + $0xc8] sm:$0xff]   ;;  %11215 = vst [vmem:[#allocation20_spill] sm:$0xff] %v10800_v49  ;;  %v9652_v62 = vld [vmem:[#allocation6 + $0x100] sm:$0xff]  }
 0x606   : > { %8293 = vmatprep.subr.bf16.mxu1 %v10705_v40  ;;  %v9625_v40 = vld [vmem:[#allocation6 + $0x8] sm:$0xff]  }
 0x608   : > { %8272 = vmatpush3.bf16.msra.mxu0 %v11210_v63  ;;  %v5343_v63 = vpack.c.bf16 %v10800_v49, %v10800_v49 }
 0x609   : > { %8294 = vmatpush3.bf16.msra.mxu1 %v10709_v11  ;;  %8301 = vmatprep.subr.bf16.mxu0 %v9619_v51  ;;  %v9629_v11 = vld [vmem:[#allocation6 + $0x10] sm:$0xff]   ;;  %v5341_v51 = vpack.c.bf16 %v10798_v0, %v10798_v0 }
 0x60a   : > { %8323 = vmatprep.subr.bf16.mxu1 %v9620_v3  ;;  %v9653_v3 = vld [vmem:[#allocation6 + $0x148] sm:$0xff]  }
 0x60b   : > { %5840 = vmatmul.mubr.bf16.vlgmr.msra.gmra.mrb[20].mxu0 %v5763_v56  ;;  %v9655_v56 = vld [vmem:[#allocation6 + $0x150] sm:$0xff]  }
 0x60c   : > { %5880 = vmatmul.mubr.bf16.vlgmr.msra.gmra.mrb[20].mxu1 %v5765_v9  ;;  %8302 = vmatpush3.bf16.msra.mxu0 %v9621_v1  ;;  %v9654_v1 = vld [vmem:[#allocation6 + $0x108] sm:$0xff]   ;;  %v9657_v9 = vld [vmem:[#allocation6 + $0x158] sm:$0xff]  }
 0x60d   : > { %6208 = vmatprep.mubr.bf16.mxu0 %v5342_v43  ;;  %8324 = vmatpush3.bf16.msra.mxu1 %v9622_v15  ;;  %v9656_v15 = vld [vmem:[#allocation6 + $0x110] sm:$0xff]   ;;  %v9659_v43 = vld [vmem:[#allocation6 + $0x160] sm:$0xff]  }
 0x60e   : > { %6248 = vmatprep.mubr.bf16.mxu1 %v5344_v44  ;;  %8303 = vmatprep.subr.bf16.mxu0 %v9623_v5  ;;  %v9658_v5 = vld [vmem:[#allocation6 + $0x118] sm:$0xff]   ;;  %v9661_v44 = vld [vmem:[#allocation6 + $0x168] sm:$0xff]  }
 0x60f   : > { %8325 = vmatprep.subr.bf16.mxu1 %v9624_v20  ;;  %v9660_v20 = vld [vmem:[#allocation6 + $0x120] sm:$0xff]  }
 0x610   : > { %8304 = vmatpush3.bf16.msra.mxu0 %v9625_v40  ;;  %v9662_v40 = vld [vmem:[#allocation6 + $0x128] sm:$0xff]  }
 0x611   : > { %8326 = vmatpush3.bf16.msra.mxu1 %v9626_v21  ;;  %8305 = vmatprep.subr.bf16.mxu0 %v9627_v16  ;;  %v9663_v21 = vld [vmem:[#allocation6 + $0x170] sm:$0xff]  }
 0x612   : > { %8327 = vmatprep.subr.bf16.mxu1 %v9628_v35  ;;  %v9664_v16 = vld [vmem:[#allocation6 + $0x130] sm:$0xff]   ;;  %v9665_v35 = vld [vmem:[#allocation6 + $0x178] sm:$0xff]  }
 0x614   : > { %8306 = vmatpush3.bf16.msra.mxu0 %v9629_v11  ;;  %v9666_v11 = vld [vmem:[#allocation6 + $0x138] sm:$0xff]  }
 0x615   : > { %8328 = vmatpush3.bf16.msra.mxu1 %v9630_v22  ;;  %8307 = vmatprep.subr.bf16.mxu0 %v9631_v10  ;;  %v11216_v22 = vld [vmem:[#allocation18_spill] sm:$0xff] }
 0x616   : > { %8329 = vmatprep.subr.bf16.mxu1 %v9632_v48  ;;  %v4529_v10 = vrot.slane %v10745_v24, %v11216_v22  ;;  %v11217_v48 = vld [vmem:[#allocation19_spill] sm:$0xff] }
 0x617   : > { %v4533_v29 = vrot.slane %v10745_v24, %v11217_v48 }
 0x618   : > { %8308 = vmatpush3.bf16.msra.mxu0 %v9633_v27 }
 0x619   : > { %8330 = vmatpush3.bf16.msra.mxu1 %v9634_v4  ;;  %8309 = vmatprep.subr.bf16.mxu0 %v9635_v50 }
 0x61a   : > { %8331 = vmatprep.subr.bf16.mxu1 %v9636_v42 }
 0x61c   : > { %8310 = vmatpush3.bf16.msra.mxu0 %v9637_v52 }
 0x61d   : > { %8332 = vmatpush3.bf16.msra.mxu1 %v9638_v14  ;;  %8311 = vmatprep.subr.bf16.mxu0 %v9639_v33 }
 0x61e   : > { %8333 = vmatprep.subr.bf16.mxu1 %v9640_v37 }
 0x620   : > { %8312 = vmatpush3.bf16.msra.mxu0 %v9641_v23 }
 0x621   : > { %8334 = vmatpush3.bf16.msra.mxu1 %v9642_v13  ;;  %8313 = vmatprep.subr.bf16.mxu0 %v9643_v59 }
 0x622   : > { %8335 = vmatprep.subr.bf16.mxu1 %v9644_v30 }
 0x624   : > { %8314 = vmatpush3.bf16.msra.mxu0 %v9645_v54 }
 0x625   : > { %8336 = vmatpush3.bf16.msra.mxu1 %v9646_v45  ;;  %8315 = vmatprep.subr.bf16.mxu0 %v9647_v2 }
 0x626   : > { %8337 = vmatprep.subr.bf16.mxu1 %v9648_v36 }
 0x628   : > { %8316 = vmatpush3.bf16.msra.mxu0 %v9649_v39 }
 0x629   : > { %8338 = vmatpush3.bf16.msra.mxu1 %v9650_v28  ;;  %8345 = vmatprep.subr.bf16.mxu0 %v9651_v38 }
 0x62b   : > { %6209 = vmatmul.mubr.bf16.vlgmr.msra.gmra.mrb[24].mxu0 %v5341_v51 }
 0x62c   : > { %6249 = vmatmul.mubr.bf16.vlgmr.msra.gmra.mrb[24].mxu1 %v5343_v63  ;;  %8346 = vmatpush3.bf16.msra.mxu0 %v9652_v62 }
 0x62d   : > { %8347 = vmatprep.subr.bf16.mxu0 %v9653_v3 }
 0x630   : > { %8348 = vmatpush3.bf16.msra.mxu0 %v9654_v1 }
 0x631   : > { %8349 = vmatprep.subr.bf16.mxu0 %v9655_v56 }
 0x634   : > { %8350 = vmatpush3.bf16.msra.mxu0 %v9656_v15  ;;  %v11218_v15 = vlaneseq }
 0x635   : > { %8351 = vmatprep.subr.bf16.mxu0 %v9657_v9 }
 0x636   : > { %v10819_v9 = vand.u32 127, %v11218_v15 }
 0x638   : > { %8352 = vmatpush3.bf16.msra.mxu0 %v9658_v5  ;;  %11219 = vst [vmem:[#allocation21_spill] sm:$0xff] %v10819_v9  ;;  %vm5148_vm2 = vcmp.lt.s32.totalorder %v10819_v9, 64 }
 0x639   : > { %8353 = vmatprep.subr.bf16.mxu0 %v9659_v43 }
 0x63c   : > { %8354 = vmatpush3.bf16.msra.mxu0 %v9660_v20 }
 0x63d   : > { %8355 = vmatprep.subr.bf16.mxu0 %v9661_v44 }
 0x640   : > { %8356 = vmatpush3.bf16.msra.mxu0 %v9662_v40 }
 0x641   : > { %8357 = vmatprep.subr.bf16.mxu0 %v9663_v21 }
 0x644   : > { %8358 = vmatpush3.bf16.msra.mxu0 %v9664_v16 }
 0x645   : > { %8359 = vmatprep.subr.bf16.mxu0 %v9665_v35 }
 0x648   : > { %8360 = vmatpush3.bf16.msra.mxu0 %v9666_v11 }
 0x675   : > { %v4902_v46 = vpop.f32.mrb[8].mxu1 }
 0x676   : > { %v8567_v27 = vadd.f32 %v4902_v46, %v4529_v10  ;;  %v4904_v41 = vpop.f32.mrb[9].mxu1 }
 0x677   : > { %v8568_v18 = vadd.f32 %v4904_v41, %v4533_v29  ;;  %v4906_v4 = vpop.f32.mrb[10].mxu1 }
 0x678   : > { %9757 = vtanh.f32 %v8567_v27  ;;  %v4907_v50 = vpop.f32.mrb[11].mxu1 }
 0x679   : > { %9759 = vtanh.f32 %v8568_v18 }
 0x682   : > { %v10810_v42 = vpop.eup %9757 }
 0x683   : > { %v10812_v34 = vpop.eup %9759  ;;  %v5345_v52 = vpack.c.bf16 %v10810_v42, %v10810_v42 }
 0x684   : > { %v5346_v47 = vpack.c.bf16 %v10812_v34, %v10812_v34 }
 0x686   : > { %6288 = vmatprep.mubr.bf16.mxu0 %v5346_v47 }
 0x687   : > { %6289 = vmatmul.mubr.bf16.vlgmr.msra.gmra.mrb[28].mxu0 %v5345_v52 }
 0x69e   : > { %v8185_v24 = vpop.f32.mrb[12].mxu0 }
 0x69f   : > { %v8207_v53 = vpop.f32.mrb[12].mxu1  ;;  %v8186_v60 = vpop.f32.mrb[13].mxu0 }
 0x6a0   : > { %v8187_v14 = vadd.f32 %v8186_v60, %v8185_v24  ;;  %v8208_v33 = vpop.f32.mrb[13].mxu1  ;;  %v8188_v37 = vpop.f32.mrb[14].mxu0 }
 0x6a1   : > { %v8209_v23 = vadd.f32 %v8208_v33, %v8207_v53  ;;  %v8210_v13 = vpop.f32.mrb[14].mxu1  ;;  %v8189_v59 = vpop.f32.mrb[15].mxu0 }
 0x6a2   : > { %v8211_v30 = vpop.f32.mrb[15].mxu1  ;;  %v10824_v13 = vld [vmem:[#allocation10] sm:$0xff] }
 0x6a3   : > { %v5716_v54 = vadd.f32 %v8209_v23, %v8187_v14  ;;  %11220 = vst [vmem:[#allocation22_spill] sm:$0xff] %v10824_v13 }
 0x6be   : > { %v8229_v45 = vpop.f32.mrb[16].mxu0 }
 0x6bf   : > { %v8251_v2 = vpop.f32.mrb[16].mxu1  ;;  %v8230_v36 = vpop.f32.mrb[17].mxu0 }
 0x6c0   : > { %v8231_v39 = vadd.f32 %v8230_v36, %v8229_v45  ;;  %v8252_v28 = vpop.f32.mrb[17].mxu1  ;;  %v8232_v38 = vpop.f32.mrb[18].mxu0 }
 0x6c1   : > { %v8253_v62 = vadd.f32 %v8252_v28, %v8251_v2  ;;  %v8254_v51 = vpop.f32.mrb[18].mxu1  ;;  %v8233_v3 = vpop.f32.mrb[19].mxu0 }
 0x6c2   : > { %v5756_v63 = vadd.f32 %v8231_v39, %v5716_v54  ;;  %v8255_v1 = vpop.f32.mrb[19].mxu1 }
 0x6c3   : > { %v11161_v1 = vmov 0.0  }
 0x6c4   : > { %8517 = vmatprep.subr.bf16.mxu1 %v11161_v1  ;;  %8533 = vmatprep.mubr.msk.bf16.mxu1 %vm9981_vm5, %v11161_v1 }
 0x6de   : > { %v8273_v56 = vpop.f32.mrb[20].mxu0 }
 0x6df   : > { %v8295_v5 = vpop.f32.mrb[20].mxu1  ;;  %v8274_v43 = vpop.f32.mrb[21].mxu0 }
 0x6e0   : > { %v8275_v20 = vadd.f32 %v8274_v43, %v8273_v56  ;;  %v8296_v44 = vpop.f32.mrb[21].mxu1  ;;  %v8276_v40 = vpop.f32.mrb[22].mxu0 }
 0x6e1   : > { %v8297_v21 = vadd.f32 %v8296_v44, %v8295_v5  ;;  %v8298_v16 = vpop.f32.mrb[22].mxu1  ;;  %v8277_v35 = vpop.f32.mrb[23].mxu0 }
 0x6e2   : > { %v5842_v11 = vadd.f32 %v8275_v20, %v8253_v62  ;;  %v8299_v22 = vpop.f32.mrb[23].mxu1 }
 0x6e3   : > { %v9669_v22 = vld [vmem:[%s11140_s5 + $0x10] sm:$0xff]  }
 0x6e4   : > { %v5882_v10 = vadd.f32 %v8297_v21, %v5842_v11  ;;  %v9668_v11 = vld [vmem:[%s11140_s5 + $0x8] sm:$0xff]  }
 0x6e6   : > { %v5887_v48 = vsel %vm5148_vm2, %v5756_v63, %v5882_v10  ;;  %v9667_v63 = vld [vmem:[%s11140_s5] sm:$0xff]   ;;  %v9670_v10 = vld [vmem:[%s11140_s5 + $0x18] sm:$0xff]  }
 0x6e7   : > { %8518 = vmatpush3.bf16.msra.mxu1 %v9667_v63  ;;  %v10915_v63 = vld [vmem:[#allocation7 + $0xd8] sm:$0xff]  }
 0x6e8   : > { %8519 = vmatprep.subr.bf16.mxu1 %v11161_v1 }
 0x6eb   : > { %8520 = vmatpush3.bf16.msra.mxu1 %v9668_v11  ;;  %v6401_v11 = vrot.slane %v10824_v13, 3 }
 0x6ec   : > { %8521 = vmatprep.subr.bf16.mxu1 %v11161_v1 }
 0x6ef   : > { %8522 = vmatpush3.bf16.msra.mxu1 %v9669_v22 }
 0x6f0   : > { %8523 = vmatprep.subr.bf16.mxu1 %v11161_v1 }
 0x6f3   : > { %8524 = vmatpush3.bf16.msra.mxu1 %v9670_v10 }
 0x6f4   : > { %8525 = vmatprep.subr.bf16.mxu1 %v11161_v1 }
 0x6fe   : > { %v8317_v29 = vpop.f32.mrb[24].mxu0 }
 0x6ff   : > { %v8339_v46 = vpop.f32.mrb[24].mxu1  ;;  %v8318_v27 = vpop.f32.mrb[25].mxu0 }
 0x700   : > { %v8319_v41 = vadd.f32 %v8318_v27, %v8317_v29  ;;  %v8340_v18 = vpop.f32.mrb[25].mxu1  ;;  %v8320_v4 = vpop.f32.mrb[26].mxu0  ;;  %v9672_v29 = vld [vmem:[%s11140_s5 + $0x28] sm:$0xff]   ;;  %v9674_v27 = vld [vmem:[%s11140_s5 + $0x38] sm:$0xff]  }
 0x701   : > { %v8341_v50 = vadd.f32 %v8340_v18, %v8339_v46  ;;  %v8342_v47 = vpop.f32.mrb[26].mxu1  ;;  %v8321_v52 = vpop.f32.mrb[27].mxu0  ;;  %v9673_v46 = vld [vmem:[%s11140_s5 + $0x30] sm:$0xff]  }
 0x702   : > { %v6211_v24 = vadd.f32 %v8319_v41, %v5887_v48  ;;  %v8343_v53 = vpop.f32.mrb[27].mxu1  ;;  %v9671_v48 = vld [vmem:[%s11140_s5 + $0x20] sm:$0xff]   ;;  %v6330_v52 = vrot.slane %v10824_v13, 1 }
 0x703   : > { %8526 = vmatpush3.bf16.msra.mxu1 %v9671_v48 }
 0x704   : > { %v6251_v60 = vadd.f32 %v8341_v50, %v6211_v24  ;;  %8527 = vmatprep.subr.bf16.mxu1 %v11161_v1 }
 0x707   : > { %8528 = vmatpush3.bf16.msra.mxu1 %v9672_v29 }
 0x708   : > { %8529 = vmatprep.subr.bf16.mxu1 %v11161_v1 }
 0x70b   : > { %8530 = vmatpush3.bf16.msra.mxu1 %v9673_v46 }
 0x70c   : > { %8531 = vmatprep.subr.bf16.mxu1 %v11161_v1 }
 0x70f   : > { %8532 = vmatpush3.bf16.msra.mxu1 %v9674_v27 }
 0x75a   : > { %v8361_v14 = vpop.f32.mrb[28].mxu0 }
 0x75b   : > { %v8362_v33 = vpop.f32.mrb[29].mxu0 }
 0x75c   : > { %v8363_v37 = vadd.f32 %v8362_v33, %v8361_v14  ;;  %v8364_v23 = vpop.f32.mrb[30].mxu0 }
 0x75d   : > { %v8365_v59 = vpop.f32.mrb[31].mxu0  ;;  %v10879_v23 = vld [vmem:[#allocation7 + $0x40] sm:$0xff]  }
 0x75e   : > { %v6291_v30 = vadd.f32 %v8363_v37, %v6251_v60  ;;  %v6333_v60 = vrot.slane %v10824_v13, 2  ;;  %v10881_v59 = vld [vmem:[#allocation7 + $0xc0] sm:$0xff]   ;;  %8376 = vmatprep.subr.bf16.mxu0 %v10879_v23 }
 0x75f   : > { %8398 = vmatprep.subr.bf16.mxu1 %v10881_v59 }
 0x760   : > { %v6296_v54 = vadd.f32 %v6291_v30, %v10824_v13  ;;  %v10883_v30 = vld [vmem:[#allocation7] sm:$0xff]  }
 0x761   : > { %8377 = vmatpush3.bf16.msra.mxu0 %v10883_v30 }
 0x762   : > { %v6298_v45 = vmin.f32 %v6296_v54, 0.0  ;;  %vm6297_vm3 = vcmp.gt.f32.partialorder %v6296_v54, 0.0 }
 0x764   : > { %v6299_v2 = vmul.f32 1.442695, %v6298_v45  ;;  %v10887_v45 = vld [vmem:[#allocation7 + $0x48] sm:$0xff]  }
 0x765   : > { %8378 = vmatprep.subr.bf16.mxu0 %v10887_v45 }
 0x766   : > { %9761 = vpow2.f32 %v6299_v2  ;;  %v10889_v2 = vld [vmem:[#allocation7 + $0xc8] sm:$0xff]  }
 0x770   : > { %v9762_v36 = vpop.eup %9761 }
 0x771   : > { %v8100_v39 = vadd.f32 -1.0, %v9762_v36  ;;  %v10895_v36 = vld [vmem:[#allocation7 + $0x8] sm:$0xff]  }
 0x772   : > { %8379 = vmatpush3.bf16.msra.mxu0 %v10895_v36 }
 0x773   : > { %v6302_v28 = vsel %vm6297_vm3, %v6296_v54, %v8100_v39  ;;  %v10885_v54 = vld [vmem:[#allocation7 + $0x80] sm:$0xff]   ;;  %v10897_v39 = vld [vmem:[#allocation7 + $0x88] sm:$0xff]  }
 0x774   : > { %v6308_v38 = vsel %vm5148_vm2, 0.0, %v6302_v28  ;;  %v6303_v62 = vsel %vm5148_vm2, %v6302_v28, 0.0 }
 0x775   : > { %v6309_v51 = vsel %vm6304_vm4, %v6308_v38, 0.0  ;;  %v6305_v3 = vsel %vm6304_vm4, %v6303_v62, 0.0  ;;  %v10903_v38 = vld [vmem:[#allocation7 + $0xd0] sm:$0xff]  }
 0x776   : > { %6310 = vadd.xlane.f32.xlu0 %v6309_v51  ;;  %6306 = vadd.xlane.f32.xlu1 %v6305_v3  ;;  %v10907_v62 = vld [vmem:[#allocation7 + $0x10] sm:$0xff]   ;;  %v10913_v3 = vld [vmem:[#allocation7 + $0x58] sm:$0xff]  }
 0x777   : > { %v10909_v51 = vld [vmem:[#allocation7 + $0x90] sm:$0xff]  }
 0x803   : > { %v6311_v56 = vpop.xlane.xlu0 %6310  ;;  %v6307_v15 = vpop.xlane.xlu1 %6306 }
 0x804   : > { %v6312_v5 = vsel %vm5148_vm2, %v6307_v15, %v6311_v56  ;;  %v10919_v56 = vld [vmem:[#allocation7 + $0x18] sm:$0xff]  }
 0x805   : > { %v6313_v43 = vmul.f32 0.015625, %v6312_v5  ;;  %v10921_v15 = vld [vmem:[#allocation7 + $0x98] sm:$0xff]   ;;  %v10925_v5 = vld [vmem:[#allocation7 + $0x60] sm:$0xff]  }
 0x807   : > { %v6314_v20 = vsub.f32 %v6302_v28, %v6313_v43  ;;  %v10901_v28 = vld [vmem:[#allocation7 + $0x50] sm:$0xff]   ;;  %v10927_v43 = vld [vmem:[#allocation7 + $0xe0] sm:$0xff]  }
 0x808   : > { %8380 = vmatprep.subr.bf16.mxu0 %v10901_v28 }
 0x809   : > { %v6315_v44 = vmul.f32 %v6314_v20, %v6314_v20  ;;  %8381 = vmatpush3.bf16.msra.mxu0 %v10907_v62 }
 0x80a   : > { %8382 = vmatprep.subr.bf16.mxu0 %v10913_v3 }
 0x80b   : > { %v6316_v40 = vsel %vm5148_vm2, %v6315_v44, 0.0  ;;  %v6320_v16 = vsel %vm5148_vm2, 0.0, %v6315_v44  ;;  %v10933_v44 = vld [vmem:[#allocation7 + $0xa0] sm:$0xff]  }
 0x80c   : > { %v6317_v21 = vsel %vm6304_vm4, %v6316_v40, 0.0  ;;  %v6321_v35 = vsel %vm6304_vm4, %v6320_v16, 0.0  ;;  %v10937_v40 = vld [vmem:[#allocation7 + $0x68] sm:$0xff]  }
 0x80d   : > { %6318 = vadd.xlane.f32.xlu1 %v6317_v21  ;;  %8383 = vmatpush3.bf16.msra.mxu0 %v10919_v56  ;;  %v10939_v21 = vld [vmem:[#allocation7 + $0xe8] sm:$0xff]  }
 0x80e   : > { %8384 = vmatprep.subr.bf16.mxu0 %v10925_v5  ;;  %v10943_v16 = vld [vmem:[#allocation7 + $0x28] sm:$0xff]  }
 0x811   : > { %6322 = vadd.xlane.f32.xlu1 %v6321_v35  ;;  %v10945_v35 = vld [vmem:[#allocation7 + $0xa8] sm:$0xff]  }
 0x89a   : > { %v6319_v41 = vpop.xlane.xlu1 %6318 }
 0x89e   : > { %v6323_v18 = vpop.xlane.xlu1 %6322 }
 0x89f   : > { %v6324_v4 = vsel %vm5148_vm2, %v6319_v41, %v6323_v18 }
 0x8a0   : > { %v6325_v50 = vmul.f32 0.015625, %v6324_v4 }
 0x8a2   : > { %v6326_v47 = vadd.f32 1e-05, %v6325_v50  ;;  %v10952_v50 = vld [vmem:[#allocation7 + $0x70] sm:$0xff]  }
 0x8a4   : > { %9763 = vrsqrt.f32 %v6326_v47  ;;  %v10954_v47 = vld [vmem:[#allocation7 + $0xf0] sm:$0xff]  }
 0x8ae   : > { %v9764_v24 = vpop.eup %9763 }
 0x8af   : > { %v6328_v53 = vmul.f32 %v9764_v24, %v6314_v20  ;;  %v10931_v20 = vld [vmem:[#allocation7 + $0x20] sm:$0xff]  }
 0x8b0   : > { %8385 = vmatpush3.bf16.msra.mxu0 %v10931_v20 }
 0x8b1   : > { %v6332_v14 = vmul.f32 %v6330_v52, %v6328_v53  ;;  %8386 = vmatprep.subr.bf16.mxu0 %v10937_v40  ;;  %v10956_v52 = vld [vmem:[#allocation7 + $0x30] sm:$0xff]  }
 0x8b2   : > { %v10958_v53 = vld [vmem:[#allocation7 + $0xb0] sm:$0xff]  }
 0x8b3   : > { %v6335_v33 = vadd.f32 %v6333_v60, %v6332_v14  ;;  %11221 = vst [vmem:[#allocation23_spill] sm:$0xff] %v10958_v53  ;;  %v10962_v60 = vld [vmem:[#allocation7 + $0x78] sm:$0xff]  }
 0x8b4   : > { %8387 = vmatpush3.bf16.msra.mxu0 %v10943_v16  ;;  %v10964_v14 = vld [vmem:[#allocation7 + $0xf8] sm:$0xff]  }
 0x8b5   : > { %v6336_v37 = vpack.c.bf16 %v6335_v33, %v6335_v33  ;;  %8388 = vmatprep.subr.bf16.mxu0 %v10952_v50  ;;  %11222 = vst [vmem:[#allocation28_spill] sm:$0xff] %v10964_v14  ;;  %v10967_v33 = vld [vmem:[#allocation7 + $0x38] sm:$0xff]  }
 0x8b7   : > { %8534 = vmatmul.mubr.bf16.vlgmr.msra.gmra.mrb[28].mxu1 %v6336_v37  ;;  %v10971_v37 = vld [vmem:[#allocation7 + $0xb8] sm:$0xff]  }
 0x8b8   : > { %8399 = vmatpush3.bf16.msra.mxu1 %v10885_v54  ;;  %8389 = vmatpush3.bf16.msra.mxu0 %v10956_v52  ;;  %11223 = vst [vmem:[#allocation29_spill] sm:$0xff] %v10971_v37 }
 0x8b9   : > { %8400 = vmatprep.subr.bf16.mxu1 %v10889_v2  ;;  %8390 = vmatprep.subr.bf16.mxu0 %v10962_v60 }
 0x8bc   : > { %8401 = vmatpush3.bf16.msra.mxu1 %v10897_v39  ;;  %8391 = vmatpush3.bf16.msra.mxu0 %v10967_v33 }
 0x8bd   : > { %8402 = vmatprep.subr.bf16.mxu1 %v10903_v38 }
 0x8c0   : > { %8403 = vmatpush3.bf16.msra.mxu1 %v10909_v51 }
 0x8c1   : > { %8404 = vmatprep.subr.bf16.mxu1 %v10915_v63 }
 0x8c4   : > { %8405 = vmatpush3.bf16.msra.mxu1 %v10921_v15 }
 0x8c5   : > { %8406 = vmatprep.subr.bf16.mxu1 %v10927_v43 }
 0x8c8   : > { %8407 = vmatpush3.bf16.msra.mxu1 %v10933_v44 }
 0x8c9   : > { %8408 = vmatprep.subr.bf16.mxu1 %v10939_v21 }
 0x8cc   : > { %8409 = vmatpush3.bf16.msra.mxu1 %v10945_v35 }
 0x8cd   : > { %8410 = vmatprep.subr.bf16.mxu1 %v10954_v47 }
 0x8d0   : > { %8411 = vmatpush3.bf16.msra.mxu1 %v10958_v53 }
 0x8d1   : > { %8412 = vmatprep.subr.bf16.mxu1 %v10964_v14 }
 0x8d4   : > { %8413 = vmatpush3.bf16.msra.mxu1 %v10971_v37 }
 0x8d5   : > { %8442 = vmatprep.subr.bf16.mxu1 %v10879_v23 }
 0x98a   : > { %v6437_v22 = vpop.f32.mrb[28].mxu1 }
 0x98b   : > { %v6438_v10 = vadd.f32 %v6437_v22, %v6401_v11  ;;  %v8535_v48 = vpop.f32.mrb[29].mxu1  ;;  %v11224_v11 = vmov 1   ;;  %v10978_v22 = vld [vmem:[#allocation7 + $0x140] sm:$0xff]  }
 0x98c   : > { %v6440_v29 = vpop.f32.mrb[30].mxu1  ;;  %8420 = vmatprep.subr.bf16.mxu0 %v10978_v22 }
 0x98d   : > { %v8109_v46 = vmul.f32 -1.442695, %v6438_v10  ;;  %v8536_v27 = vpop.f32.mrb[31].mxu1 }
 0x98f   : > { %9765 = vpow2.f32 %v8109_v46 }
 0x999   : > { %v9766_v41 = vpop.eup %9765 }
 0x99a   : > { %v6446_v18 = vadd.f32 1.0, %v9766_v41 }
 0x99c   : > { %9767 = vrcp.f32 %v6446_v18 }
 0x9a6   : > { %v9768_v4 = vpop.eup %9767 }
 0x9a7   : > { %6463 = vperm.xlu0 %8695, %v9768_v4   ;;  %v6449_v24 = vsub.f32 1.0, %v9768_v4 }
 0x9a9   : > { %6452 = vperm.xlu1 %8698, %v6449_v24  }
 0x9ab   : > { %8700 = vset.pattern.permute.xlu0 %v11224_v11 }
 0x9ad   : > { %8699 = vset.pattern.permute.xlu1 %v11224_v11 }
 0x9ae   : > { %6479 = vperm.xlu1 %8699, %v6449_v24  }
 0x9b2   : > { %6489 = vperm.xlu1 %8699, %v9768_v4  }
 0xa26   : > { %v10982_v10 = vpop.permute.xlu0 %6463 }
 0xa27   : > { %v6467_v29 = vmul.f32 %v10778_v32, %v10982_v10  ;;  %v6469_v46 = vmul.f32 %v10781_v6, %v10982_v10  ;;  %v6466_v27 = vmul.f32 %v10798_v0, %v10982_v10  ;;  %v6468_v41 = vmul.f32 %v10800_v49, %v10982_v10  ;;  %v11008_v49 = vld [vmem:[#allocation7 + $0x100] sm:$0xff]  }
 0xa28   : > { %v10984_v48 = vpop.permute.xlu1 %6452  ;;  %v6471_v1 = vmul.f32 %v10812_v34, %v10982_v10 }
 0xa29   : > { %v6456_v23 = vmul.f32 %v10984_v48, %v10628_v58  ;;  %v6458_v18 = vmul.f32 %v10984_v48, %v10630_v8  ;;  %v6455_v4 = vmul.f32 %v10984_v48, %v10624_v17  ;;  %v6457_v24 = vmul.f32 %v10984_v48, %v10626_v31  ;;  %v11010_v31 = vld [vmem:[#allocation7 + $0x148] sm:$0xff]  }
 0xa2a   : > { %v6460_v11 = vmul.f32 %v10984_v48, %v10648_v7 }
 0xa2b   : > { %v6473_v13 = vadd.f32 %v6467_v29, %v6456_v23  ;;  %v6475_v9 = vadd.f32 %v6469_v46, %v6458_v18  ;;  %v6472_v37 = vadd.f32 %v6466_v27, %v6455_v4  ;;  %v6474_v14 = vadd.f32 %v6468_v41, %v6457_v24  ;;  %v11016_v29 = vld [vmem:[#allocation7 + $0x108] sm:$0xff]  }
 0xa2c   : > { %v6477_v58 = vadd.f32 %v6471_v1, %v6460_v11 }
 0xa2d   : > { %v11006_v57 = vpop.permute.xlu1 %6479  ;;  %v6505_v8 = vpack.c.bf16 %v6473_v13, %v6473_v13  ;;  %v6507_v53 = vpack.c.bf16 %v6475_v9, %v6475_v9  ;;  %v6504_v12 = vpack.c.bf16 %v6472_v37, %v6472_v37  ;;  %v6506_v17 = vpack.c.bf16 %v6474_v14, %v6474_v14  ;;  %v11019_v9 = vld [vmem:[#allocation7 + $0x150] sm:$0xff]   ;;  %v11032_v37 = vld [vmem:[#allocation7 + $0x158] sm:$0xff]  }
 0xa2e   : > { %v6509_v7 = vpack.c.bf16 %v6477_v58, %v6477_v58  ;;  %v6483_v13 = vmul.f32 %v11006_v57, %v10659_v55  ;;  %v11036_v55 = vld [vmem:[#allocation7 + $0x118] sm:$0xff]  }
 0xa2f   : > { %6926 = vmatprep.mubr.bf16.mxu0 %v6505_v8  ;;  %6966 = vmatprep.mubr.bf16.mxu1 %v6507_v53 }
 0xa30   : > { %6927 = vmatmul.mubr.bf16.vlgmr.msra.gmra.mrb[32].mxu0 %v6504_v12  ;;  %6967 = vmatmul.mubr.bf16.vlgmr.msra.gmra.mrb[32].mxu1 %v6506_v17 }
 0xa31   : > { %8421 = vmatpush3.bf16.msra.mxu0 %v11008_v49  ;;  %8443 = vmatpush3.bf16.msra.mxu1 %v10883_v30  ;;  %v11014_v1 = vpop.permute.xlu1 %6489  ;;  %v11028_v30 = vld [vmem:[#allocation7 + $0x110] sm:$0xff]  }
 0xa32   : > { %7006 = vmatprep.mubr.bf16.mxu0 %v6509_v7  ;;  %8422 = vmatprep.subr.bf16.mxu0 %v11010_v31  ;;  %v6493_v12 = vmul.f32 %v10778_v32, %v11014_v1  ;;  %v9715_v32 = vld [vmem:[#allocation7 + $0x160] sm:$0xff]   ;;  %v6492_v46 = vmul.f32 %v10798_v0, %v11014_v1  ;;  %v6497_v27 = vmul.f32 %v10812_v34, %v11014_v1 }
 0xa33   : > { %8444 = vmatprep.subr.bf16.mxu1 %v10887_v45  ;;  %v9716_v45 = vld [vmem:[#allocation7 + $0x120] sm:$0xff]  }
 0xa34   : > { %v6499_v53 = vadd.f32 %v6493_v12, %v6483_v13 }
 0xa35   : > { %8423 = vmatpush3.bf16.msra.mxu0 %v11016_v29  ;;  %8445 = vmatpush3.bf16.msra.mxu1 %v10895_v36  ;;  %v9717_v36 = vld [vmem:[#allocation7 + $0x168] sm:$0xff]  }
 0xa36   : > { %8424 = vmatprep.subr.bf16.mxu0 %v11019_v9  ;;  %8446 = vmatprep.subr.bf16.mxu1 %v10901_v28  ;;  %v7015_v14 = vpack.c.bf16 %v6499_v53, %v6499_v53  ;;  %v9718_v28 = vld [vmem:[#allocation7 + $0x128] sm:$0xff]  }
 0xa38   : > { %7052 = vmatprep.mubr.bf16.mxu1 %v7015_v14 }
 0xa39   : > { %8425 = vmatpush3.bf16.msra.mxu0 %v11028_v30  ;;  %8447 = vmatpush3.bf16.msra.mxu1 %v10907_v62  ;;  %v9719_v62 = vld [vmem:[#allocation7 + $0x170] sm:$0xff]  }
 0xa3a   : > { %8426 = vmatprep.subr.bf16.mxu0 %v11032_v37  ;;  %8448 = vmatprep.subr.bf16.mxu1 %v10913_v3  ;;  %v9720_v3 = vld [vmem:[#allocation7 + $0x130] sm:$0xff]  }
 0xa3d   : > { %8427 = vmatpush3.bf16.msra.mxu0 %v11036_v55  ;;  %8449 = vmatpush3.bf16.msra.mxu1 %v10919_v56  ;;  %v9721_v56 = vld [vmem:[#allocation7 + $0x178] sm:$0xff]  }
 0xa3e   : > { %8428 = vmatprep.subr.bf16.mxu0 %v9715_v32  ;;  %8450 = vmatprep.subr.bf16.mxu1 %v10925_v5  ;;  %v6459_v5 = vmul.f32 %v10984_v48, %v10713_v19  ;;  %v6485_v19 = vmul.f32 %v11006_v57, %v10718_v61 }
 0xa41   : > { %8429 = vmatpush3.bf16.msra.mxu0 %v9716_v45  ;;  %8451 = vmatpush3.bf16.msra.mxu1 %v10931_v20  ;;  %v6495_v20 = vmul.f32 %v10781_v6, %v11014_v1 }
 0xa42   : > { %8430 = vmatprep.subr.bf16.mxu0 %v9717_v36  ;;  %8452 = vmatprep.subr.bf16.mxu1 %v10937_v40  ;;  %v6470_v40 = vmul.f32 %v10810_v42, %v10982_v10  ;;  %v6487_v10 = vmul.f32 %v11006_v57, %v10721_v26  ;;  %v11225_v26 = vld [vmem:[#allocation20_spill] sm:$0xff] }
 0xa43   : > { %v6501_v48 = vadd.f32 %v6495_v20, %v6485_v19 }
 0xa44   : > { %v6476_v6 = vadd.f32 %v6470_v40, %v6459_v5 }
 0xa45   : > { %8431 = vmatpush3.bf16.msra.mxu0 %v9718_v28  ;;  %8453 = vmatpush3.bf16.msra.mxu1 %v10943_v16  ;;  %v6482_v16 = vmul.f32 %v11006_v57, %v10716_v25  ;;  %v6503_v25 = vadd.f32 %v6497_v27, %v6487_v10  ;;  %v7017_v61 = vpack.c.bf16 %v6501_v48, %v6501_v48 }
 0xa46   : > { %8432 = vmatprep.subr.bf16.mxu0 %v9719_v62  ;;  %8454 = vmatprep.subr.bf16.mxu1 %v10952_v50  ;;  %v9722_v50 = vld [vmem:[#allocation7 + $0x138] sm:$0xff]   ;;  %v6508_v34 = vpack.c.bf16 %v6476_v6, %v6476_v6 }
 0xa47   : > { %v6498_v0 = vadd.f32 %v6492_v46, %v6482_v16 }
 0xa49   : > { %8433 = vmatpush3.bf16.msra.mxu0 %v9720_v3  ;;  %8455 = vmatpush3.bf16.msra.mxu1 %v10956_v52  ;;  %v7014_v41 = vpack.c.bf16 %v6498_v0, %v6498_v0  ;;  %v7019_v52 = vpack.c.bf16 %v6503_v25, %v6503_v25 }
 0xa4a   : > { %8434 = vmatprep.subr.bf16.mxu0 %v9721_v56  ;;  %8456 = vmatprep.subr.bf16.mxu1 %v10962_v60 }
 0xa4d   : > { %8435 = vmatpush3.bf16.msra.mxu0 %v9722_v50  ;;  %8457 = vmatpush3.bf16.msra.mxu1 %v10967_v33 }
 0xa4e   : > { %8464 = vmatprep.subr.bf16.mxu0 %v10881_v59  ;;  %8486 = vmatprep.subr.bf16.mxu1 %v10978_v22  ;;  %v6496_v59 = vmul.f32 %v10810_v42, %v11014_v1 }
 0xa50   : > { %7007 = vmatmul.mubr.bf16.vlgmr.msra.gmra.mrb[36].mxu0 %v6508_v34  ;;  %7053 = vmatmul.mubr.bf16.vlgmr.msra.gmra.mrb[36].mxu1 %v7014_v41  ;;  %v9723_v34 = vld [vmem:[#allocation9] sm:$0xff]   ;;  %v9724_v41 = vld [vmem:[#allocation9 + $0x8] sm:$0xff]  }
 0xa51   : > { %8465 = vmatpush3.bf16.msra.mxu0 %v10885_v54  ;;  %7092 = vmatprep.mubr.bf16.mxu0 %v7017_v61  ;;  %v11226_v54 = vld [vmem:[#allocation26_spill] sm:$0xff] }
 0xa52   : > { %8487 = vmatpush3.bf16.msra.mxu1 %v11008_v49  ;;  %7132 = vmatprep.mubr.bf16.mxu1 %v7019_v52  ;;  %v6494_v49 = vmul.f32 %v11225_v26, %v11014_v1 }
 0xa53   : > { %8466 = vmatprep.subr.bf16.mxu0 %v10889_v2  ;;  %8488 = vmatprep.subr.bf16.mxu1 %v11010_v31  ;;  %v6484_v2 = vmul.f32 %v11006_v57, %v11226_v54 }
 0xa55   : > { %8467 = vmatpush3.bf16.msra.mxu0 %v10897_v39  ;;  %v11227_v39 = vld [vmem:[#allocation23_spill] sm:$0xff] }
 0xa56   : > { %8489 = vmatpush3.bf16.msra.mxu1 %v11016_v29  ;;  %8468 = vmatprep.subr.bf16.mxu0 %v10903_v38  ;;  %v11228_v38 = vld [vmem:[#allocation27_spill] sm:$0xff] }
 0xa57   : > { %8490 = vmatprep.subr.bf16.mxu1 %v11019_v9 }
 0xa59   : > { %8469 = vmatpush3.bf16.msra.mxu0 %v10909_v51  ;;  %v6486_v51 = vmul.f32 %v11006_v57, %v11228_v38 }
 0xa5a   : > { %8491 = vmatpush3.bf16.msra.mxu1 %v11028_v30  ;;  %8470 = vmatprep.subr.bf16.mxu0 %v10915_v63  ;;  %v11229_v63 = vld [vmem:[#allocation28_spill] sm:$0xff] }
 0xa5b   : > { %8492 = vmatprep.subr.bf16.mxu1 %v11032_v37 }
 0xa5d   : > { %8471 = vmatpush3.bf16.msra.mxu0 %v10921_v15  ;;  %v6500_v15 = vadd.f32 %v6494_v49, %v6484_v2 }
 0xa5e   : > { %8493 = vmatpush3.bf16.msra.mxu1 %v11036_v55  ;;  %8472 = vmatprep.subr.bf16.mxu0 %v10927_v43  ;;  %v6502_v43 = vadd.f32 %v6496_v59, %v6486_v51 }
 0xa5f   : > { %8494 = vmatprep.subr.bf16.mxu1 %v9715_v32 }
 0xa60   : > { %v7018_v42 = vpack.c.bf16 %v6502_v43, %v6502_v43  ;;  %v9727_v43 = vld [vmem:[#allocation9 + $0x20] sm:$0xff]  }
 0xa61   : > { %8473 = vmatpush3.bf16.msra.mxu0 %v10933_v44  ;;  %v11230_v44 = vld [vmem:[#allocation29_spill] sm:$0xff] }
 0xa62   : > { %8495 = vmatpush3.bf16.msra.mxu1 %v9716_v45  ;;  %8474 = vmatprep.subr.bf16.mxu0 %v10939_v21  ;;  %v7016_v21 = vpack.c.bf16 %v6500_v15, %v6500_v15  ;;  %v9726_v15 = vld [vmem:[#allocation9 + $0x18] sm:$0xff]  }
 0xa63   : > { %8496 = vmatprep.subr.bf16.mxu1 %v9717_v36 }
 0xa65   : > { %8475 = vmatpush3.bf16.msra.mxu0 %v10945_v35  ;;  %v11231_v35 = vmov 0.0  }
 0xa66   : > { %8497 = vmatpush3.bf16.msra.mxu1 %v9718_v28  ;;  %8476 = vmatprep.subr.bf16.mxu0 %v10954_v47 }
 0xa67   : > { %8498 = vmatprep.subr.bf16.mxu1 %v9719_v62 }
 0xa69   : > { %8477 = vmatpush3.bf16.msra.mxu0 %v11227_v39 }
 0xa6a   : > { %8499 = vmatpush3.bf16.msra.mxu1 %v9720_v3  ;;  %8478 = vmatprep.subr.bf16.mxu0 %v11229_v63  ;;  %v9725_v63 = vld [vmem:[#allocation9 + $0x10] sm:$0xff]  }
 0xa6b   : > { %8500 = vmatprep.subr.bf16.mxu1 %v9721_v56 }
 0xa6d   : > { %8479 = vmatpush3.bf16.msra.mxu0 %v11230_v44  ;;  %v9728_v44 = vld [vmem:[#allocation9 + $0x28] sm:$0xff]  }
 0xa6e   : > { %8501 = vmatpush3.bf16.msra.mxu1 %v9722_v50  ;;  %8537 = vmatprep.subr.bf16.mxu0 %v11231_v35 }
 0xa70   : > { %7093 = vmatmul.mubr.bf16.vlgmr.msra.gmra.mrb[40].mxu0 %v7016_v21  ;;  %v9729_v21 = vld [vmem:[#allocation9 + $0x30] sm:$0xff]  }
 0xa71   : > { %7133 = vmatmul.mubr.bf16.vlgmr.msra.gmra.mrb[40].mxu1 %v7018_v42  ;;  %8553 = vmatprep.mubr.msk.bf16.mxu0 %vm9981_vm5, %v11231_v35  ;;  %v9730_v42 = vld [vmem:[#allocation9 + $0x38] sm:$0xff]  }
 0xa72   : > { %8538 = vmatpush3.bf16.msra.mxu0 %v9723_v34 }
 0xa73   : > { %8539 = vmatprep.subr.bf16.mxu0 %v11231_v35 }
 0xa76   : > { %8540 = vmatpush3.bf16.msra.mxu0 %v9724_v41 }
 0xa77   : > { %8541 = vmatprep.subr.bf16.mxu0 %v11231_v35 }
 0xa7a   : > { %8542 = vmatpush3.bf16.msra.mxu0 %v9725_v63 }
 0xa7b   : > { %8543 = vmatprep.subr.bf16.mxu0 %v11231_v35 }
 0xa7e   : > { %8544 = vmatpush3.bf16.msra.mxu0 %v9726_v15 }
 0xa7f   : > { %8545 = vmatprep.subr.bf16.mxu0 %v11231_v35 }
 0xa82   : > { %8546 = vmatpush3.bf16.msra.mxu0 %v9727_v43 }
 0xa83   : > { %8547 = vmatprep.subr.bf16.mxu0 %v11231_v35 }
 0xa86   : > { %8548 = vmatpush3.bf16.msra.mxu0 %v9728_v44 }
 0xa87   : > { %8549 = vmatprep.subr.bf16.mxu0 %v11231_v35 }
 0xa8a   : > { %8550 = vmatpush3.bf16.msra.mxu0 %v9729_v21 }
 0xa8b   : > { %8551 = vmatprep.subr.bf16.mxu0 %v11231_v35 }
 0xa8e   : > { %8552 = vmatpush3.bf16.msra.mxu0 %v9730_v42 }
 0xb03   : > { %v8392_v47 = vpop.f32.mrb[32].mxu0  ;;  %v8414_v57 = vpop.f32.mrb[32].mxu1 }
 0xb04   : > { %v8393_v60 = vpop.f32.mrb[33].mxu0  ;;  %v8415_v33 = vpop.f32.mrb[33].mxu1 }
 0xb05   : > { %v8394_v22 = vadd.f32 %v8393_v60, %v8392_v47  ;;  %v8416_v23 = vadd.f32 %v8415_v33, %v8414_v57  ;;  %v8395_v18 = vpop.f32.mrb[34].mxu0  ;;  %v8417_v4 = vpop.f32.mrb[34].mxu1 }
 0xb06   : > { %v8396_v24 = vpop.f32.mrb[35].mxu0  ;;  %v8418_v11 = vpop.f32.mrb[35].mxu1 }
 0xb07   : > { %v6969_v58 = vadd.f32 %v8416_v23, %v8394_v22  ;;  %v11233_v23 = vld [vmem:[#allocation22_spill] sm:$0xff] }
 0xb08   : > { %v7172_v18 = vrot.slane %v11233_v23, 4  ;;  %v7175_v11 = vrot.slane %v11233_v23, 5 }
 0xb23   : > { %v8436_v8 = vpop.f32.mrb[36].mxu0  ;;  %v8458_v17 = vpop.f32.mrb[36].mxu1 }
 0xb24   : > { %v8437_v31 = vpop.f32.mrb[37].mxu0  ;;  %v8459_v7 = vpop.f32.mrb[37].mxu1 }
 0xb25   : > { %v8438_v1 = vadd.f32 %v8437_v31, %v8436_v8  ;;  %v8460_v29 = vadd.f32 %v8459_v7, %v8458_v17  ;;  %v8439_v9 = vpop.f32.mrb[38].mxu0  ;;  %v8461_v13 = vpop.f32.mrb[38].mxu1 }
 0xb26   : > { %v8440_v12 = vpop.f32.mrb[39].mxu0  ;;  %v8462_v53 = vpop.f32.mrb[39].mxu1 }
 0xb27   : > { %v7009_v30 = vadd.f32 %v8438_v1, %v6969_v58 }
 0xb43   : > { %v8480_v14 = vpop.f32.mrb[40].mxu0 }
 0xb44   : > { %v8502_v37 = vpop.f32.mrb[40].mxu1  ;;  %v8481_v55 = vpop.f32.mrb[41].mxu0 }
 0xb45   : > { %v8482_v32 = vadd.f32 %v8481_v55, %v8480_v14  ;;  %v8503_v45 = vpop.f32.mrb[41].mxu1  ;;  %v8483_v36 = vpop.f32.mrb[42].mxu0 }
 0xb46   : > { %v8504_v28 = vadd.f32 %v8503_v45, %v8502_v37  ;;  %v8505_v62 = vpop.f32.mrb[42].mxu1  ;;  %v8484_v3 = vpop.f32.mrb[43].mxu0 }
 0xb47   : > { %v7095_v56 = vadd.f32 %v8482_v32, %v8460_v29  ;;  %v8506_v5 = vpop.f32.mrb[43].mxu1 }
 0xb49   : > { %v7135_v46 = vadd.f32 %v8504_v28, %v7095_v56 }
 0xb4b   : > { %v7140_v40 = vsel %vm5148_vm2, %v7009_v30, %v7135_v46 }
 0xb4c   : > { %v7142_v16 = vmin.f32 %v7140_v40, 0.0  ;;  %vm7141_vm6 = vcmp.gt.f32.partialorder %v7140_v40, 0.0 }
 0xb4e   : > { %v7143_v27 = vmul.f32 1.442695, %v7142_v16 }
 0xb50   : > { %9769 = vpow2.f32 %v7143_v27 }
 0xb5a   : > { %v9770_v50 = vpop.eup %9769 }
 0xb5b   : > { %v8158_v19 = vadd.f32 -1.0, %v9770_v50 }
 0xb5d   : > { %v7146_v6 = vsel %vm7141_vm6, %v7140_v40, %v8158_v19 }
 0xb5e   : > { %v7151_v0 = vsel %vm5148_vm2, 0.0, %v7146_v6  ;;  %v7147_v10 = vsel %vm5148_vm2, %v7146_v6, 0.0 }
 0xb5f   : > { %v7152_v48 = vsel %vm6304_vm4, %v7151_v0, 0.0  ;;  %v7148_v25 = vsel %vm6304_vm4, %v7147_v10, 0.0 }
 0xb60   : > { %7153 = vadd.xlane.f32.xlu0 %v7152_v48  ;;  %7149 = vadd.xlane.f32.xlu1 %v7148_v25 }
 0xbed   : > { %v7154_v61 = vpop.xlane.xlu0 %7153  ;;  %v7150_v52 = vpop.xlane.xlu1 %7149 }
 0xbee   : > { %v7155_v26 = vsel %vm5148_vm2, %v7150_v52, %v7154_v61 }
 0xbef   : > { %v7156_v49 = vmul.f32 0.015625, %v7155_v26 }
 0xbf1   : > { %v7157_v59 = vsub.f32 %v7146_v6, %v7156_v49 }
 0xbf3   : > { %v7158_v54 = vmul.f32 %v7157_v59, %v7157_v59 }
 0xbf5   : > { %v7163_v2 = vsel %vm5148_vm2, 0.0, %v7158_v54  ;;  %v7159_v39 = vsel %vm5148_vm2, %v7158_v54, 0.0 }
 0xbf6   : > { %v7164_v38 = vsel %vm6304_vm4, %v7163_v2, 0.0  ;;  %v7160_v51 = vsel %vm6304_vm4, %v7159_v39, 0.0 }
 0xbf7   : > { %7165 = vadd.xlane.f32.xlu0 %v7164_v38  ;;  %7161 = vadd.xlane.f32.xlu1 %v7160_v51 }
 0xc84   : > { %v7166_v47 = vpop.xlane.xlu0 %7165  ;;  %v7162_v57 = vpop.xlane.xlu1 %7161 }
 0xc85   : > { %v7167_v60 = vsel %vm5148_vm2, %v7162_v57, %v7166_v47 }
 0xc86   : > { %v7168_v33 = vmul.f32 0.015625, %v7167_v60 }
 0xc88   : > { %v7169_v22 = vadd.f32 1e-05, %v7168_v33 }
 0xc8a   : > { %9771 = vrsqrt.f32 %v7169_v22 }
 0xc94   : > { %v9772_v4 = vpop.eup %9771 }
 0xc95   : > { %v7171_v24 = vmul.f32 %v9772_v4, %v7157_v59 }
 0xc97   : > { %v7174_v58 = vmul.f32 %v7172_v18, %v7171_v24 }
 0xc99   : > { %v7177_v8 = vadd.f32 %v7175_v11, %v7174_v58 }
 0xc9b   : > { %v7178_v17 = vpack.c.bf16 %v7177_v8, %v7177_v8 }
 0xc9d   : > { %8554 = vmatmul.mubr.bf16.vlgmr.msra.gmra.mrb[44].mxu0 %v7178_v17 }
 0xd70   : > { %v7277_v35 = vpop.f32.mrb[44].mxu0 }
 0xd71   : > { %7283 = vst [vmem:[%s429_s21] sm:$0x1] %v7277_v35  ;;  %v8555_v31 = vpop.f32.mrb[45].mxu0 }
 0xd72   : > { %v7280_v7 = vpop.f32.mrb[46].mxu0 }
 0xd73   : > { %v8556_v1 = vpop.f32.mrb[47].mxu0 }
 0xd74 PF: > { %s23_s30 = sadd.s32 1, %s9966_s30  }
 0xd75   : > { %p20_p13 = scmp.ge.s32.totalorder %s23_s30, 4  }
 0xd77   :  { %22 = sbr.rel (!%p20_p13) target bundleno = 4 (0x4), region = 119 }
 0xd7e   :  { %7301 = vsyncpa [#allocation3], 1 }
 0xd7f   :  { %7303 = vsyncpa [#allocation3 + $0x1], 1 }
 0xd80   :  { %7304 = vsyncpa [#allocation5], 1 }
 0xd81   :  { %7305 = vsyncpa [#allocation8], 1 }
 0xd82   :  { %7306 = vsyncpa [#allocation11], 1 }

</bundles_post_ra>
